<compile_context>
chip_gen: v7x
topology: tpu7x:2x2x1
jax: 0.10.0
libtpu: 0.0.40
codegen_flags: <defaults>
</compile_context>

<pallas_src>
import jax
import jax.numpy as jnp
from jax.experimental import pallas as pl
from jax.experimental.pallas import tpu as pltpu

NEG_SLOPE = 0.2
BN_EPS = 1e-5


def _leaky(y):
    return jnp.where(y > 0, y, NEG_SLOPE * y)


# ----------------------------------------------------------------------------
# Pallas kernels
# ----------------------------------------------------------------------------
def _matmul_leaky_kernel(x_ref, w_ref, o_ref):
    # y = x @ w ; LeakyReLU(0.2) — tiled over rows, lane-dense (N=128) output.
    y = jnp.dot(x_ref[...], w_ref[...], preferred_element_type=jnp.float32)
    o_ref[...] = _leaky(y).astype(o_ref.dtype)


def _matmul_bn_leaky_kernel(x_ref, w_ref, g_ref, b_ref, o_ref, acc_ref):
    # Tiled matmul over rows; un-normalized result accumulates into a resident
    # f32 VMEM scratch.  BatchNorm (training-mode, biased var) + LeakyReLU run
    # once, in the last grid step, on the full resident result.
    m = pl.program_id(0)
    tm = x_ref.shape[0]
    y = jnp.dot(x_ref[...], w_ref[...], preferred_element_type=jnp.float32)
    start = pl.multiple_of(m * tm, tm)
    acc_ref[pl.ds(start, tm), :] = y

    @pl.when(m == pl.num_programs(0) - 1)
    def _():
        ya = acc_ref[...]
        mean = jnp.mean(ya, axis=0, keepdims=True)
        d = ya - mean
        var = jnp.mean(d * d, axis=0, keepdims=True)
        yn = d * jax.lax.rsqrt(var + BN_EPS) * g_ref[...] + b_ref[...]
        o_ref[...] = _leaky(yn).astype(o_ref.dtype)


def _matmul_bn_leaky_sigmoid_head_kernel(x_ref, w_ref, g_ref, b_ref, w4_ref,
                                         o_ref, acc_ref):
    # Layer 3 (matmul + BN + LeakyReLU) with layer 4 fused into the epilogue:
    # Conv(256->1, k4, s1, p0) on a 4x4 map == full (hw, c) reduction per image.
    m = pl.program_id(0)
    tm = x_ref.shape[0]
    y = jnp.dot(x_ref[...], w_ref[...], preferred_element_type=jnp.float32)
    start = pl.multiple_of(m * tm, tm)
    acc_ref[pl.ds(start, tm), :] = y

    @pl.when(m == pl.num_programs(0) - 1)
    def _():
        ya = acc_ref[...]
        mean = jnp.mean(ya, axis=0, keepdims=True)
        d = ya - mean
        var = jnp.mean(d * d, axis=0, keepdims=True)
        yn = _leaky(d * jax.lax.rsqrt(var + BN_EPS) * g_ref[...] + b_ref[...])
        batch = o_ref.shape[0]
        hw = w4_ref.shape[0]
        n = yn.shape[-1]
        y3 = yn.reshape(batch, hw, n)                       # rows are (b, ho, wo)
        s = jnp.sum(y3 * w4_ref[...][None, :, :], axis=2)   # [B, hw]
        s = jnp.sum(s, axis=1, keepdims=True)               # [B, 1]
        o_ref[...] = jax.nn.sigmoid(s).astype(o_ref.dtype)


# ----------------------------------------------------------------------------
# Pallas wrappers
# ----------------------------------------------------------------------------
def _pick_tile(m, target=256):
    t = min(target, m)
    while m % t:
        t -= 8
        if t <= 0:
            return m
    return t


def conv_leaky(patches, w, tm=256):
    """patches: [M, K] bf16, w: [K, N] bf16 -> leaky(patches @ w) as bf16."""
    M, K = patches.shape
    N = w.shape[1]
    tm = _pick_tile(M, tm)
    return pl.pallas_call(
        _matmul_leaky_kernel,
        out_shape=jax.ShapeDtypeStruct((M, N), jnp.bfloat16),
        grid=(M // tm,),
        in_specs=[
            pl.BlockSpec((tm, K), lambda m: (m, 0)),
            pl.BlockSpec((K, N), lambda m: (0, 0)),
        ],
        out_specs=pl.BlockSpec((tm, N), lambda m: (m, 0)),
        compiler_params=pltpu.CompilerParams(dimension_semantics=("parallel",)),
        cost_estimate=pl.CostEstimate(
            flops=2 * M * K * N, transcendentals=0,
            bytes_accessed=2 * (M * K + K * N + M * N)),
    )(patches, w)


def conv_bn_leaky(patches, w, gamma, beta, tm=256):
    """Tiled matmul + exact-batch-stats BN + LeakyReLU (resident f32 scratch)."""
    M, K = patches.shape
    N = w.shape[1]
    tm = _pick_tile(M, tm)
    return pl.pallas_call(
        _matmul_bn_leaky_kernel,
        out_shape=jax.ShapeDtypeStruct((M, N), jnp.bfloat16),
        grid=(M // tm,),
        in_specs=[
            pl.BlockSpec((tm, K), lambda m: (m, 0)),
            pl.BlockSpec((K, N), lambda m: (0, 0)),
            pl.BlockSpec((1, N), lambda m: (0, 0)),
            pl.BlockSpec((1, N), lambda m: (0, 0)),
        ],
        out_specs=pl.BlockSpec((M, N), lambda m: (0, 0)),
        scratch_shapes=[pltpu.VMEM((M, N), jnp.float32)],
        compiler_params=pltpu.CompilerParams(dimension_semantics=("arbitrary",)),
        cost_estimate=pl.CostEstimate(
            flops=2 * M * K * N, transcendentals=N,
            bytes_accessed=2 * (M * K + K * N + M * N) + 8 * N),
    )(patches, w, gamma, beta)


def conv_bn_leaky_sigmoid_head(patches, w, gamma, beta, w4, batch, tm=256):
    """Layer 3 matmul+BN+LeakyReLU with the layer-4 reduction+sigmoid fused."""
    M, K = patches.shape
    N = w.shape[1]
    hw = M // batch
    tm = _pick_tile(M, tm)
    return pl.pallas_call(
        _matmul_bn_leaky_sigmoid_head_kernel,
        out_shape=jax.ShapeDtypeStruct((batch, 1), jnp.float32),
        grid=(M // tm,),
        in_specs=[
            pl.BlockSpec((tm, K), lambda m: (m, 0)),
            pl.BlockSpec((K, N), lambda m: (0, 0)),
            pl.BlockSpec((1, N), lambda m: (0, 0)),
            pl.BlockSpec((1, N), lambda m: (0, 0)),
            pl.BlockSpec((hw, N), lambda m: (0, 0)),
        ],
        out_specs=pl.BlockSpec((batch, 1), lambda m: (0, 0)),
        scratch_shapes=[pltpu.VMEM((M, N), jnp.float32)],
        compiler_params=pltpu.CompilerParams(dimension_semantics=("arbitrary",)),
        cost_estimate=pl.CostEstimate(
            flops=2 * M * K * N + 2 * M * N, transcendentals=N + batch,
            bytes_accessed=2 * (M * K + K * N) + 4 * (hw * N + batch)),
    )(patches, w, gamma, beta, w4)


# ----------------------------------------------------------------------------
# Glue: channels-last im2col (plain JAX, no big transposes)
# ----------------------------------------------------------------------------
def im2col_nhwc(x, k, stride, pad):
    """x: [B, H, W, C] -> ([B*Ho*Wo, k*k*C], Ho, Wo).
    Patch feature order = (kh, kw, C), matching the weight prep below."""
    B, H, W, C = x.shape
    if pad:
        x = jnp.pad(x, ((0, 0), (pad, pad), (pad, pad), (0, 0)))
    Ho = (H + 2 * pad - k) // stride + 1
    Wo = (W + 2 * pad - k) // stride + 1
    cols = []
    for ki in range(k):
        for kj in range(k):
            cols.append(
                x[:, ki:ki + stride * Ho:stride, kj:kj + stride * Wo:stride, :])
    patches = jnp.concatenate(cols, axis=-1)          # [B, Ho, Wo, k*k*C]
    return patches.reshape(B * Ho * Wo, k * k * C), Ho, Wo


# ----------------------------------------------------------------------------
# Parameter init (deterministic, DCGAN-style N(0, 0.02))
# ----------------------------------------------------------------------------
def init_params(key):
    k1, k2, k3, k4 = jax.random.split(key, 4)

    def conv_w(key, cout, cin, ksz=4):
        # PyTorch layout [Cout, Cin, kh, kw] -> [(kh, kw, Cin), Cout]
        w = 0.02 * jax.random.normal(key, (cout, cin, ksz, ksz), jnp.float32)
        return jnp.transpose(w, (2, 3, 1, 0)).reshape(ksz * ksz * cin, cout)

    w1 = conv_w(k1, 64, 3)                              # [48, 64]
    # lane-dense layer 1: zero-pad K 48->128 and N 64->128
    w1 = jnp.pad(w1, ((0, 128 - w1.shape[0]), (0, 128 - w1.shape[1])))

    w4 = 0.02 * jax.random.normal(k4, (1, 256, 4, 4), jnp.float32)
    # -> [hw=16, C=256], matching the (b, ho, wo) row order of layer-3 output
    w4 = jnp.transpose(w4[0], (1, 2, 0)).reshape(16, 256)

    return {
        "w1": w1.astype(jnp.bfloat16),                   # [128, 128]
        "w2": conv_w(k2, 128, 64).astype(jnp.bfloat16),  # [1024, 128]
        "w3": conv_w(k3, 256, 128).astype(jnp.bfloat16), # [2048, 256]
        "w4": w4,                                        # [16, 256] f32 (VPU)
        "gamma2": jnp.ones((1, 128), jnp.float32),
        "beta2": jnp.zeros((1, 128), jnp.float32),
        "gamma3": jnp.ones((1, 256), jnp.float32),
        "beta3": jnp.zeros((1, 256), jnp.float32),
    }


# ----------------------------------------------------------------------------
# Discriminator forward
# ----------------------------------------------------------------------------
@jax.jit
def discriminator_forward(params, x):
    B = x.shape[0]
    x = jnp.transpose(x, (0, 2, 3, 1)).astype(jnp.bfloat16)  # NCHW -> NHWC

    # layer 1: Conv(3->64, k4 s2 p1) + LeakyReLU(0.2), K padded 48->128
    p, Ho, Wo = im2col_nhwc(x, 4, 2, 1)                       # [B*256, 48]
    p = jnp.pad(p, ((0, 0), (0, 128 - p.shape[1])))
    y = conv_leaky(p, params["w1"])                           # [B*256, 128] bf16
    x = y[:, :64].reshape(B, Ho, Wo, 64)                      # drop N padding

    # layer 2: Conv(64->128, k4 s2 p1) + BN + LeakyReLU
    p, Ho, Wo = im2col_nhwc(x, 4, 2, 1)                       # [B*64, 1024]
    y = conv_bn_leaky(p, params["w2"], params["gamma2"], params["beta2"])
    x = y.reshape(B, Ho, Wo, 128)

    # layers 3+4: Conv(128->256, k4 s2 p1) + BN + LeakyReLU,
    #             Conv(256->1, k4 s1 p0) + Sigmoid fused in the epilogue
    p, Ho, Wo = im2col_nhwc(x, 4, 2, 1)                       # [B*16, 2048]
    out = conv_bn_leaky_sigmoid_head(p, params["w3"], params["gamma3"],
                                     params["beta3"], params["w4"], batch=B)
    return out.reshape(-1)                                    # .view(-1)


if __name__ == "__main__":
    key = jax.random.PRNGKey(0)
    pkey, xkey = jax.random.split(key)
    params = init_params(pkey)

    # DCGAN discriminator expects 32x32 here (32 -> 16 -> 8 -> 4 -> 1)
    x = jax.random.normal(xkey, (2, 3, 32, 32), dtype=jnp.float32)

    out = discriminator_forward(params, x)
    out = jax.block_until_ready(out)
    assert out.shape == (2,)
    assert bool(jnp.all(jnp.isfinite(out)))
    print("KERNEL_OK")
</pallas_src>

<mosaic_0001>
module attributes {stable_mosaic.version = 11 : i64} {
  func.func @_matmul_leaky_kernel(%arg0: i32, %arg1: memref<256x128xbf16, #tpu.memory_space<vmem>>, %arg2: memref<128x128xbf16, #tpu.memory_space<vmem>>, %arg3: memref<256x128xbf16, #tpu.memory_space<vmem>>) attributes {dimension_semantics = [#tpu.dimension_semantics<parallel>], iteration_bounds = array<i64: 2>, scalar_prefetch = 0 : i64, scratch_operands = 0 : i64, tpu.core_type = #tpu.core_type<tc>, window_params = [{transform_indices = @transform_0, window_bounds = array<i64: 256, 128>}, {pipeline_mode = #tpu.pipeline_mode<synchronous>, transform_indices = @transform_1, window_bounds = array<i64: 128, 128>}, {transform_indices = @transform_2, window_bounds = array<i64: 256, 128>}]} {
    %c0 = arith.constant 0 : index
    %c0_0 = arith.constant 0 : index
    %0 = vector.load %arg1[%c0, %c0_0] : memref<256x128xbf16, #tpu.memory_space<vmem>>, vector<256x128xbf16>
    %c0_1 = arith.constant 0 : index
    %c0_2 = arith.constant 0 : index
    %1 = vector.load %arg2[%c0_1, %c0_2] : memref<128x128xbf16, #tpu.memory_space<vmem>>, vector<128x128xbf16>
    %cst = arith.constant dense<0.000000e+00> : vector<256x128xf32>
    %2 = tpu.matmul %0, %1, %cst {dimension_numbers = #tpu.dot_dimension_numbers<[1], [0], [0], [1], [0, 0, 1, 1], [], []>} : vector<256x128xbf16>, vector<128x128xbf16>, vector<256x128xf32> -> vector<256x128xf32>
    %cst_3 = arith.constant 0.000000e+00 : f32
    %3 = vector.broadcast %cst_3 : f32 to vector<256x128xf32>
    %4 = arith.cmpf ogt, %2, %3 : vector<256x128xf32>
    %cst_4 = arith.constant 2.000000e-01 : f32
    %5 = vector.broadcast %cst_4 : f32 to vector<256x128xf32>
    %6 = arith.mulf %5, %2 : vector<256x128xf32>
    %7 = arith.select %4, %2, %6 : vector<256x128xi1>, vector<256x128xf32>
    %8 = arith.truncf %7 : vector<256x128xf32> to vector<256x128xbf16>
    %c0_5 = arith.constant 0 : index
    %c0_6 = arith.constant 0 : index
    %9 = vector.load %arg3[%c0_5, %c0_6] : memref<256x128xbf16, #tpu.memory_space<vmem>>, vector<256x128xbf16>
    tpu.vector_store %arg3[%c0_5, %c0_6], %8 {strides = array<i32>} : memref<256x128xbf16, #tpu.memory_space<vmem>>, vector<256x128xbf16>,
    return
  }
  func.func @transform_0(%arg0: i32) -> (i32, i32) {
    %c0_i32 = arith.constant 0 : i32
    %c0_i32_0 = arith.constant 0 : i32
    return %arg0, %c0_i32 : i32, i32
  }
  func.func @transform_1(%arg0: i32) -> (i32, i32) {
    %c0_i32 = arith.constant 0 : i32
    %c0_i32_0 = arith.constant 0 : i32
    %c0_i32_1 = arith.constant 0 : i32
    return %c0_i32, %c0_i32_0 : i32, i32
  }
  func.func @transform_2(%arg0: i32) -> (i32, i32) {
    %c0_i32 = arith.constant 0 : i32
    %c0_i32_0 = arith.constant 0 : i32
    return %arg0, %c0_i32 : i32, i32
  }
}

module attributes {stable_mosaic.version = 11 : i64} {
  func.func @_matmul_bn_leaky_kernel(%arg0: i32, %arg1: memref<128x1024xbf16, #tpu.memory_space<vmem>>, %arg2: memref<1024x128xbf16, #tpu.memory_space<vmem>>, %arg3: memref<1x128xf32, #tpu.memory_space<vmem>>, %arg4: memref<1x128xf32, #tpu.memory_space<vmem>>, %arg5: memref<128x128xbf16, #tpu.memory_space<vmem>>, %arg6: memref<128x128xf32, #tpu.memory_space<vmem>>) attributes {dimension_semantics = [#tpu.dimension_semantics<arbitrary>], iteration_bounds = array<i64: 1>, scalar_prefetch = 0 : i64, scratch_operands = 1 : i64, tpu.core_type = #tpu.core_type<tc>, window_params = [{transform_indices = @transform_0, window_bounds = array<i64: 128, 1024>}, {pipeline_mode = #tpu.pipeline_mode<synchronous>, transform_indices = @transform_1, window_bounds = array<i64: 1024, 128>}, {pipeline_mode = #tpu.pipeline_mode<synchronous>, transform_indices = @transform_2, window_bounds = array<i64: 1, 128>}, {pipeline_mode = #tpu.pipeline_mode<synchronous>, transform_indices = @transform_3, window_bounds = array<i64: 1, 128>}, {pipeline_mode = #tpu.pipeline_mode<synchronous>, transform_indices = @transform_4, window_bounds = array<i64: 128, 128>}]} {
    %c0 = arith.constant 0 : index
    %c0_0 = arith.constant 0 : index
    %0 = vector.load %arg1[%c0, %c0_0] : memref<128x1024xbf16, #tpu.memory_space<vmem>>, vector<128x1024xbf16>
    %c0_1 = arith.constant 0 : index
    %c0_2 = arith.constant 0 : index
    %1 = vector.load %arg2[%c0_1, %c0_2] : memref<1024x128xbf16, #tpu.memory_space<vmem>>, vector<1024x128xbf16>
    %cst = arith.constant dense<0.000000e+00> : vector<128x128xf32>
    %2 = tpu.matmul %0, %1, %cst {dimension_numbers = #tpu.dot_dimension_numbers<[1], [0], [0], [1], [0, 0, 1, 1], [], []>} : vector<128x1024xbf16>, vector<1024x128xbf16>, vector<128x128xf32> -> vector<128x128xf32>
    %c128_i32 = arith.constant 128 : i32
    %3 = arith.muli %arg0, %c128_i32 : i32
    %4 = tpu.assume_multiple %3, 128 : i32
    %5 = arith.index_cast %4 : i32 to index
    %c0_3 = arith.constant 0 : index
    %6 = vector.load %arg6[%5, %c0_3] : memref<128x128xf32, #tpu.memory_space<vmem>>, vector<128x128xf32>
    tpu.vector_store %arg6[%5, %c0_3], %2 {strides = array<i32>} : memref<128x128xf32, #tpu.memory_space<vmem>>, vector<128x128xf32>,
    %c0_i32 = arith.constant 0 : i32
    %7 = arith.cmpi eq, %arg0, %c0_i32 : i32
    %8 = arith.extui %7 : i1 to i32
    %c0_i32_4 = arith.constant 0 : i32
    %9 = arith.cmpi ne, %8, %c0_i32_4 : i32
    scf.if %9 {
      %c0_5 = arith.constant 0 : index
      %c0_6 = arith.constant 0 : index
      %10 = vector.load %arg6[%c0_5, %c0_6] : memref<128x128xf32, #tpu.memory_space<vmem>>, vector<128x128xf32>
      %cst_7 = arith.constant dense<0.000000e+00> : vector<128xf32>
      %11 = vector.multi_reduction <add>, %10, %cst_7 [0] : vector<128x128xf32> to vector<128xf32>
      %12 = vector.shape_cast %11 : vector<128xf32> to vector<1x128xf32>
      %cst_8 = arith.constant 1.280000e+02 : f32
      %13 = vector.broadcast %cst_8 : f32 to vector<1x128xf32>
      %14 = arith.divf %12, %13 : vector<1x128xf32>
      %15 = vector.broadcast %14 : vector<1x128xf32> to vector<128x128xf32>
      %16 = arith.subf %10, %15 : vector<128x128xf32>
      %17 = arith.mulf %16, %16 : vector<128x128xf32>
      %cst_9 = arith.constant dense<0.000000e+00> : vector<128xf32>
      %18 = vector.multi_reduction <add>, %17, %cst_9 [0] : vector<128x128xf32> to vector<128xf32>
      %19 = vector.shape_cast %18 : vector<128xf32> to vector<1x128xf32>
      %cst_10 = arith.constant 1.280000e+02 : f32
      %20 = vector.broadcast %cst_10 : f32 to vector<1x128xf32>
      %21 = arith.divf %19, %20 : vector<1x128xf32>
      %cst_11 = arith.constant 9.99999974E-6 : f32
      %22 = vector.broadcast %cst_11 : f32 to vector<1x128xf32>
      %23 = arith.addf %21, %22 : vector<1x128xf32>
      %24 = math.rsqrt %23 : vector<1x128xf32>
      %25 = vector.broadcast %24 : vector<1x128xf32> to vector<128x128xf32>
      %26 = arith.mulf %16, %25 : vector<128x128xf32>
      %c0_12 = arith.constant 0 : index
      %c0_13 = arith.constant 0 : index
      %27 = vector.load %arg3[%c0_12, %c0_13] : memref<1x128xf32, #tpu.memory_space<vmem>>, vector<1x128xf32>
      %28 = vector.broadcast %27 : vector<1x128xf32> to vector<128x128xf32>
      %29 = arith.mulf %26, %28 : vector<128x128xf32>
      %c0_14 = arith.constant 0 : index
      %c0_15 = arith.constant 0 : index
      %30 = vector.load %arg4[%c0_14, %c0_15] : memref<1x128xf32, #tpu.memory_space<vmem>>, vector<1x128xf32>
      %31 = vector.broadcast %30 : vector<1x128xf32> to vector<128x128xf32>
      %32 = arith.addf %29, %31 : vector<128x128xf32>
      %cst_16 = arith.constant 0.000000e+00 : f32
      %33 = vector.broadcast %cst_16 : f32 to vector<128x128xf32>
      %34 = arith.cmpf ogt, %32, %33 : vector<128x128xf32>
      %cst_17 = arith.constant 2.000000e-01 : f32
      %35 = vector.broadcast %cst_17 : f32 to vector<128x128xf32>
      %36 = arith.mulf %35, %32 : vector<128x128xf32>
      %37 = arith.select %34, %32, %36 : vector<128x128xi1>, vector<128x128xf32>
      %38 = arith.truncf %37 : vector<128x128xf32> to vector<128x128xbf16>
      %c0_18 = arith.constant 0 : index
      %c0_19 = arith.constant 0 : index
      %39 = vector.load %arg5[%c0_18, %c0_19] : memref<128x128xbf16, #tpu.memory_space<vmem>>, vector<128x128xbf16>
      tpu.vector_store %arg5[%c0_18, %c0_19], %38 {strides = array<i32>} : memref<128x128xbf16, #tpu.memory_space<vmem>>, vector<128x128xbf16>,
    } else {
    }
    return
  }
  func.func @transform_0(%arg0: i32) -> (i32, i32) {
    %c0_i32 = arith.constant 0 : i32
    %c0_i32_0 = arith.constant 0 : i32
    return %arg0, %c0_i32 : i32, i32
  }
  func.func @transform_1(%arg0: i32) -> (i32, i32) {
    %c0_i32 = arith.constant 0 : i32
    %c0_i32_0 = arith.constant 0 : i32
    %c0_i32_1 = arith.constant 0 : i32
    return %c0_i32, %c0_i32_0 : i32, i32
  }
  func.func @transform_2(%arg0: i32) -> (i32, i32) {
    %c0_i32 = arith.constant 0 : i32
    %c0_i32_0 = arith.constant 0 : i32
    %c0_i32_1 = arith.constant 0 : i32
    return %c0_i32, %c0_i32_0 : i32, i32
  }
  func.func @transform_3(%arg0: i32) -> (i32, i32) {
    %c0_i32 = arith.constant 0 : i32
    %c0_i32_0 = arith.constant 0 : i32
    %c0_i32_1 = arith.constant 0 : i32
    return %c0_i32, %c0_i32_0 : i32, i32
  }
  func.func @transform_4(%arg0: i32) -> (i32, i32) {
    %c0_i32 = arith.constant 0 : i32
    %c0_i32_0 = arith.constant 0 : i32
    %c0_i32_1 = arith.constant 0 : i32
    return %c0_i32, %c0_i32_0 : i32, i32
  }
}

module attributes {stable_mosaic.version = 11 : i64} {
  func.func @_matmul_bn_leaky_sigmoid_head_kernel(%arg0: i32, %arg1: memref<32x2048xbf16, #tpu.memory_space<vmem>>, %arg2: memref<2048x256xbf16, #tpu.memory_space<vmem>>, %arg3: memref<1x256xf32, #tpu.memory_space<vmem>>, %arg4: memref<1x256xf32, #tpu.memory_space<vmem>>, %arg5: memref<16x256xf32, #tpu.memory_space<vmem>>, %arg6: memref<2x1xf32, #tpu.memory_space<vmem>>, %arg7: memref<32x256xf32, #tpu.memory_space<vmem>>) attributes {dimension_semantics = [#tpu.dimension_semantics<arbitrary>], iteration_bounds = array<i64: 1>, scalar_prefetch = 0 : i64, scratch_operands = 1 : i64, tpu.core_type = #tpu.core_type<tc>, window_params = [{transform_indices = @transform_0, window_bounds = array<i64: 32, 2048>}, {pipeline_mode = #tpu.pipeline_mode<synchronous>, transform_indices = @transform_1, window_bounds = array<i64: 2048, 256>}, {pipeline_mode = #tpu.pipeline_mode<synchronous>, transform_indices = @transform_2, window_bounds = array<i64: 1, 256>}, {pipeline_mode = #tpu.pipeline_mode<synchronous>, transform_indices = @transform_3, window_bounds = array<i64: 1, 256>}, {pipeline_mode = #tpu.pipeline_mode<synchronous>, transform_indices = @transform_4, window_bounds = array<i64: 16, 256>}, {pipeline_mode = #tpu.pipeline_mode<synchronous>, transform_indices = @transform_5, window_bounds = array<i64: 2, 1>}]} {
    %c0 = arith.constant 0 : index
    %c0_0 = arith.constant 0 : index
    %0 = vector.load %arg1[%c0, %c0_0] : memref<32x2048xbf16, #tpu.memory_space<vmem>>, vector<32x2048xbf16>
    %c0_1 = arith.constant 0 : index
    %c0_2 = arith.constant 0 : index
    %1 = vector.load %arg2[%c0_1, %c0_2] : memref<2048x256xbf16, #tpu.memory_space<vmem>>, vector<2048x256xbf16>
    %cst = arith.constant dense<0.000000e+00> : vector<32x256xf32>
    %2 = tpu.matmul %0, %1, %cst {dimension_numbers = #tpu.dot_dimension_numbers<[1], [0], [0], [1], [0, 0, 1, 1], [], []>} : vector<32x2048xbf16>, vector<2048x256xbf16>, vector<32x256xf32> -> vector<32x256xf32>
    %c32_i32 = arith.constant 32 : i32
    %3 = arith.muli %arg0, %c32_i32 : i32
    %4 = tpu.assume_multiple %3, 32 : i32
    %5 = arith.index_cast %4 : i32 to index
    %c0_3 = arith.constant 0 : index
    %6 = vector.load %arg7[%5, %c0_3] : memref<32x256xf32, #tpu.memory_space<vmem>>, vector<32x256xf32>
    tpu.vector_store %arg7[%5, %c0_3], %2 {strides = array<i32>} : memref<32x256xf32, #tpu.memory_space<vmem>>, vector<32x256xf32>,
    %c0_i32 = arith.constant 0 : i32
    %7 = arith.cmpi eq, %arg0, %c0_i32 : i32
    %8 = arith.extui %7 : i1 to i32
    %c0_i32_4 = arith.constant 0 : i32
    %9 = arith.cmpi ne, %8, %c0_i32_4 : i32
    scf.if %9 {
      %c0_5 = arith.constant 0 : index
      %c0_6 = arith.constant 0 : index
      %10 = vector.load %arg7[%c0_5, %c0_6] : memref<32x256xf32, #tpu.memory_space<vmem>>, vector<32x256xf32>
      %cst_7 = arith.constant dense<0.000000e+00> : vector<256xf32>
      %11 = vector.multi_reduction <add>, %10, %cst_7 [0] : vector<32x256xf32> to vector<256xf32>
      %12 = vector.shape_cast %11 : vector<256xf32> to vector<1x256xf32>
      %cst_8 = arith.constant 3.200000e+01 : f32
      %13 = vector.broadcast %cst_8 : f32 to vector<1x256xf32>
      %14 = arith.divf %12, %13 : vector<1x256xf32>
      %15 = vector.broadcast %14 : vector<1x256xf32> to vector<32x256xf32>
      %16 = arith.subf %10, %15 : vector<32x256xf32>
      %17 = arith.mulf %16, %16 : vector<32x256xf32>
      %cst_9 = arith.constant dense<0.000000e+00> : vector<256xf32>
      %18 = vector.multi_reduction <add>, %17, %cst_9 [0] : vector<32x256xf32> to vector<256xf32>
      %19 = vector.shape_cast %18 : vector<256xf32> to vector<1x256xf32>
      %cst_10 = arith.constant 3.200000e+01 : f32
      %20 = vector.broadcast %cst_10 : f32 to vector<1x256xf32>
      %21 = arith.divf %19, %20 : vector<1x256xf32>
      %cst_11 = arith.constant 9.99999974E-6 : f32
      %22 = vector.broadcast %cst_11 : f32 to vector<1x256xf32>
      %23 = arith.addf %21, %22 : vector<1x256xf32>
      %24 = math.rsqrt %23 : vector<1x256xf32>
      %25 = vector.broadcast %24 : vector<1x256xf32> to vector<32x256xf32>
      %26 = arith.mulf %16, %25 : vector<32x256xf32>
      %c0_12 = arith.constant 0 : index
      %c0_13 = arith.constant 0 : index
      %27 = vector.load %arg3[%c0_12, %c0_13] : memref<1x256xf32, #tpu.memory_space<vmem>>, vector<1x256xf32>
      %28 = vector.broadcast %27 : vector<1x256xf32> to vector<32x256xf32>
      %29 = arith.mulf %26, %28 : vector<32x256xf32>
      %c0_14 = arith.constant 0 : index
      %c0_15 = arith.constant 0 : index
      %30 = vector.load %arg4[%c0_14, %c0_15] : memref<1x256xf32, #tpu.memory_space<vmem>>, vector<1x256xf32>
      %31 = vector.broadcast %30 : vector<1x256xf32> to vector<32x256xf32>
      %32 = arith.addf %29, %31 : vector<32x256xf32>
      %cst_16 = arith.constant 0.000000e+00 : f32
      %33 = vector.broadcast %cst_16 : f32 to vector<32x256xf32>
      %34 = arith.cmpf ogt, %32, %33 : vector<32x256xf32>
      %cst_17 = arith.constant 2.000000e-01 : f32
      %35 = vector.broadcast %cst_17 : f32 to vector<32x256xf32>
      %36 = arith.mulf %35, %32 : vector<32x256xf32>
      %37 = arith.select %34, %32, %36 : vector<32x256xi1>, vector<32x256xf32>
      %38 = vector.shape_cast %37 : vector<32x256xf32> to vector<2x16x256xf32>
      %c0_18 = arith.constant 0 : index
      %c0_19 = arith.constant 0 : index
      %39 = vector.load %arg5[%c0_18, %c0_19] : memref<16x256xf32, #tpu.memory_space<vmem>>, vector<16x256xf32>
      %40 = vector.shape_cast %39 : vector<16x256xf32> to vector<1x16x256xf32>
      %41 = vector.broadcast %40 : vector<1x16x256xf32> to vector<2x16x256xf32>
      %42 = arith.mulf %38, %41 : vector<2x16x256xf32>
      %cst_20 = arith.constant dense<0.000000e+00> : vector<2x16xf32>
      %43 = vector.multi_reduction <add>, %42, %cst_20 [2] : vector<2x16x256xf32> to vector<2x16xf32>
      %cst_21 = arith.constant dense<0.000000e+00> : vector<2xf32>
      %44 = vector.multi_reduction <add>, %43, %cst_21 [1] : vector<2x16xf32> to vector<2xf32>
      %45 = vector.shape_cast %44 : vector<2xf32> to vector<2x1xf32>
      %46 = arith.negf %45 : vector<2x1xf32>
      %47 = math.exp %46 : vector<2x1xf32>
      %cst_22 = arith.constant 1.000000e+00 : f32
      %48 = vector.broadcast %cst_22 : f32 to vector<2x1xf32>
      %49 = arith.addf %48, %47 : vector<2x1xf32>
      %50 = arith.divf %48, %49 : vector<2x1xf32>
      %c0_23 = arith.constant 0 : index
      %c0_24 = arith.constant 0 : index
      %51 = vector.load %arg6[%c0_23, %c0_24] : memref<2x1xf32, #tpu.memory_space<vmem>>, vector<2x1xf32>
      tpu.vector_store %arg6[%c0_23, %c0_24], %50 {strides = array<i32>} : memref<2x1xf32, #tpu.memory_space<vmem>>, vector<2x1xf32>,
    } else {
    }
    return
  }
  func.func @transform_0(%arg0: i32) -> (i32, i32) {
    %c0_i32 = arith.constant 0 : i32
    %c0_i32_0 = arith.constant 0 : i32
    return %arg0, %c0_i32 : i32, i32
  }
  func.func @transform_1(%arg0: i32) -> (i32, i32) {
    %c0_i32 = arith.constant 0 : i32
    %c0_i32_0 = arith.constant 0 : i32
    %c0_i32_1 = arith.constant 0 : i32
    return %c0_i32, %c0_i32_0 : i32, i32
  }
  func.func @transform_2(%arg0: i32) -> (i32, i32) {
    %c0_i32 = arith.constant 0 : i32
    %c0_i32_0 = arith.constant 0 : i32
    %c0_i32_1 = arith.constant 0 : i32
    return %c0_i32, %c0_i32_0 : i32, i32
  }
  func.func @transform_3(%arg0: i32) -> (i32, i32) {
    %c0_i32 = arith.constant 0 : i32
    %c0_i32_0 = arith.constant 0 : i32
    %c0_i32_1 = arith.constant 0 : i32
    return %c0_i32, %c0_i32_0 : i32, i32
  }
  func.func @transform_4(%arg0: i32) -> (i32, i32) {
    %c0_i32 = arith.constant 0 : i32
    %c0_i32_0 = arith.constant 0 : i32
    %c0_i32_1 = arith.constant 0 : i32
    return %c0_i32, %c0_i32_0 : i32, i32
  }
  func.func @transform_5(%arg0: i32) -> (i32, i32) {
    %c0_i32 = arith.constant 0 : i32
    %c0_i32_0 = arith.constant 0 : i32
    %c0_i32_1 = arith.constant 0 : i32
    return %c0_i32, %c0_i32_0 : i32, i32
  }
}

</mosaic_0001>

<bundles_post_ra>
// kernel: discriminator_forward.3
= control target key start
LH: loop header
LB: loop body
LE: loop exit
PB: predicated region body
PF: predicated region fallthrough
CT: control target
= control target key end

     0   :  { %s1150_s9 = smov 0   ;;  %s1237_s0 = inlined_call_operand.vmem [shape: bf16[512,128], index: 0, kind: input, shape index: {}]   ;;  %s1238_s1 = inlined_call_operand.vmem [shape: bf16[128,128], index: 1, kind: input, shape index: {}]   ;;  %s1239_s2 = inlined_call_operand.vmem [shape: bf16[512,128], index: 2, kind: output, shape index: {}]  }
   0x1 LB: > { %s813_s10 = sadd.s32 4294967295, %s1133_s9   ;;  %p817_p0 = scmp.ge.s32.totalorder %s1133_s9, 1  ;;  %s1133_s9 = sphi %s1150_s9, %s12_s9  }
   0x2   : > { %p113_p1 = scmp.lt.s32.totalorder %s1133_s9, 3 }
   0x4   : > { %p114_p2 = pnand %p817_p0, %p113_p1 }
   0x5   : > { %v1103_v0 = vld [vmem:[%s1238_s1] sm:$0xff] (!%p114_p2)   ;;  %s818_s13 = sshll.u32 (!%p114_p2), %s813_s10, 5  ;;  %v1104_v1 = vld [vmem:[%s1238_s1 + $0x8] sm:$0xff] (!%p114_p2)   ;;  %v1105_v2 = vld [vmem:[%s1238_s1 + $0x10] sm:$0xff] (!%p114_p2)  }
   0x6   : > { %117 = sbr.rel (%p114_p2) target bundleno = 285 (0x11d), region = 28  ;;  %p136_p3 = scmp.lt.s32.totalorder (!%p114_p2), %s818_s13, 63  ;;  %1031 = vmatprep.subr.bf16.mxu0 (!%p114_p2), %v1103_v0  ;;  %1079 = vmatprep.subr.bf16.mxu1 (!%p114_p2), %v1103_v0  ;;  %v1106_v3 = vld [vmem:[%s1238_s1 + $0x18] sm:$0xff] (!%p114_p2)   ;;  %v1107_v6 = vld [vmem:[%s1238_s1 + $0x20] sm:$0xff] (!%p114_p2)   ;;  %v1108_v7 = vld [vmem:[%s1238_s1 + $0x28] sm:$0xff] (!%p114_p2)  }
   0x7   : > { %1032 = vmatpush3.bf16.msra.mxu0 (!%p114_p2), %v1103_v0  ;;  %1087 = vmatpush3.bf16.msra.mxu1 (!%p114_p2), %v1103_v0  ;;  %v1109_v8 = vld [vmem:[%s1238_s1 + $0x30] sm:$0xff] (!%p114_p2)   ;;  %v1110_v9 = vld [vmem:[%s1238_s1 + $0x38] sm:$0xff] (!%p114_p2)  }
   0x8   : > { %1033 = vmatprep.subr.bf16.mxu0 (!%p114_p2), %v1104_v1  ;;  %1080 = vmatprep.subr.bf16.mxu1 (!%p114_p2), %v1104_v1 }
   0xb   : > { %1034 = vmatpush3.bf16.msra.mxu0 (!%p114_p2), %v1104_v1  ;;  %1088 = vmatpush3.bf16.msra.mxu1 (!%p114_p2), %v1104_v1 }
   0xc   : > { %1035 = vmatprep.subr.bf16.mxu0 (!%p114_p2), %v1105_v2  ;;  %1081 = vmatprep.subr.bf16.mxu1 (!%p114_p2), %v1105_v2 }
   0xd   : > { %s1241_s13 = smov (!%p136_p3, %s818_s13), 63 }
   0xe   : > { %s819_s18 = sshll.u32 %s1241_s13, 2 }
   0xf   : > { %s1175_s21 = scalar_lea.vmem %s1237_s0, %s819_s18  ;;  %1036 = vmatpush3.bf16.msra.mxu0 %v1105_v2  ;;  %1089 = vmatpush3.bf16.msra.mxu1 %v1105_v2  ;;  %s1213_s6 = scalar_lea.vmem %s1239_s2, %s819_s18 }
  0x10   : > { %v1111_v4 = vld [vmem:[%s1175_s21] sm:$0xff]   ;;  %1037 = vmatprep.subr.bf16.mxu0 %v1106_v3  ;;  %1082 = vmatprep.subr.bf16.mxu1 %v1106_v3  ;;  %v1113_v10 = vld [vmem:[%s1175_s21 + $0x8] sm:$0xff]   ;;  %v1115_v12 = vld [vmem:[%s1175_s21 + $0x10] sm:$0xff]  }
  0x11   : > { %v1112_v5 = vld [vmem:[%s1175_s21 + $0x40] sm:$0xff]   ;;  %1047 = vmatprep.mubr.bf16.mxu0 %v1111_v4  ;;  %v1114_v11 = vld [vmem:[%s1175_s21 + $0x48] sm:$0xff]   ;;  %v1116_v13 = vld [vmem:[%s1175_s21 + $0x50] sm:$0xff]  }
  0x12   : > { %1063 = vmatprep.mubr.bf16.mxu1 %v1112_v5  ;;  %v1117_v14 = vld [vmem:[%s1175_s21 + $0x18] sm:$0xff]   ;;  %v1119_v16 = vld [vmem:[%s1175_s21 + $0x20] sm:$0xff]   ;;  %v1121_v18 = vld [vmem:[%s1175_s21 + $0x28] sm:$0xff]  }
  0x13   : > { %1038 = vmatpush3.bf16.msra.mxu0 %v1106_v3  ;;  %1090 = vmatpush3.bf16.msra.mxu1 %v1106_v3  ;;  %v1118_v15 = vld [vmem:[%s1175_s21 + $0x58] sm:$0xff]   ;;  %v1120_v17 = vld [vmem:[%s1175_s21 + $0x60] sm:$0xff]   ;;  %v1122_v19 = vld [vmem:[%s1175_s21 + $0x68] sm:$0xff]  }
  0x14   : > { %1039 = vmatprep.subr.bf16.mxu0 %v1107_v6  ;;  %1083 = vmatprep.subr.bf16.mxu1 %v1107_v6  ;;  %v1123_v20 = vld [vmem:[%s1175_s21 + $0x30] sm:$0xff]   ;;  %v1125_v22 = vld [vmem:[%s1175_s21 + $0x38] sm:$0xff]  }
  0x15   : > { %v1124_v21 = vld [vmem:[%s1175_s21 + $0x70] sm:$0xff]   ;;  %v1126_v23 = vld [vmem:[%s1175_s21 + $0x78] sm:$0xff]  }
  0x17   : > { %1040 = vmatpush3.bf16.msra.mxu0 %v1107_v6  ;;  %1091 = vmatpush3.bf16.msra.mxu1 %v1107_v6 }
  0x18   : > { %1041 = vmatprep.subr.bf16.mxu0 %v1108_v7  ;;  %1084 = vmatprep.subr.bf16.mxu1 %v1108_v7 }
  0x1b   : > { %1042 = vmatpush3.bf16.msra.mxu0 %v1108_v7  ;;  %1092 = vmatpush3.bf16.msra.mxu1 %v1108_v7 }
  0x1c   : > { %1043 = vmatprep.subr.bf16.mxu0 %v1109_v8  ;;  %1085 = vmatprep.subr.bf16.mxu1 %v1109_v8 }
  0x1f   : > { %1044 = vmatpush3.bf16.msra.mxu0 %v1109_v8  ;;  %1093 = vmatpush3.bf16.msra.mxu1 %v1109_v8 }
  0x20   : > { %1045 = vmatprep.subr.bf16.mxu0 %v1110_v9  ;;  %1086 = vmatprep.subr.bf16.mxu1 %v1110_v9 }
  0x23   : > { %1046 = vmatpush3.bf16.msra.mxu0 %v1110_v9  ;;  %1094 = vmatpush3.bf16.msra.mxu1 %v1110_v9 }
  0x26   : > { %1048 = vmatmul.mubr.bf16.vlgmr.msra.gmra.mrb[0].mxu0 %v1113_v10  ;;  %1064 = vmatmul.mubr.bf16.vlgmr.msra.gmra.mrb[0].mxu1 %v1114_v11 }
  0x27   : > { %1051 = vmatprep.mubr.bf16.mxu0 %v1115_v12  ;;  %1067 = vmatprep.mubr.bf16.mxu1 %v1116_v13 }
  0x2e   : > { %1052 = vmatmul.mubr.bf16.gmra.mrb[4].mxu0 %v1117_v14  ;;  %1068 = vmatmul.mubr.bf16.gmra.mrb[4].mxu1 %v1118_v15 }
  0x2f   : > { %1055 = vmatprep.mubr.bf16.mxu0 %v1119_v16  ;;  %1071 = vmatprep.mubr.bf16.mxu1 %v1120_v17 }
  0x36   : > { %1056 = vmatmul.mubr.bf16.gmra.mrb[8].mxu0 %v1121_v18  ;;  %1072 = vmatmul.mubr.bf16.gmra.mrb[8].mxu1 %v1122_v19 }
  0x37   : > { %1059 = vmatprep.mubr.bf16.mxu0 %v1123_v20  ;;  %1075 = vmatprep.mubr.bf16.mxu1 %v1124_v21 }
  0x3e   : > { %1060 = vmatmul.mubr.bf16.gmra.mrb[12].mxu0 %v1125_v22  ;;  %1076 = vmatmul.mubr.bf16.gmra.mrb[12].mxu1 %v1126_v23 }
  0xf9   : > { %v1049_v24 = vpop.f32.mrb[0].mxu0  ;;  %v1065_v25 = vpop.f32.mrb[0].mxu1 }
  0xfa   : > { %vm503_vm0 = vcmp.gt.f32.partialorder %v1049_v24, 0.0  ;;  %v535_v26 = vmul.f32 0.2, %v1049_v24  ;;  %v551_v27 = vmul.f32 0.2, %v1065_v25  ;;  %vm519_vm1 = vcmp.gt.f32.partialorder %v1065_v25, 0.0 }
  0xfb   : > { %v374_v28 = vpop.f32.mrb[1].mxu0  ;;  %v438_v29 = vpop.f32.mrb[1].mxu1 }
  0xfc   : > { %v533_v30 = vmul.f32 0.2, %v374_v28  ;;  %v1050_v31 = vpop.f32.mrb[2].mxu0  ;;  %v1066_v32 = vpop.f32.mrb[2].mxu1  ;;  %v567_v33 = vsel %vm503_vm0, %v1049_v24, %v535_v26  ;;  %v549_v34 = vmul.f32 0.2, %v438_v29  ;;  %v583_v36 = vsel %vm519_vm1, %v1065_v25, %v551_v27 }
  0xfd   : > { %vm504_vm2 = vcmp.gt.f32.partialorder %v1050_v31, 0.0  ;;  %v536_v35 = vmul.f32 0.2, %v1050_v31  ;;  %vm501_vm3 = vcmp.gt.f32.partialorder %v374_v28, 0.0  ;;  %vm520_vm4 = vcmp.gt.f32.partialorder %v1066_v32, 0.0  ;;  %v377_v38 = vpop.f32.mrb[3].mxu0 }
  0xfe   : > { %v552_v37 = vmul.f32 0.2, %v1066_v32  ;;  %v441_v39 = vpop.f32.mrb[3].mxu1  ;;  %vm517_vm5 = vcmp.gt.f32.partialorder %v438_v29, 0.0  ;;  %vm502_vm6 = vcmp.gt.f32.partialorder %v377_v38, 0.0  ;;  %v565_v45 = vsel %vm501_vm3, %v374_v28, %v533_v30 }
  0xff   : > { %v568_v40 = vsel %vm504_vm2, %v1050_v31, %v536_v35  ;;  %v534_v41 = vmul.f32 0.2, %v377_v38  ;;  %vm518_vm7 = vcmp.gt.f32.partialorder %v441_v39, 0.0  ;;  %v550_v44 = vmul.f32 0.2, %v441_v39 }
 0x100   : > { %v920_v42 = vpack.c.bf16 %v568_v40, %v567_v33  ;;  %v584_v43 = vsel %vm520_vm4, %v1066_v32, %v552_v37  ;;  %v581_v50 = vsel %vm517_vm5, %v438_v29, %v549_v34 }
 0x101   : > { %v960_v46 = vpack.c.bf16 %v584_v43, %v583_v36  ;;  %v566_v47 = vsel %vm502_vm6, %v377_v38, %v534_v41  ;;  %v1053_v48 = vpop.f32.mrb[4].mxu0  ;;  %v1069_v49 = vpop.f32.mrb[4].mxu1  ;;  %v582_v52 = vsel %vm518_vm7, %v441_v39, %v550_v44 }
 0x102   : > { %992 = vst [vmem:[%s1213_s6 + $0x8] sm:$0xff] %v920_v42   ;;  %v915_v51 = vpack.c.bf16 %v566_v47, %v565_v45  ;;  %v539_v53 = vmul.f32 0.2, %v1053_v48  ;;  %v390_v54 = vpop.f32.mrb[5].mxu0  ;;  %v454_v55 = vpop.f32.mrb[5].mxu1  ;;  %v955_v56 = vpack.c.bf16 %v582_v52, %v581_v50  ;;  %vm507_vm8 = vcmp.gt.f32.partialorder %v1053_v48, 0.0 }
 0x103   : > { %1000 = vst [vmem:[%s1213_s6 + $0x48] sm:$0xff] %v960_v46   ;;  %v555_v57 = vmul.f32 0.2, %v1069_v49  ;;  %v1054_v58 = vpop.f32.mrb[6].mxu0  ;;  %v1070_v59 = vpop.f32.mrb[6].mxu1  ;;  %vm523_vm9 = vcmp.gt.f32.partialorder %v1069_v49, 0.0 }
 0x104   : > { %916 = vst [vmem:[%s1213_s6] sm:$0xff] %v915_v51   ;;  %v537_v60 = vmul.f32 0.2, %v390_v54  ;;  %v553_v61 = vmul.f32 0.2, %v454_v55  ;;  %v393_v62 = vpop.f32.mrb[7].mxu0  ;;  %999 = vst [vmem:[%s1213_s6 + $0x40] sm:$0xff] %v955_v56   ;;  %v571_v1 = vsel %vm507_vm8, %v1053_v48, %v539_v53 }
 0x105   : > { %vm505_vm10 = vcmp.gt.f32.partialorder %v390_v54, 0.0  ;;  %vm508_vm11 = vcmp.gt.f32.partialorder %v1054_v58, 0.0  ;;  %v540_v63 = vmul.f32 0.2, %v1054_v58  ;;  %vm524_vm12 = vcmp.gt.f32.partialorder %v1070_v59, 0.0  ;;  %v457_v0 = vpop.f32.mrb[7].mxu1 }
 0x106   : > { %vm521_vm13 = vcmp.gt.f32.partialorder %v454_v55, 0.0  ;;  %v556_v2 = vmul.f32 0.2, %v1070_v59  ;;  %vm506_vm14 = vcmp.gt.f32.partialorder %v393_v62, 0.0  ;;  %v538_v4 = vmul.f32 0.2, %v393_v62 }
 0x107   : > { %v572_v3 = vsel %vm508_vm11, %v1054_v58, %v540_v63  ;;  %vm522_vm15 = vcmp.gt.f32.partialorder %v457_v0, 0.0  ;;  %v554_v5 = vmul.f32 0.2, %v457_v0  ;;  %v587_v6 = vsel %vm523_vm9, %v1069_v49, %v555_v57 }
 0x108   : > { %v569_v7 = vsel %vm505_vm10, %v390_v54, %v537_v60  ;;  %v930_v8 = vpack.c.bf16 %v572_v3, %v571_v1  ;;  %v588_v9 = vsel %vm524_vm12, %v1070_v59, %v556_v2  ;;  %v585_v10 = vsel %vm521_vm13, %v454_v55, %v553_v61 }
 0x109   : > { %v970_v11 = vpack.c.bf16 %v588_v9, %v587_v6  ;;  %v570_v12 = vsel %vm506_vm14, %v393_v62, %v538_v4  ;;  %v586_v13 = vsel %vm522_vm15, %v457_v0, %v554_v5  ;;  %v1057_v14 = vpop.f32.mrb[8].mxu0  ;;  %v1073_v15 = vpop.f32.mrb[8].mxu1 }
 0x10a   : > { %994 = vst [vmem:[%s1213_s6 + $0x18] sm:$0xff] %v930_v8   ;;  %v925_v16 = vpack.c.bf16 %v570_v12, %v569_v7  ;;  %v965_v17 = vpack.c.bf16 %v586_v13, %v585_v10  ;;  %vm511_vm0 = vcmp.gt.f32.partialorder %v1057_v14, 0.0  ;;  %v543_v18 = vmul.f32 0.2, %v1057_v14  ;;  %v406_v19 = vpop.f32.mrb[9].mxu0  ;;  %v470_v20 = vpop.f32.mrb[9].mxu1 }
 0x10b   : > { %1002 = vst [vmem:[%s1213_s6 + $0x58] sm:$0xff] %v970_v11   ;;  %vm527_vm1 = vcmp.gt.f32.partialorder %v1073_v15, 0.0  ;;  %v559_v21 = vmul.f32 0.2, %v1073_v15  ;;  %v541_v22 = vmul.f32 0.2, %v406_v19 }
 0x10c   : > { %993 = vst [vmem:[%s1213_s6 + $0x10] sm:$0xff] %v925_v16   ;;  %1001 = vst [vmem:[%s1213_s6 + $0x50] sm:$0xff] %v965_v17   ;;  %v557_v23 = vmul.f32 0.2, %v470_v20  ;;  %v1058_v24 = vpop.f32.mrb[10].mxu0  ;;  %v1074_v25 = vpop.f32.mrb[10].mxu1  ;;  %v575_v26 = vsel %vm511_vm0, %v1057_v14, %v543_v18 }
 0x10d   : > { %vm509_vm2 = vcmp.gt.f32.partialorder %v406_v19, 0.0  ;;  %vm512_vm3 = vcmp.gt.f32.partialorder %v1058_v24, 0.0  ;;  %v544_v27 = vmul.f32 0.2, %v1058_v24  ;;  %v409_v28 = vpop.f32.mrb[11].mxu0  ;;  %v473_v29 = vpop.f32.mrb[11].mxu1  ;;  %v591_v34 = vsel %vm527_vm1, %v1073_v15, %v559_v21 }
 0x10e   : > { %vm525_vm4 = vcmp.gt.f32.partialorder %v470_v20, 0.0  ;;  %vm528_vm5 = vcmp.gt.f32.partialorder %v1074_v25, 0.0  ;;  %v560_v30 = vmul.f32 0.2, %v1074_v25  ;;  %vm510_vm6 = vcmp.gt.f32.partialorder %v409_v28, 0.0 }
 0x10f   : > { %v576_v31 = vsel %vm512_vm3, %v1058_v24, %v544_v27  ;;  %v542_v32 = vmul.f32 0.2, %v409_v28  ;;  %vm526_vm7 = vcmp.gt.f32.partialorder %v473_v29, 0.0  ;;  %v558_v33 = vmul.f32 0.2, %v473_v29 }
 0x110   : > { %v573_v35 = vsel %vm509_vm2, %v406_v19, %v541_v22  ;;  %v940_v36 = vpack.c.bf16 %v576_v31, %v575_v26  ;;  %v592_v37 = vsel %vm528_vm5, %v1074_v25, %v560_v30  ;;  %v589_v38 = vsel %vm525_vm4, %v470_v20, %v557_v23 }
 0x111   : > { %v980_v39 = vpack.c.bf16 %v592_v37, %v591_v34  ;;  %v574_v40 = vsel %vm510_vm6, %v409_v28, %v542_v32  ;;  %v590_v41 = vsel %vm526_vm7, %v473_v29, %v558_v33  ;;  %v1061_v42 = vpop.f32.mrb[12].mxu0  ;;  %v1077_v43 = vpop.f32.mrb[12].mxu1 }
 0x112   : > { %996 = vst [vmem:[%s1213_s6 + $0x28] sm:$0xff] %v940_v36   ;;  %v935_v44 = vpack.c.bf16 %v574_v40, %v573_v35  ;;  %v975_v45 = vpack.c.bf16 %v590_v41, %v589_v38  ;;  %vm515_vm8 = vcmp.gt.f32.partialorder %v1061_v42, 0.0  ;;  %v547_v46 = vmul.f32 0.2, %v1061_v42  ;;  %v422_v47 = vpop.f32.mrb[13].mxu0  ;;  %v486_v48 = vpop.f32.mrb[13].mxu1 }
 0x113   : > { %1004 = vst [vmem:[%s1213_s6 + $0x68] sm:$0xff] %v980_v39   ;;  %vm531_vm9 = vcmp.gt.f32.partialorder %v1077_v43, 0.0  ;;  %v563_v49 = vmul.f32 0.2, %v1077_v43  ;;  %v545_v50 = vmul.f32 0.2, %v422_v47 }
 0x114   : > { %995 = vst [vmem:[%s1213_s6 + $0x20] sm:$0xff] %v935_v44   ;;  %1003 = vst [vmem:[%s1213_s6 + $0x60] sm:$0xff] %v975_v45   ;;  %v561_v51 = vmul.f32 0.2, %v486_v48  ;;  %v1062_v52 = vpop.f32.mrb[14].mxu0  ;;  %v1078_v53 = vpop.f32.mrb[14].mxu1  ;;  %v579_v54 = vsel %vm515_vm8, %v1061_v42, %v547_v46 }
 0x115   : > { %vm513_vm10 = vcmp.gt.f32.partialorder %v422_v47, 0.0  ;;  %vm516_vm11 = vcmp.gt.f32.partialorder %v1062_v52, 0.0  ;;  %v548_v55 = vmul.f32 0.2, %v1062_v52  ;;  %v425_v56 = vpop.f32.mrb[15].mxu0  ;;  %v489_v57 = vpop.f32.mrb[15].mxu1  ;;  %v595_v62 = vsel %vm531_vm9, %v1077_v43, %v563_v49 }
 0x116   : > { %vm529_vm12 = vcmp.gt.f32.partialorder %v486_v48, 0.0  ;;  %vm532_vm13 = vcmp.gt.f32.partialorder %v1078_v53, 0.0  ;;  %v564_v58 = vmul.f32 0.2, %v1078_v53  ;;  %vm514_vm14 = vcmp.gt.f32.partialorder %v425_v56, 0.0 }
 0x117   : > { %v580_v59 = vsel %vm516_vm11, %v1062_v52, %v548_v55  ;;  %v546_v60 = vmul.f32 0.2, %v425_v56  ;;  %vm530_vm15 = vcmp.gt.f32.partialorder %v489_v57, 0.0  ;;  %v562_v61 = vmul.f32 0.2, %v489_v57 }
 0x118   : > { %v577_v63 = vsel %vm513_vm10, %v422_v47, %v545_v50  ;;  %v950_v0 = vpack.c.bf16 %v580_v59, %v579_v54  ;;  %v596_v1 = vsel %vm532_vm13, %v1078_v53, %v564_v58  ;;  %v593_v2 = vsel %vm529_vm12, %v486_v48, %v561_v51 }
 0x119   : > { %v990_v3 = vpack.c.bf16 %v596_v1, %v595_v62  ;;  %v578_v4 = vsel %vm514_vm14, %v425_v56, %v546_v60  ;;  %v594_v5 = vsel %vm530_vm15, %v489_v57, %v562_v61 }
 0x11a   : > { %998 = vst [vmem:[%s1213_s6 + $0x38] sm:$0xff] %v950_v0   ;;  %v945_v6 = vpack.c.bf16 %v578_v4, %v577_v63  ;;  %v985_v7 = vpack.c.bf16 %v594_v5, %v593_v2 }
 0x11b   : > { %1006 = vst [vmem:[%s1213_s6 + $0x78] sm:$0xff] %v990_v3  }
 0x11c   : > { %997 = vst [vmem:[%s1213_s6 + $0x30] sm:$0xff] %v945_v6   ;;  %1005 = vst [vmem:[%s1213_s6 + $0x70] sm:$0xff] %v985_v7  }
 0x11d PF: > { %s12_s9 = sadd.s32 1, %s1133_s9  }
 0x11e   : > { %p9_p4 = scmp.ge.s32.totalorder %s12_s9, 4  }
 0x120   :  { %11 = sbr.rel (!%p9_p4) target bundleno = 1 (0x1), region = 58 }

// kernel: discriminator_forward.4
= control target key start
LH: loop header
LB: loop body
LE: loop exit
PB: predicated region body
PF: predicated region fallthrough
CT: control target
= control target key end

     0   :  { %s2687_s1 = inlined_call_operand.vmem [shape: bf16[1024,128], index: 1, kind: input, shape index: {}]   ;;  %s2688_s0 = inlined_call_operand.vmem [shape: bf16[128,1024], index: 0, kind: input, shape index: {}]   ;;  %s2689_s2 = inlined_call_operand.vmem [shape: f32[1,128], index: 2, kind: input, shape index: {}]   ;;  %s2690_s3 = inlined_call_operand.vmem [shape: f32[1,128], index: 3, kind: input, shape index: {}]   ;;  %s2691_s4 = inlined_call_operand.vmem [shape: bf16[128,128], index: 4, kind: output, shape index: {}]  }
   0x1   :  { %v2078_v0 = vld [vmem:[%s2687_s1 + $0x40] sm:$0xff]   ;;  %v2082_v4 = vld [vmem:[%s2687_s1 + $0x48] sm:$0xff]   ;;  %v2086_v8 = vld [vmem:[%s2687_s1 + $0x50] sm:$0xff]  }
   0x2   :  { %v2079_v1 = vld [vmem:[%s2687_s1 + $0xc0] sm:$0xff]   ;;  %1822 = vmatprep.subr.bf16.mxu0 %v2078_v0  ;;  %v2083_v5 = vld [vmem:[%s2687_s1 + $0xc8] sm:$0xff]   ;;  %v2087_v9 = vld [vmem:[%s2687_s1 + $0xd0] sm:$0xff]  }
   0x3   :  { %v2080_v2 = vld [vmem:[%s2687_s1] sm:$0xff]   ;;  %1886 = vmatprep.subr.bf16.mxu1 %v2079_v1  ;;  %v2084_v6 = vld [vmem:[%s2687_s1 + $0x8] sm:$0xff]   ;;  %v2088_v10 = vld [vmem:[%s2687_s1 + $0x10] sm:$0xff]  }
   0x4   :  { %v2081_v3 = vld [vmem:[%s2687_s1 + $0x80] sm:$0xff]   ;;  %1823 = vmatpush3.bf16.msra.mxu0 %v2080_v2  ;;  %v2085_v7 = vld [vmem:[%s2687_s1 + $0x88] sm:$0xff]   ;;  %v2089_v11 = vld [vmem:[%s2687_s1 + $0x90] sm:$0xff]  }
   0x5   :  { %1887 = vmatpush3.bf16.msra.mxu1 %v2081_v3  ;;  %1824 = vmatprep.subr.bf16.mxu0 %v2082_v4  ;;  %v2090_v12 = vld [vmem:[%s2687_s1 + $0x58] sm:$0xff]   ;;  %v2094_v16 = vld [vmem:[%s2687_s1 + $0x60] sm:$0xff]   ;;  %v2098_v20 = vld [vmem:[%s2687_s1 + $0x68] sm:$0xff]  }
   0x6   :  { %1888 = vmatprep.subr.bf16.mxu1 %v2083_v5  ;;  %v2091_v13 = vld [vmem:[%s2687_s1 + $0xd8] sm:$0xff]   ;;  %v2095_v17 = vld [vmem:[%s2687_s1 + $0xe0] sm:$0xff]   ;;  %v2099_v21 = vld [vmem:[%s2687_s1 + $0xe8] sm:$0xff]  }
   0x7   :  { %v2092_v14 = vld [vmem:[%s2687_s1 + $0x18] sm:$0xff]   ;;  %v2096_v18 = vld [vmem:[%s2687_s1 + $0x20] sm:$0xff]   ;;  %v2100_v22 = vld [vmem:[%s2687_s1 + $0x28] sm:$0xff]  }
   0x8   :  { %1825 = vmatpush3.bf16.msra.mxu0 %v2084_v6  ;;  %v2093_v15 = vld [vmem:[%s2687_s1 + $0x98] sm:$0xff]   ;;  %v2097_v19 = vld [vmem:[%s2687_s1 + $0xa0] sm:$0xff]   ;;  %v2101_v23 = vld [vmem:[%s2687_s1 + $0xa8] sm:$0xff]  }
   0x9   :  { %1889 = vmatpush3.bf16.msra.mxu1 %v2085_v7  ;;  %1826 = vmatprep.subr.bf16.mxu0 %v2086_v8  ;;  %v2102_v24 = vld [vmem:[%s2687_s1 + $0x70] sm:$0xff]   ;;  %v2106_v28 = vld [vmem:[%s2687_s1 + $0x78] sm:$0xff]   ;;  %v18_v32 = vld [vmem:[%s2688_s0] sm:$0xff] }
   0xa   :  { %1890 = vmatprep.subr.bf16.mxu1 %v2087_v9  ;;  %v2103_v25 = vld [vmem:[%s2687_s1 + $0xf0] sm:$0xff]   ;;  %v2107_v29 = vld [vmem:[%s2687_s1 + $0xf8] sm:$0xff]   ;;  %v22_v33 = vld [vmem:[%s2688_s0 + $0x20] sm:$0xff] }
   0xb   :  { %v2104_v26 = vld [vmem:[%s2687_s1 + $0x30] sm:$0xff]   ;;  %v2108_v30 = vld [vmem:[%s2687_s1 + $0x38] sm:$0xff]   ;;  %v19_v34 = vld [vmem:[%s2688_s0 + $0x8] sm:$0xff]  ;;  %v1613_v35 = vcombine.low %v18_v32, %v22_v33  ;;  %v1614_v36 = vcombine.high %v18_v32, %v22_v33 }
   0xc   :  { %1827 = vmatpush3.bf16.msra.mxu0 %v2088_v10  ;;  %v2105_v27 = vld [vmem:[%s2687_s1 + $0xb0] sm:$0xff]   ;;  %v2109_v31 = vld [vmem:[%s2687_s1 + $0xb8] sm:$0xff]   ;;  %v23_v37 = vld [vmem:[%s2688_s0 + $0x28] sm:$0xff] }
   0xd   :  { %1891 = vmatpush3.bf16.msra.mxu1 %v2089_v11  ;;  %1828 = vmatprep.subr.bf16.mxu0 %v2090_v12  ;;  %v1615_v38 = vcombine.low %v19_v34, %v23_v37  ;;  %v1616_v39 = vcombine.high %v19_v34, %v23_v37  ;;  %v2110_v40 = vld [vmem:[%s2687_s1 + $0x140] sm:$0xff]   ;;  %v27_v47 = vld [vmem:[%s2688_s0 + $0x48] sm:$0xff]  ;;  %v2118_v62 = vld [vmem:[%s2687_s1 + $0x150] sm:$0xff]  }
   0xe   :  { %1892 = vmatprep.subr.bf16.mxu1 %v2091_v13  ;;  %946 = vmatprep.mubr.bf16.mxu0 %v1614_v36  ;;  %v2111_v41 = vld [vmem:[%s2687_s1 + $0x100] sm:$0xff]   ;;  %v31_v48 = vld [vmem:[%s2688_s0 + $0x68] sm:$0xff]  ;;  %v2119_v63 = vld [vmem:[%s2687_s1 + $0x110] sm:$0xff]  }
   0xf   :  { %1043 = vmatprep.mubr.bf16.mxu1 %v1616_v39  ;;  %v2112_v42 = vld [vmem:[%s2687_s1 + $0x1c0] sm:$0xff]   ;;  %v1624_v49 = vcombine.high %v27_v47, %v31_v48  ;;  %v2114_v50 = vld [vmem:[%s2687_s1 + $0x148] sm:$0xff]   ;;  %v1623_v53 = vcombine.low %v27_v47, %v31_v48  ;;  %v2120_v0 = vld [vmem:[%s2687_s1 + $0x1d0] sm:$0xff]  }
  0x10   :  { %1829 = vmatpush3.bf16.msra.mxu0 %v2092_v14  ;;  %v2113_v43 = vld [vmem:[%s2687_s1 + $0x180] sm:$0xff]   ;;  %v2115_v52 = vld [vmem:[%s2687_s1 + $0x108] sm:$0xff]   ;;  %v2121_v1 = vld [vmem:[%s2687_s1 + $0x190] sm:$0xff]  }
  0x11   :  { %1893 = vmatpush3.bf16.msra.mxu1 %v2093_v15  ;;  %1830 = vmatprep.subr.bf16.mxu0 %v2094_v16  ;;  %v26_v44 = vld [vmem:[%s2688_s0 + $0x40] sm:$0xff]  ;;  %v2116_v54 = vld [vmem:[%s2687_s1 + $0x1c8] sm:$0xff]   ;;  %v2122_v10 = vld [vmem:[%s2687_s1 + $0x158] sm:$0xff]  }
  0x12   :  { %1894 = vmatprep.subr.bf16.mxu1 %v2095_v17  ;;  %v30_v45 = vld [vmem:[%s2688_s0 + $0x60] sm:$0xff]  ;;  %v2117_v55 = vld [vmem:[%s2687_s1 + $0x188] sm:$0xff]   ;;  %v2123_v11 = vld [vmem:[%s2687_s1 + $0x118] sm:$0xff]  }
  0x13   :  { %v1622_v46 = vcombine.high %v26_v44, %v30_v45  ;;  %v1621_v51 = vcombine.low %v26_v44, %v30_v45  ;;  %v34_v56 = vld [vmem:[%s2688_s0 + $0x80] sm:$0xff]  ;;  %v35_v58 = vld [vmem:[%s2688_s0 + $0x88] sm:$0xff]  ;;  %v2124_v12 = vld [vmem:[%s2687_s1 + $0x1d8] sm:$0xff]  }
  0x14   :  { %1831 = vmatpush3.bf16.msra.mxu0 %v2096_v18  ;;  %v38_v57 = vld [vmem:[%s2688_s0 + $0xa0] sm:$0xff]  ;;  %v39_v59 = vld [vmem:[%s2688_s0 + $0xa8] sm:$0xff]  ;;  %v2125_v13 = vld [vmem:[%s2687_s1 + $0x198] sm:$0xff]  }
  0x15   :  { %1895 = vmatpush3.bf16.msra.mxu1 %v2097_v19  ;;  %1832 = vmatprep.subr.bf16.mxu0 %v2098_v20  ;;  %v1630_v60 = vcombine.high %v34_v56, %v38_v57  ;;  %v1632_v61 = vcombine.high %v35_v58, %v39_v59  ;;  %v1629_v2 = vcombine.low %v34_v56, %v38_v57  ;;  %v42_v3 = vld [vmem:[%s2688_s0 + $0xc0] sm:$0xff]  ;;  %v43_v5 = vld [vmem:[%s2688_s0 + $0xc8] sm:$0xff]  ;;  %v2135_v39 = vld [vmem:[%s2687_s1 + $0x130] sm:$0xff]  }
  0x16   :  { %1896 = vmatprep.subr.bf16.mxu1 %v2099_v21  ;;  %v46_v4 = vld [vmem:[%s2688_s0 + $0xe0] sm:$0xff]  ;;  %v1631_v6 = vcombine.low %v35_v58, %v39_v59  ;;  %v47_v8 = vld [vmem:[%s2688_s0 + $0xe8] sm:$0xff]  ;;  %v2139_v48 = vld [vmem:[%s2687_s1 + $0x138] sm:$0xff]  }
  0x17   :  { %v1638_v7 = vcombine.high %v42_v3, %v46_v4  ;;  %v1640_v9 = vcombine.high %v43_v5, %v47_v8  ;;  %v50_v14 = vld [vmem:[%s2688_s0 + $0x100] sm:$0xff]  ;;  %v51_v16 = vld [vmem:[%s2688_s0 + $0x108] sm:$0xff]  ;;  %v1637_v19 = vcombine.low %v42_v3, %v46_v4  ;;  %v1639_v21 = vcombine.low %v43_v5, %v47_v8  ;;  %v29_v8 = vld [vmem:[%s2688_s0 + $0x58] sm:$0xff] }
  0x18   :  { %1833 = vmatpush3.bf16.msra.mxu0 %v2100_v22  ;;  %v54_v15 = vld [vmem:[%s2688_s0 + $0x120] sm:$0xff]  ;;  %v55_v17 = vld [vmem:[%s2688_s0 + $0x128] sm:$0xff] }
  0x19   :  { %1897 = vmatpush3.bf16.msra.mxu1 %v2101_v23  ;;  %1834 = vmatprep.subr.bf16.mxu0 %v2102_v24  ;;  %v2126_v18 = vld [vmem:[%s2687_s1 + $0x160] sm:$0xff]   ;;  %v1646_v22 = vcombine.high %v50_v14, %v54_v15  ;;  %v1648_v24 = vcombine.high %v51_v16, %v55_v17  ;;  %v2132_v32 = vld [vmem:[%s2687_s1 + $0x1e8] sm:$0xff]   ;;  %v1645_v34 = vcombine.low %v50_v14, %v54_v15  ;;  %v36_v14 = vld [vmem:[%s2688_s0 + $0x90] sm:$0xff] }
  0x1a   :  { %1898 = vmatprep.subr.bf16.mxu1 %v2103_v25  ;;  %v2127_v20 = vld [vmem:[%s2687_s1 + $0x120] sm:$0xff]   ;;  %v2133_v33 = vld [vmem:[%s2687_s1 + $0x1a8] sm:$0xff]   ;;  %v40_v15 = vld [vmem:[%s2688_s0 + $0xb0] sm:$0xff] }
  0x1b   :  { %v2128_v23 = vld [vmem:[%s2687_s1 + $0x1e0] sm:$0xff]   ;;  %v67_v44 = vld [vmem:[%s2688_s0 + $0x188] sm:$0xff] }
  0x1c   :  { %1835 = vmatpush3.bf16.msra.mxu0 %v2104_v26  ;;  %v2129_v25 = vld [vmem:[%s2687_s1 + $0x1a0] sm:$0xff]   ;;  %v71_v45 = vld [vmem:[%s2688_s0 + $0x1a8] sm:$0xff] }
  0x1d   :  { %1899 = vmatpush3.bf16.msra.mxu1 %v2105_v27  ;;  %1836 = vmatprep.subr.bf16.mxu0 %v2106_v28  ;;  %v58_v26 = vld [vmem:[%s2688_s0 + $0x140] sm:$0xff]  ;;  %v2130_v28 = vld [vmem:[%s2687_s1 + $0x168] sm:$0xff]   ;;  %v1663_v59 = vcombine.low %v67_v44, %v71_v45 }
  0x1e   :  { %1900 = vmatprep.subr.bf16.mxu1 %v2107_v29  ;;  %v62_v27 = vld [vmem:[%s2688_s0 + $0x160] sm:$0xff]  ;;  %v59_v29 = vld [vmem:[%s2688_s0 + $0x148] sm:$0xff] }
  0x1f   :  { %v1654_v36 = vcombine.high %v58_v26, %v62_v27  ;;  %v1653_v47 = vcombine.low %v58_v26, %v62_v27  ;;  %v75_v56 = vld [vmem:[%s2688_s0 + $0x1c8] sm:$0xff]  ;;  %v1633_v26 = vcombine.low %v36_v14, %v40_v15 }
  0x20   :  { %1837 = vmatpush3.bf16.msra.mxu0 %v2108_v30  ;;  %v63_v30 = vld [vmem:[%s2688_s0 + $0x168] sm:$0xff] }
  0x21   :  { %1901 = vmatpush3.bf16.msra.mxu1 %v2109_v31  ;;  %1950 = vmatprep.subr.bf16.mxu0 %v2110_v40  ;;  %v2131_v31 = vld [vmem:[%s2687_s1 + $0x128] sm:$0xff]   ;;  %v1656_v37 = vcombine.high %v59_v29, %v63_v30  ;;  %v2136_v40 = vld [vmem:[%s2687_s1 + $0x1f0] sm:$0xff]  }
  0x22   :  { %2014 = vmatprep.subr.bf16.mxu1 %v2112_v42  ;;  %v70_v42 = vld [vmem:[%s2688_s0 + $0x1a0] sm:$0xff]  ;;  %v79_v57 = vld [vmem:[%s2688_s0 + $0x1e8] sm:$0xff] }
  0x23   :  { %947 = vmatmul.mubr.bf16.vlgmr.msra.gmra.mrb[0].mxu0 %v1613_v35  ;;  %v1647_v35 = vcombine.low %v51_v16, %v55_v17  ;;  %v1671_v3 = vcombine.low %v75_v56, %v79_v57  ;;  %v37_v16 = vld [vmem:[%s2688_s0 + $0x98] sm:$0xff] }
  0x24   :  { %1044 = vmatmul.mubr.bf16.vlgmr.msra.gmra.mrb[0].mxu1 %v1615_v38  ;;  %1951 = vmatpush3.bf16.msra.mxu0 %v2111_v41  ;;  %v2134_v38 = vld [vmem:[%s2687_s1 + $0x170] sm:$0xff]   ;;  %v66_v41 = vld [vmem:[%s2688_s0 + $0x180] sm:$0xff]  ;;  %v41_v17 = vld [vmem:[%s2688_s0 + $0xb8] sm:$0xff] }
  0x25   :  { %2015 = vmatpush3.bf16.msra.mxu1 %v2113_v43  ;;  %954 = vmatprep.mubr.bf16.mxu0 %v1622_v46  ;;  %v2137_v43 = vld [vmem:[%s2687_s1 + $0x1b0] sm:$0xff]   ;;  %v2138_v46 = vld [vmem:[%s2687_s1 + $0x178] sm:$0xff]   ;;  %v1661_v58 = vcombine.low %v66_v41, %v70_v42  ;;  %v1635_v27 = vcombine.low %v37_v16, %v41_v17 }
  0x26   :  { %1051 = vmatprep.mubr.bf16.mxu1 %v1624_v49  ;;  %1952 = vmatprep.subr.bf16.mxu0 %v2114_v50  ;;  %v1655_v49 = vcombine.low %v59_v29, %v63_v30  ;;  %v1662_v50 = vcombine.high %v66_v41, %v70_v42  ;;  %v52_v30 = vld [vmem:[%s2688_s0 + $0x110] sm:$0xff]  ;;  %v65_v41 = vld [vmem:[%s2688_s0 + $0x178] sm:$0xff] }
  0x27   :  { %2016 = vmatprep.subr.bf16.mxu1 %v2116_v54  ;;  %v74_v54 = vld [vmem:[%s2688_s0 + $0x1c0] sm:$0xff] }
  0x28   :  { %1953 = vmatpush3.bf16.msra.mxu0 %v2115_v52  ;;  %v1664_v52 = vcombine.high %v67_v44, %v71_v45 }
  0x29   :  { %2017 = vmatpush3.bf16.msra.mxu1 %v2117_v55  ;;  %1954 = vmatprep.subr.bf16.mxu0 %v2118_v62  ;;  %v78_v55 = vld [vmem:[%s2688_s0 + $0x1e0] sm:$0xff]  ;;  %v20_v62 = vld [vmem:[%s2688_s0 + $0x10] sm:$0xff] }
  0x2a   :  { %2018 = vmatprep.subr.bf16.mxu1 %v2120_v0  ;;  %v21_v0 = vld [vmem:[%s2688_s0 + $0x18] sm:$0xff] }
  0x2b   :  { %955 = vmatmul.mubr.bf16.gmra.mrb[4].mxu0 %v1621_v51  ;;  %v2140_v51 = vld [vmem:[%s2687_s1 + $0x1f8] sm:$0xff]  }
  0x2c   :  { %1052 = vmatmul.mubr.bf16.gmra.mrb[4].mxu1 %v1623_v53  ;;  %962 = vmatprep.mubr.bf16.mxu0 %v1630_v60  ;;  %v2141_v53 = vld [vmem:[%s2687_s1 + $0x1b8] sm:$0xff]   ;;  %v1670_v60 = vcombine.high %v74_v54, %v78_v55 }
  0x2d   :  { %1059 = vmatprep.mubr.bf16.mxu1 %v1632_v61  ;;  %1955 = vmatpush3.bf16.msra.mxu0 %v2119_v63  ;;  %v1672_v61 = vcombine.high %v75_v56, %v79_v57  ;;  %v24_v63 = vld [vmem:[%s2688_s0 + $0x30] sm:$0xff]  ;;  %v77_v56 = vld [vmem:[%s2688_s0 + $0x1d8] sm:$0xff] }
  0x2e   :  { %2019 = vmatpush3.bf16.msra.mxu1 %v2121_v1  ;;  %1956 = vmatprep.subr.bf16.mxu0 %v2122_v10  ;;  %v25_v1 = vld [vmem:[%s2688_s0 + $0x38] sm:$0xff]  ;;  %v1618_v4 = vcombine.high %v20_v62, %v24_v63  ;;  %v1617_v10 = vcombine.low %v20_v62, %v24_v63 }
  0x2f   :  { %2020 = vmatprep.subr.bf16.mxu1 %v2124_v12  ;;  %v1620_v5 = vcombine.high %v21_v0, %v25_v1  ;;  %v81_v57 = vld [vmem:[%s2688_s0 + $0x1f8] sm:$0xff] }
  0x30   :  { %v1675_v63 = vcombine.low %v77_v56, %v81_v57 }
  0x31   :  { %1957 = vmatpush3.bf16.msra.mxu0 %v2123_v11  ;;  %v1619_v11 = vcombine.low %v21_v0, %v25_v1 }
  0x32   :  { %2021 = vmatpush3.bf16.msra.mxu1 %v2125_v13  ;;  %1958 = vmatprep.subr.bf16.mxu0 %v2126_v18 }
  0x33   :  { %963 = vmatmul.mubr.bf16.gmra.mrb[8].mxu0 %v1629_v2  ;;  %2022 = vmatprep.subr.bf16.mxu1 %v2128_v23  ;;  %v1669_v2 = vcombine.low %v74_v54, %v78_v55  ;;  %v48_v23 = vld [vmem:[%s2688_s0 + $0xf0] sm:$0xff] }
  0x34   :  { %1060 = vmatmul.mubr.bf16.gmra.mrb[8].mxu1 %v1631_v6  ;;  %970 = vmatprep.mubr.bf16.mxu0 %v1638_v7  ;;  %v28_v6 = vld [vmem:[%s2688_s0 + $0x50] sm:$0xff] }
  0x35   :  { %1067 = vmatprep.mubr.bf16.mxu1 %v1640_v9  ;;  %1959 = vmatpush3.bf16.msra.mxu0 %v2127_v20  ;;  %v32_v7 = vld [vmem:[%s2688_s0 + $0x70] sm:$0xff]  ;;  %v33_v9 = vld [vmem:[%s2688_s0 + $0x78] sm:$0xff]  ;;  %v1634_v20 = vcombine.high %v36_v14, %v40_v15 }
  0x36   :  { %2023 = vmatpush3.bf16.msra.mxu1 %v2129_v25  ;;  %1960 = vmatprep.subr.bf16.mxu0 %v2130_v28  ;;  %v1626_v12 = vcombine.high %v28_v6, %v32_v7  ;;  %v1628_v13 = vcombine.high %v29_v8, %v33_v9  ;;  %v1625_v18 = vcombine.low %v28_v6, %v32_v7  ;;  %v49_v25 = vld [vmem:[%s2688_s0 + $0xf8] sm:$0xff]  ;;  %v76_v54 = vld [vmem:[%s2688_s0 + $0x1d0] sm:$0xff] }
  0x37   :  { %2024 = vmatprep.subr.bf16.mxu1 %v2132_v32  ;;  %v53_v32 = vld [vmem:[%s2688_s0 + $0x118] sm:$0xff]  ;;  %v80_v55 = vld [vmem:[%s2688_s0 + $0x1f0] sm:$0xff] }
  0x38   :  { %v1673_v62 = vcombine.low %v76_v54, %v80_v55 }
  0x39   :  { %1961 = vmatpush3.bf16.msra.mxu0 %v2131_v31  ;;  %v56_v31 = vld [vmem:[%s2688_s0 + $0x130] sm:$0xff] }
  0x3a   :  { %2025 = vmatpush3.bf16.msra.mxu1 %v2133_v33  ;;  %1962 = vmatprep.subr.bf16.mxu0 %v2134_v38  ;;  %v57_v33 = vld [vmem:[%s2688_s0 + $0x138] sm:$0xff]  ;;  %v60_v38 = vld [vmem:[%s2688_s0 + $0x150] sm:$0xff]  ;;  %v1649_v42 = vcombine.low %v52_v30, %v56_v31 }
  0x3b   :  { %971 = vmatmul.mubr.bf16.gmra.mrb[12].mxu0 %v1637_v19  ;;  %2026 = vmatprep.subr.bf16.mxu1 %v2136_v40  ;;  %v1627_v19 = vcombine.low %v29_v8, %v33_v9  ;;  %v61_v40 = vld [vmem:[%s2688_s0 + $0x158] sm:$0xff] }
  0x3c   :  { %1068 = vmatmul.mubr.bf16.gmra.mrb[12].mxu1 %v1639_v21  ;;  %978 = vmatprep.mubr.bf16.mxu0 %v1646_v22  ;;  %v1636_v21 = vcombine.high %v37_v16, %v41_v17  ;;  %v44_v22 = vld [vmem:[%s2688_s0 + $0xd0] sm:$0xff]  ;;  %v1660_v45 = vcombine.high %v61_v40, %v65_v41 }
  0x3d   :  { %1075 = vmatprep.mubr.bf16.mxu1 %v1648_v24  ;;  %1963 = vmatpush3.bf16.msra.mxu0 %v2135_v39  ;;  %v45_v24 = vld [vmem:[%s2688_s0 + $0xd8] sm:$0xff]  ;;  %v1642_v28 = vcombine.high %v44_v22, %v48_v23  ;;  %v64_v39 = vld [vmem:[%s2688_s0 + $0x170] sm:$0xff] }
  0x3e   :  { %2027 = vmatpush3.bf16.msra.mxu1 %v2137_v43  ;;  %1964 = vmatprep.subr.bf16.mxu0 %v2138_v46  ;;  %v1644_v29 = vcombine.high %v45_v24, %v49_v25  ;;  %v1651_v43 = vcombine.low %v53_v32, %v57_v33  ;;  %v1658_v44 = vcombine.high %v60_v38, %v64_v39  ;;  %v68_v46 = vld [vmem:[%s2688_s0 + $0x190] sm:$0xff] }
  0x3f   :  { %2028 = vmatprep.subr.bf16.mxu1 %v2140_v51  ;;  %v1659_v51 = vcombine.low %v61_v40, %v65_v41 }
  0x41   :  { %1965 = vmatpush3.bf16.msra.mxu0 %v2139_v48  ;;  %v69_v48 = vld [vmem:[%s2688_s0 + $0x198] sm:$0xff] }
  0x42   :  { %2029 = vmatpush3.bf16.msra.mxu1 %v2141_v53 }
  0x43   :  { %979 = vmatmul.mubr.bf16.gmra.mrb[16].mxu0 %v1645_v34  ;;  %v1641_v34 = vcombine.low %v44_v22, %v48_v23 }
  0x44   :  { %1076 = vmatmul.mubr.bf16.gmra.mrb[16].mxu1 %v1647_v35  ;;  %986 = vmatprep.mubr.bf16.mxu0 %v1654_v36  ;;  %v1643_v35 = vcombine.low %v45_v24, %v49_v25  ;;  %v1650_v36 = vcombine.high %v52_v30, %v56_v31 }
  0x45   :  { %1083 = vmatprep.mubr.bf16.mxu1 %v1656_v37  ;;  %v1652_v37 = vcombine.high %v53_v32, %v57_v33 }
  0x4b   :  { %987 = vmatmul.mubr.bf16.gmra.mrb[20].mxu0 %v1653_v47  ;;  %v72_v47 = vld [vmem:[%s2688_s0 + $0x1b0] sm:$0xff] }
  0x4c   :  { %1084 = vmatmul.mubr.bf16.gmra.mrb[20].mxu1 %v1655_v49  ;;  %994 = vmatprep.mubr.bf16.mxu0 %v1662_v50  ;;  %v73_v49 = vld [vmem:[%s2688_s0 + $0x1b8] sm:$0xff]  ;;  %v1657_v50 = vcombine.low %v60_v38, %v64_v39 }
  0x4d   :  { %1091 = vmatprep.mubr.bf16.mxu1 %v1664_v52  ;;  %v1666_v52 = vcombine.high %v68_v46, %v72_v47  ;;  %v1668_v53 = vcombine.high %v69_v48, %v73_v49 }
  0x53   :  { %995 = vmatmul.mubr.bf16.gmra.mrb[24].mxu0 %v1661_v58  ;;  %v1665_v58 = vcombine.low %v68_v46, %v72_v47 }
  0x54   :  { %1092 = vmatmul.mubr.bf16.gmra.mrb[24].mxu1 %v1663_v59  ;;  %1002 = vmatprep.mubr.bf16.mxu0 %v1670_v60  ;;  %v1667_v59 = vcombine.low %v69_v48, %v73_v49  ;;  %v1674_v60 = vcombine.high %v76_v54, %v80_v55 }
  0x55   :  { %1099 = vmatprep.mubr.bf16.mxu1 %v1672_v61  ;;  %v1676_v61 = vcombine.high %v77_v56, %v81_v57 }
  0x5b   :  { %1003 = vmatmul.mubr.bf16.gmra.mrb[28].mxu0 %v1669_v2 }
  0x5c   :  { %1100 = vmatmul.mubr.bf16.gmra.mrb[28].mxu1 %v1671_v3  ;;  %1140 = vmatprep.mubr.bf16.mxu0 %v1618_v4 }
  0x5d   :  { %1237 = vmatprep.mubr.bf16.mxu1 %v1620_v5 }
  0x63   :  { %1141 = vmatmul.mubr.bf16.vlgmr.msra.gmra.mrb[32].mxu0 %v1617_v10 }
  0x64   :  { %1238 = vmatmul.mubr.bf16.vlgmr.msra.gmra.mrb[32].mxu1 %v1619_v11  ;;  %1148 = vmatprep.mubr.bf16.mxu0 %v1626_v12 }
  0x65   :  { %1245 = vmatprep.mubr.bf16.mxu1 %v1628_v13 }
  0x6b   :  { %1149 = vmatmul.mubr.bf16.gmra.mrb[36].mxu0 %v1625_v18 }
  0x6c   :  { %1246 = vmatmul.mubr.bf16.gmra.mrb[36].mxu1 %v1627_v19  ;;  %1156 = vmatprep.mubr.bf16.mxu0 %v1634_v20 }
  0x6d   :  { %1253 = vmatprep.mubr.bf16.mxu1 %v1636_v21 }
  0x73   :  { %1157 = vmatmul.mubr.bf16.gmra.mrb[40].mxu0 %v1633_v26 }
  0x74   :  { %1254 = vmatmul.mubr.bf16.gmra.mrb[40].mxu1 %v1635_v27  ;;  %1164 = vmatprep.mubr.bf16.mxu0 %v1642_v28 }
  0x75   :  { %1261 = vmatprep.mubr.bf16.mxu1 %v1644_v29 }
  0x7b   :  { %1165 = vmatmul.mubr.bf16.gmra.mrb[44].mxu0 %v1641_v34 }
  0x7c   :  { %1262 = vmatmul.mubr.bf16.gmra.mrb[44].mxu1 %v1643_v35  ;;  %1172 = vmatprep.mubr.bf16.mxu0 %v1650_v36 }
  0x7d   :  { %1269 = vmatprep.mubr.bf16.mxu1 %v1652_v37 }
  0x83   :  { %1173 = vmatmul.mubr.bf16.gmra.mrb[48].mxu0 %v1649_v42 }
  0x84   :  { %1270 = vmatmul.mubr.bf16.gmra.mrb[48].mxu1 %v1651_v43  ;;  %1180 = vmatprep.mubr.bf16.mxu0 %v1658_v44 }
  0x85   :  { %1277 = vmatprep.mubr.bf16.mxu1 %v1660_v45 }
  0x8b   :  { %1181 = vmatmul.mubr.bf16.gmra.mrb[52].mxu0 %v1657_v50 }
  0x8c   :  { %1278 = vmatmul.mubr.bf16.gmra.mrb[52].mxu1 %v1659_v51  ;;  %1188 = vmatprep.mubr.bf16.mxu0 %v1666_v52 }
  0x8d   :  { %1285 = vmatprep.mubr.bf16.mxu1 %v1668_v53 }
  0x93   :  { %1189 = vmatmul.mubr.bf16.gmra.mrb[56].mxu0 %v1665_v58 }
  0x94   :  { %1286 = vmatmul.mubr.bf16.gmra.mrb[56].mxu1 %v1667_v59  ;;  %1196 = vmatprep.mubr.bf16.mxu0 %v1674_v60 }
  0x95   :  { %1293 = vmatprep.mubr.bf16.mxu1 %v1676_v61 }
  0x9b   :  { %1197 = vmatmul.mubr.bf16.gmra.mrb[60].mxu0 %v1673_v62 }
  0x9c   :  { %1294 = vmatmul.mubr.bf16.gmra.mrb[60].mxu1 %v1675_v63 }
  0xf6   :  { %v1838_v0 = vpop.f32.mrb[0].mxu0 }
  0xf7   :  { %v1902_v1 = vpop.f32.mrb[0].mxu1  ;;  %v1839_v2 = vpop.f32.mrb[1].mxu0 }
  0xf8   :  { %v1840_v3 = vadd.f32 %v1839_v2, %v1838_v0  ;;  %v1903_v4 = vpop.f32.mrb[1].mxu1  ;;  %v1841_v5 = vpop.f32.mrb[2].mxu0 }
  0xf9   :  { %v1904_v6 = vadd.f32 %v1903_v4, %v1902_v1  ;;  %v1905_v7 = vpop.f32.mrb[2].mxu1  ;;  %v1842_v8 = vpop.f32.mrb[3].mxu0 }
  0xfa   :  { %v1843_v9 = vadd.f32 %v1842_v8, %v1841_v5  ;;  %v1906_v10 = vpop.f32.mrb[3].mxu1 }
  0xfb   :  { %v2553_v11 = vadd.f32 %v1904_v6, %v1840_v3  ;;  %v1907_v12 = vadd.f32 %v1906_v10, %v1905_v7 }
  0xfd   :  { %v2555_v13 = vadd.f32 %v1907_v12, %v1843_v9 }
  0xfe   :  { %v1844_v14 = vpop.f32.mrb[4].mxu0 }
  0xff   :  { %v1908_v15 = vpop.f32.mrb[4].mxu1  ;;  %v1845_v16 = vpop.f32.mrb[5].mxu0 }
 0x100   :  { %v1846_v17 = vadd.f32 %v1845_v16, %v1844_v14  ;;  %v1909_v18 = vpop.f32.mrb[5].mxu1  ;;  %v1847_v19 = vpop.f32.mrb[6].mxu0 }
 0x101   :  { %v1910_v20 = vadd.f32 %v1909_v18, %v1908_v15  ;;  %v1911_v21 = vpop.f32.mrb[6].mxu1  ;;  %v1848_v22 = vpop.f32.mrb[7].mxu0 }
 0x102   :  { %v1849_v23 = vadd.f32 %v1848_v22, %v1847_v19  ;;  %v1912_v24 = vpop.f32.mrb[7].mxu1 }
 0x103   :  { %v2557_v25 = vadd.f32 %v1910_v20, %v1846_v17  ;;  %v1913_v26 = vadd.f32 %v1912_v24, %v1911_v21 }
 0x105   :  { %v2559_v27 = vadd.f32 %v1913_v26, %v1849_v23 }
 0x106   :  { %v1850_v28 = vpop.f32.mrb[8].mxu0 }
 0x107   :  { %v1914_v29 = vpop.f32.mrb[8].mxu1  ;;  %v1851_v30 = vpop.f32.mrb[9].mxu0 }
 0x108   :  { %v1852_v31 = vadd.f32 %v1851_v30, %v1850_v28  ;;  %v1915_v32 = vpop.f32.mrb[9].mxu1  ;;  %v1853_v33 = vpop.f32.mrb[10].mxu0 }
 0x109   :  { %v1916_v34 = vadd.f32 %v1915_v32, %v1914_v29  ;;  %v1917_v35 = vpop.f32.mrb[10].mxu1  ;;  %v1854_v36 = vpop.f32.mrb[11].mxu0 }
 0x10a   :  { %v1855_v37 = vadd.f32 %v1854_v36, %v1853_v33  ;;  %v1918_v38 = vpop.f32.mrb[11].mxu1 }
 0x10b   :  { %v2561_v39 = vadd.f32 %v1916_v34, %v1852_v31  ;;  %v1919_v40 = vadd.f32 %v1918_v38, %v1917_v35 }
 0x10d   :  { %v2563_v41 = vadd.f32 %v1919_v40, %v1855_v37 }
 0x10e   :  { %v1856_v42 = vpop.f32.mrb[12].mxu0 }
 0x10f   :  { %v1920_v43 = vpop.f32.mrb[12].mxu1  ;;  %v1857_v44 = vpop.f32.mrb[13].mxu0 }
 0x110   :  { %v1858_v45 = vadd.f32 %v1857_v44, %v1856_v42  ;;  %v1921_v46 = vpop.f32.mrb[13].mxu1  ;;  %v1859_v47 = vpop.f32.mrb[14].mxu0 }
 0x111   :  { %v1922_v48 = vadd.f32 %v1921_v46, %v1920_v43  ;;  %v1923_v49 = vpop.f32.mrb[14].mxu1  ;;  %v1860_v50 = vpop.f32.mrb[15].mxu0 }
 0x112   :  { %v1861_v51 = vadd.f32 %v1860_v50, %v1859_v47  ;;  %v1924_v52 = vpop.f32.mrb[15].mxu1 }
 0x113   :  { %v2565_v53 = vadd.f32 %v1922_v48, %v1858_v45  ;;  %v1925_v54 = vadd.f32 %v1924_v52, %v1923_v49 }
 0x115   :  { %v2567_v55 = vadd.f32 %v1925_v54, %v1861_v51 }
 0x116   :  { %v1862_v56 = vpop.f32.mrb[16].mxu0 }
 0x117   :  { %v1926_v57 = vpop.f32.mrb[16].mxu1  ;;  %v1863_v58 = vpop.f32.mrb[17].mxu0 }
 0x118   :  { %v1864_v59 = vadd.f32 %v1863_v58, %v1862_v56  ;;  %v1927_v60 = vpop.f32.mrb[17].mxu1  ;;  %v1865_v61 = vpop.f32.mrb[18].mxu0 }
 0x119   :  { %v1928_v62 = vadd.f32 %v1927_v60, %v1926_v57  ;;  %v1929_v63 = vpop.f32.mrb[18].mxu1  ;;  %v1866_v0 = vpop.f32.mrb[19].mxu0 }
 0x11a   :  { %v1867_v1 = vadd.f32 %v1866_v0, %v1865_v61  ;;  %v1930_v2 = vpop.f32.mrb[19].mxu1 }
 0x11b   :  { %v2569_v3 = vadd.f32 %v1928_v62, %v1864_v59  ;;  %v1931_v4 = vadd.f32 %v1930_v2, %v1929_v63 }
 0x11d   :  { %v2571_v5 = vadd.f32 %v1931_v4, %v1867_v1 }
 0x11e   :  { %v1868_v6 = vpop.f32.mrb[20].mxu0 }
 0x11f   :  { %v1932_v7 = vpop.f32.mrb[20].mxu1  ;;  %v1869_v8 = vpop.f32.mrb[21].mxu0 }
 0x120   :  { %v1870_v9 = vadd.f32 %v1869_v8, %v1868_v6  ;;  %v1933_v10 = vpop.f32.mrb[21].mxu1  ;;  %v1871_v12 = vpop.f32.mrb[22].mxu0 }
 0x121   :  { %v1934_v14 = vadd.f32 %v1933_v10, %v1932_v7  ;;  %v1935_v15 = vpop.f32.mrb[22].mxu1  ;;  %v1872_v16 = vpop.f32.mrb[23].mxu0 }
 0x122   :  { %v1873_v17 = vadd.f32 %v1872_v16, %v1871_v12  ;;  %v1936_v18 = vpop.f32.mrb[23].mxu1 }
 0x123   :  { %v2573_v19 = vadd.f32 %v1934_v14, %v1870_v9  ;;  %v1937_v20 = vadd.f32 %v1936_v18, %v1935_v15 }
 0x125   :  { %v2575_v21 = vadd.f32 %v1937_v20, %v1873_v17 }
 0x126   :  { %v1874_v22 = vpop.f32.mrb[24].mxu0 }
 0x127   :  { %v1938_v23 = vpop.f32.mrb[24].mxu1  ;;  %v1875_v24 = vpop.f32.mrb[25].mxu0 }
 0x128   :  { %v1876_v26 = vadd.f32 %v1875_v24, %v1874_v22  ;;  %v1939_v28 = vpop.f32.mrb[25].mxu1  ;;  %v1877_v29 = vpop.f32.mrb[26].mxu0 }
 0x129   :  { %v1940_v30 = vadd.f32 %v1939_v28, %v1938_v23  ;;  %v1941_v31 = vpop.f32.mrb[26].mxu1  ;;  %v1878_v32 = vpop.f32.mrb[27].mxu0 }
 0x12a   :  { %v1879_v33 = vadd.f32 %v1878_v32, %v1877_v29  ;;  %v1942_v34 = vpop.f32.mrb[27].mxu1 }
 0x12b   :  { %v2577_v35 = vadd.f32 %v1940_v30, %v1876_v26  ;;  %v1943_v36 = vadd.f32 %v1942_v34, %v1941_v31 }
 0x12d   :  { %v2579_v37 = vadd.f32 %v1943_v36, %v1879_v33 }
 0x12e   :  { %v1880_v38 = vpop.f32.mrb[28].mxu0 }
 0x12f   :  { %v1944_v40 = vpop.f32.mrb[28].mxu1  ;;  %v1881_v42 = vpop.f32.mrb[29].mxu0 }
 0x130   :  { %v1882_v43 = vadd.f32 %v1881_v42, %v1880_v38  ;;  %v1945_v44 = vpop.f32.mrb[29].mxu1  ;;  %v1883_v45 = vpop.f32.mrb[30].mxu0 }
 0x131   :  { %v1946_v46 = vadd.f32 %v1945_v44, %v1944_v40  ;;  %v1947_v47 = vpop.f32.mrb[30].mxu1  ;;  %v1884_v48 = vpop.f32.mrb[31].mxu0 }
 0x132   :  { %v1885_v49 = vadd.f32 %v1884_v48, %v1883_v45  ;;  %v1948_v50 = vpop.f32.mrb[31].mxu1 }
 0x133   :  { %v2581_v51 = vadd.f32 %v1946_v46, %v1882_v43  ;;  %v1949_v52 = vadd.f32 %v1948_v50, %v1947_v47 }
 0x135   :  { %v2583_v54 = vadd.f32 %v1949_v52, %v1885_v49 }
 0x136   :  { %v1966_v56 = vpop.f32.mrb[32].mxu0 }
 0x137   :  { %v2030_v57 = vpop.f32.mrb[32].mxu1  ;;  %v1967_v58 = vpop.f32.mrb[33].mxu0 }
 0x138   :  { %v1968_v59 = vadd.f32 %v1967_v58, %v1966_v56  ;;  %v2031_v60 = vpop.f32.mrb[33].mxu1  ;;  %v1969_v61 = vpop.f32.mrb[34].mxu0 }
 0x139   :  { %v2032_v62 = vadd.f32 %v2031_v60, %v2030_v57  ;;  %v2033_v63 = vpop.f32.mrb[34].mxu1  ;;  %v1970_v0 = vpop.f32.mrb[35].mxu0 }
 0x13a   :  { %v1143_v1 = vadd.f32 %v1968_v59, %v2553_v11  ;;  %v1971_v2 = vadd.f32 %v1970_v0, %v1969_v61  ;;  %v2034_v4 = vpop.f32.mrb[35].mxu1 }
 0x13b   :  { %v2035_v6 = vadd.f32 %v2034_v4, %v2033_v63 }
 0x13c   :  { %v2586_v7 = vadd.f32 %v2032_v62, %v1143_v1  ;;  %v1146_v8 = vadd.f32 %v1971_v2, %v2555_v13 }
 0x13e   :  { %v2589_v9 = vadd.f32 %v2035_v6, %v1146_v8  ;;  %v1972_v10 = vpop.f32.mrb[36].mxu0 }
 0x13f   :  { %v2036_v12 = vpop.f32.mrb[36].mxu1  ;;  %v1973_v14 = vpop.f32.mrb[37].mxu0 }
 0x140   :  { %v1340_v15 = vadd.f32 %v2589_v9, %v2586_v7  ;;  %v1974_v16 = vadd.f32 %v1973_v14, %v1972_v10  ;;  %v2037_v17 = vpop.f32.mrb[37].mxu1  ;;  %v1975_v18 = vpop.f32.mrb[38].mxu0 }
 0x141   :  { %v2038_v20 = vadd.f32 %v2037_v17, %v2036_v12  ;;  %v2039_v11 = vpop.f32.mrb[38].mxu1  ;;  %v1976_v22 = vpop.f32.mrb[39].mxu0 }
 0x142   :  { %v1151_v23 = vadd.f32 %v1974_v16, %v2557_v25  ;;  %v1977_v24 = vadd.f32 %v1976_v22, %v1975_v18  ;;  %v2040_v26 = vpop.f32.mrb[39].mxu1 }
 0x143   :  { %v2041_v28 = vadd.f32 %v2040_v26, %v2039_v11 }
 0x144   :  { %v2594_v13 = vadd.f32 %v2038_v20, %v1151_v23  ;;  %v1154_v29 = vadd.f32 %v1977_v24, %v2559_v27 }
 0x146   :  { %v1341_v30 = vadd.f32 %v1340_v15, %v2594_v13  ;;  %v2598_v31 = vadd.f32 %v2041_v28, %v1154_v29  ;;  %v1978_v32 = vpop.f32.mrb[40].mxu0 }
 0x147   :  { %v2042_v33 = vpop.f32.mrb[40].mxu1  ;;  %v1979_v34 = vpop.f32.mrb[41].mxu0 }
 0x148   :  { %v1342_v36 = vadd.f32 %v1341_v30, %v2598_v31  ;;  %v1980_v38 = vadd.f32 %v1979_v34, %v1978_v32  ;;  %v2043_v40 = vpop.f32.mrb[41].mxu1  ;;  %v1981_v42 = vpop.f32.mrb[42].mxu0 }
 0x149   :  { %v2044_v25 = vadd.f32 %v2043_v40, %v2042_v33  ;;  %v2045_v43 = vpop.f32.mrb[42].mxu1  ;;  %v1982_v44 = vpop.f32.mrb[43].mxu0 }
 0x14a   :  { %v1159_v45 = vadd.f32 %v1980_v38, %v2561_v39  ;;  %v1983_v46 = vadd.f32 %v1982_v44, %v1981_v42  ;;  %v2046_v47 = vpop.f32.mrb[43].mxu1 }
 0x14b   :  { %v2047_v27 = vadd.f32 %v2046_v47, %v2045_v43 }
 0x14c   :  { %v2602_v48 = vadd.f32 %v2044_v25, %v1159_v45  ;;  %v1162_v49 = vadd.f32 %v1983_v46, %v2563_v41 }
 0x14e   :  { %v1343_v50 = vadd.f32 %v1342_v36, %v2602_v48  ;;  %v2606_v52 = vadd.f32 %v2047_v27, %v1162_v49  ;;  %v1984_v56 = vpop.f32.mrb[44].mxu0 }
 0x14f   :  { %v2048_v57 = vpop.f32.mrb[44].mxu1  ;;  %v1985_v58 = vpop.f32.mrb[45].mxu0 }
 0x150   :  { %v1344_v59 = vadd.f32 %v1343_v50, %v2606_v52  ;;  %v1986_v60 = vadd.f32 %v1985_v58, %v1984_v56  ;;  %v2049_v61 = vpop.f32.mrb[45].mxu1  ;;  %v1987_v62 = vpop.f32.mrb[46].mxu0 }
 0x151   :  { %v2050_v39 = vadd.f32 %v2049_v61, %v2048_v57  ;;  %v2051_v63 = vpop.f32.mrb[46].mxu1  ;;  %v1988_v0 = vpop.f32.mrb[47].mxu0 }
 0x152   :  { %v1167_v1 = vadd.f32 %v1986_v60, %v2565_v53  ;;  %v1989_v2 = vadd.f32 %v1988_v0, %v1987_v62  ;;  %v2052_v4 = vpop.f32.mrb[47].mxu1 }
 0x153   :  { %v2053_v41 = vadd.f32 %v2052_v4, %v2051_v63 }
 0x154   :  { %v2610_v6 = vadd.f32 %v2050_v39, %v1167_v1  ;;  %v1170_v8 = vadd.f32 %v1989_v2, %v2567_v55 }
 0x156   :  { %v1345_v10 = vadd.f32 %v1344_v59, %v2610_v6  ;;  %v2614_v12 = vadd.f32 %v2053_v41, %v1170_v8  ;;  %v1990_v14 = vpop.f32.mrb[48].mxu0 }
 0x157   :  { %v2054_v15 = vpop.f32.mrb[48].mxu1  ;;  %v1991_v16 = vpop.f32.mrb[49].mxu0 }
 0x158   :  { %v1346_v17 = vadd.f32 %v1345_v10, %v2614_v12  ;;  %v1992_v18 = vadd.f32 %v1991_v16, %v1990_v14  ;;  %v2055_v20 = vpop.f32.mrb[49].mxu1  ;;  %v1993_v11 = vpop.f32.mrb[50].mxu0 }
 0x159   :  { %v2056_v53 = vadd.f32 %v2055_v20, %v2054_v15  ;;  %v2057_v22 = vpop.f32.mrb[50].mxu1  ;;  %v1994_v23 = vpop.f32.mrb[51].mxu0 }
 0x15a   :  { %v1175_v24 = vadd.f32 %v1992_v18, %v2569_v3  ;;  %v1995_v26 = vadd.f32 %v1994_v23, %v1993_v11  ;;  %v2058_v28 = vpop.f32.mrb[51].mxu1 }
 0x15b   :  { %v2059_v55 = vadd.f32 %v2058_v28, %v2057_v22 }
 0x15c   :  { %v2618_v29 = vadd.f32 %v2056_v53, %v1175_v24  ;;  %v1178_v30 = vadd.f32 %v1995_v26, %v2571_v5 }
 0x15e   :  { %v1347_v32 = vadd.f32 %v1346_v17, %v2618_v29  ;;  %v2622_v33 = vadd.f32 %v2059_v55, %v1178_v30  ;;  %v1996_v34 = vpop.f32.mrb[52].mxu0 }
 0x15f   :  { %v2060_v36 = vpop.f32.mrb[52].mxu1  ;;  %v1997_v38 = vpop.f32.mrb[53].mxu0 }
 0x160   :  { %v1348_v40 = vadd.f32 %v1347_v32, %v2622_v33  ;;  %v1998_v42 = vadd.f32 %v1997_v38, %v1996_v34  ;;  %v2061_v25 = vpop.f32.mrb[53].mxu1  ;;  %v1999_v43 = vpop.f32.mrb[54].mxu0 }
 0x161   :  { %v2062_v3 = vadd.f32 %v2061_v25, %v2060_v36  ;;  %v2063_v44 = vpop.f32.mrb[54].mxu1  ;;  %v2000_v45 = vpop.f32.mrb[55].mxu0 }
 0x162   :  { %v1183_v46 = vadd.f32 %v1998_v42, %v2573_v19  ;;  %v2001_v47 = vadd.f32 %v2000_v45, %v1999_v43  ;;  %v2064_v27 = vpop.f32.mrb[55].mxu1 }
 0x163   :  { %v2065_v5 = vadd.f32 %v2064_v27, %v2063_v44 }
 0x164   :  { %v1280_v49 = vadd.f32 %v2062_v3, %v1183_v46  ;;  %v1186_v50 = vadd.f32 %v2001_v47, %v2575_v21 }
 0x166   :  { %v1349_v56 = vadd.f32 %v1348_v40, %v1280_v49  ;;  %v1283_v57 = vadd.f32 %v2065_v5, %v1186_v50  ;;  %v2002_v58 = vpop.f32.mrb[56].mxu0 }
 0x167   :  { %v2066_v59 = vpop.f32.mrb[56].mxu1  ;;  %v2003_v60 = vpop.f32.mrb[57].mxu0 }
 0x168   :  { %v1350_v61 = vadd.f32 %v1349_v56, %v1283_v57  ;;  %v2004_v62 = vadd.f32 %v2003_v60, %v2002_v58  ;;  %v2067_v39 = vpop.f32.mrb[57].mxu1  ;;  %v2005_v63 = vpop.f32.mrb[58].mxu0 }
 0x169   :  { %v2068_v0 = vadd.f32 %v2067_v39, %v2066_v59  ;;  %v2069_v1 = vpop.f32.mrb[58].mxu1  ;;  %v2006_v2 = vpop.f32.mrb[59].mxu0 }
 0x16a   :  { %v1191_v19 = vadd.f32 %v2004_v62, %v2577_v35  ;;  %v2007_v4 = vadd.f32 %v2006_v2, %v2005_v63  ;;  %v2070_v41 = vpop.f32.mrb[59].mxu1 }
 0x16b   :  { %v2071_v8 = vadd.f32 %v2070_v41, %v2069_v1 }
 0x16c   :  { %v1288_v10 = vadd.f32 %v2068_v0, %v1191_v19  ;;  %v1194_v21 = vadd.f32 %v2007_v4, %v2579_v37 }
 0x16e   :  { %v1351_v14 = vadd.f32 %v1350_v61, %v1288_v10  ;;  %v1291_v15 = vadd.f32 %v2071_v8, %v1194_v21  ;;  %v2008_v16 = vpop.f32.mrb[60].mxu0 }
 0x16f   :  { %v2072_v17 = vpop.f32.mrb[60].mxu1  ;;  %v2009_v18 = vpop.f32.mrb[61].mxu0 }
 0x170   :  { %v1352_v20 = vadd.f32 %v1351_v14, %v1291_v15  ;;  %v2010_v11 = vadd.f32 %v2009_v18, %v2008_v16  ;;  %v2073_v53 = vpop.f32.mrb[61].mxu1  ;;  %v2011_v22 = vpop.f32.mrb[62].mxu0 }
 0x171   :  { %v2074_v23 = vadd.f32 %v2073_v53, %v2072_v17  ;;  %v2075_v24 = vpop.f32.mrb[62].mxu1  ;;  %v2012_v26 = vpop.f32.mrb[63].mxu0 }
 0x172   :  { %v1199_v35 = vadd.f32 %v2010_v11, %v2581_v51  ;;  %v2013_v28 = vadd.f32 %v2012_v26, %v2011_v22  ;;  %v2076_v55 = vpop.f32.mrb[63].mxu1 }
 0x173   :  { %v2077_v30 = vadd.f32 %v2076_v55, %v2075_v24 }
 0x174   :  { %v1296_v32 = vadd.f32 %v2074_v23, %v1199_v35  ;;  %v1202_v37 = vadd.f32 %v2013_v28, %v2583_v54 }
 0x176   :  { %v1353_v34 = vadd.f32 %v1352_v20, %v1296_v32  ;;  %v1299_v36 = vadd.f32 %v2077_v30, %v1202_v37 }
 0x178   :  { %v1354_v38 = vadd.f32 %v1353_v34, %v1299_v36 }
 0x17a   :  { %v1355_v40 = vrot.slane %v1354_v38, 4 }
 0x17c   :  { %v1356_v42 = vadd.f32 %v1355_v40, %v1354_v38 }
 0x17e   :  { %v1357_v25 = vrot.slane %v1356_v42, 2 }
 0x180   :  { %v1358_v43 = vadd.f32 %v1357_v25, %v1356_v42 }
 0x182   :  { %v1359_v3 = vrot.slane %v1358_v43, 1 }
 0x184   :  { %v1360_v44 = vadd.f32 %v1359_v3, %v1358_v43 }
 0x186   :  { %v1362_v45 = vmul.f32 0.0078125, %v1360_v44 }
 0x188   :  { %v1363_v46 = vsub.f32 %v2586_v7, %v1362_v45  ;;  %v1364_v51 = vsub.f32 %v2589_v9, %v1362_v45  ;;  %v1365_v47 = vsub.f32 %v2594_v13, %v1362_v45  ;;  %v1366_v27 = vsub.f32 %v2598_v31, %v1362_v45 }
 0x189   :  { %v1367_v54 = vsub.f32 %v2602_v48, %v1362_v45  ;;  %v1368_v5 = vsub.f32 %v2606_v52, %v1362_v45  ;;  %v1369_v50 = vsub.f32 %v2610_v6, %v1362_v45  ;;  %v1370_v56 = vsub.f32 %v2614_v12, %v1362_v45 }
 0x18a   :  { %v1371_v58 = vsub.f32 %v2618_v29, %v1362_v45  ;;  %v1372_v59 = vsub.f32 %v2622_v33, %v1362_v45  ;;  %v1373_v60 = vsub.f32 %v1280_v49, %v1362_v45  ;;  %v1374_v7 = vsub.f32 %v1283_v57, %v1362_v45 }
 0x18b   :  { %v1375_v61 = vsub.f32 %v1288_v10, %v1362_v45  ;;  %v1376_v9 = vsub.f32 %v1291_v15, %v1362_v45  ;;  %v1377_v62 = vsub.f32 %v1296_v32, %v1362_v45  ;;  %v1378_v13 = vsub.f32 %v1299_v36, %v1362_v45 }
 0x18c   :  { %v1379_v39 = vmul.f32 %v1363_v46, %v1363_v46  ;;  %v1380_v31 = vmul.f32 %v1364_v51, %v1364_v51  ;;  %v1381_v63 = vmul.f32 %v1365_v47, %v1365_v47  ;;  %v1382_v0 = vmul.f32 %v1366_v27, %v1366_v27 }
 0x18d   :  { %v1383_v1 = vmul.f32 %v1367_v54, %v1367_v54  ;;  %v1384_v2 = vmul.f32 %v1368_v5, %v1368_v5  ;;  %v1385_v19 = vmul.f32 %v1369_v50, %v1369_v50  ;;  %v1386_v4 = vmul.f32 %v1370_v56, %v1370_v56 }
 0x18e   :  { %v1395_v48 = vadd.f32 %v1380_v31, %v1379_v39  ;;  %v1387_v49 = vmul.f32 %v1371_v58, %v1371_v58  ;;  %v1388_v41 = vmul.f32 %v1372_v59, %v1372_v59  ;;  %v1389_v10 = vmul.f32 %v1373_v60, %v1373_v60  ;;  %v1741_v39 = vld [vmem:[%s2689_s2] ss:$0 sm:$0xff] }
 0x18f   :  { %v1390_v14 = vmul.f32 %v1374_v7, %v1374_v7  ;;  %v1391_v16 = vmul.f32 %v1375_v61, %v1375_v61  ;;  %v1392_v18 = vmul.f32 %v1376_v9, %v1376_v9  ;;  %v1393_v11 = vmul.f32 %v1377_v62, %v1377_v62 }
 0x190   :  { %v1396_v52 = vadd.f32 %v1395_v48, %v1381_v63  ;;  %v1394_v22 = vmul.f32 %v1378_v13, %v1378_v13 }
 0x192   :  { %v1397_v6 = vadd.f32 %v1396_v52, %v1382_v0 }
 0x194   :  { %v1398_v12 = vadd.f32 %v1397_v6, %v1383_v1 }
 0x196   :  { %v1399_v29 = vadd.f32 %v1398_v12, %v1384_v2  ;;  %v1742_v12 = vld [vmem:[%s2690_s3] ss:$0 sm:$0xff] }
 0x198   :  { %v1400_v33 = vadd.f32 %v1399_v29, %v1385_v19 }
 0x19a   :  { %v1401_v57 = vadd.f32 %v1400_v33, %v1386_v4 }
 0x19c   :  { %v1402_v8 = vadd.f32 %v1401_v57, %v1387_v49 }
 0x19e   :  { %v1403_v21 = vadd.f32 %v1402_v8, %v1388_v41 }
 0x1a0   :  { %v1404_v15 = vadd.f32 %v1403_v21, %v1389_v10 }
 0x1a2   :  { %v1405_v17 = vadd.f32 %v1404_v15, %v1390_v14 }
 0x1a4   :  { %v1406_v20 = vadd.f32 %v1405_v17, %v1391_v16 }
 0x1a6   :  { %v1407_v53 = vadd.f32 %v1406_v20, %v1392_v18 }
 0x1a8   :  { %v1408_v23 = vadd.f32 %v1407_v53, %v1393_v11 }
 0x1aa   :  { %v1409_v24 = vadd.f32 %v1408_v23, %v1394_v22 }
 0x1ac   :  { %v1410_v26 = vrot.slane %v1409_v24, 4 }
 0x1ae   :  { %v1411_v35 = vadd.f32 %v1410_v26, %v1409_v24 }
 0x1b0   :  { %v1412_v28 = vrot.slane %v1411_v35, 2 }
 0x1b2   :  { %v1413_v55 = vadd.f32 %v1412_v28, %v1411_v35 }
 0x1b4   :  { %v1414_v30 = vrot.slane %v1413_v55, 1 }
 0x1b6   :  { %v1415_v32 = vadd.f32 %v1414_v30, %v1413_v55 }
 0x1b8   :  { %v1416_v37 = vmul.f32 0.0078125, %v1415_v32 }
 0x1ba   :  { %v1417_v34 = vadd.f32 1e-05, %v1416_v37 }
 0x1bc   :  { %2142 = vrsqrt.f32 %v1417_v34 }
 0x1c6   :  { %v2143_v36 = vpop.eup %2142 }
 0x1c7   :  { %v1419_v38 = vmul.f32 %v2143_v36, %v1363_v46  ;;  %v1420_v40 = vmul.f32 %v2143_v36, %v1364_v51  ;;  %v1421_v42 = vmul.f32 %v2143_v36, %v1365_v47  ;;  %v1422_v25 = vmul.f32 %v2143_v36, %v1366_v27 }
 0x1c8   :  { %v1423_v43 = vmul.f32 %v2143_v36, %v1367_v54  ;;  %v1424_v3 = vmul.f32 %v2143_v36, %v1368_v5  ;;  %v1425_v44 = vmul.f32 %v2143_v36, %v1369_v50  ;;  %v1426_v45 = vmul.f32 %v2143_v36, %v1370_v56 }
 0x1c9   :  { %v1427_v31 = vmul.f32 %v2143_v36, %v1371_v58  ;;  %v1428_v63 = vmul.f32 %v2143_v36, %v1372_v59  ;;  %v1429_v48 = vmul.f32 %v2143_v36, %v1373_v60  ;;  %v1430_v0 = vmul.f32 %v2143_v36, %v1374_v7 }
 0x1ca   :  { %v1431_v52 = vmul.f32 %v2143_v36, %v1375_v61  ;;  %v1432_v1 = vmul.f32 %v2143_v36, %v1376_v9  ;;  %v1433_v6 = vmul.f32 %v2143_v36, %v1377_v62  ;;  %v1434_v2 = vmul.f32 %v2143_v36, %v1378_v13 }
 0x1cb   :  { %v1442_v46 = vmul.f32 %v1741_v39, %v1419_v38  ;;  %v1443_v51 = vmul.f32 %v1741_v39, %v1420_v40  ;;  %v1444_v47 = vmul.f32 %v1741_v39, %v1421_v42  ;;  %v1445_v27 = vmul.f32 %v1741_v39, %v1422_v25 }
 0x1cc   :  { %v1446_v54 = vmul.f32 %v1741_v39, %v1423_v43  ;;  %v1447_v5 = vmul.f32 %v1741_v39, %v1424_v3  ;;  %v1448_v50 = vmul.f32 %v1741_v39, %v1425_v44  ;;  %v1449_v56 = vmul.f32 %v1741_v39, %v1426_v45 }
 0x1cd   :  { %v1450_v58 = vmul.f32 %v1741_v39, %v1427_v31  ;;  %v1451_v59 = vmul.f32 %v1741_v39, %v1428_v63  ;;  %v1452_v60 = vmul.f32 %v1741_v39, %v1429_v48  ;;  %v1453_v7 = vmul.f32 %v1741_v39, %v1430_v0 }
 0x1ce   :  { %v1454_v61 = vmul.f32 %v1741_v39, %v1431_v52  ;;  %v1455_v9 = vmul.f32 %v1741_v39, %v1432_v1  ;;  %v1456_v62 = vmul.f32 %v1741_v39, %v1433_v6  ;;  %v1457_v13 = vmul.f32 %v1741_v39, %v1434_v2 }
 0x1cf   :  { %v1465_v19 = vadd.f32 %v1742_v12, %v1442_v46  ;;  %v1466_v29 = vadd.f32 %v1742_v12, %v1443_v51  ;;  %v1467_v4 = vadd.f32 %v1742_v12, %v1444_v47  ;;  %v1468_v33 = vadd.f32 %v1742_v12, %v1445_v27 }
 0x1d0   :  { %v1469_v49 = vadd.f32 %v1742_v12, %v1446_v54  ;;  %v1470_v57 = vadd.f32 %v1742_v12, %v1447_v5  ;;  %v1471_v41 = vadd.f32 %v1742_v12, %v1448_v50  ;;  %v1472_v8 = vadd.f32 %v1742_v12, %v1449_v56 }
 0x1d1   :  { %v1473_v10 = vadd.f32 %v1742_v12, %v1450_v58  ;;  %v1474_v21 = vadd.f32 %v1742_v12, %v1451_v59  ;;  %v1475_v14 = vadd.f32 %v1742_v12, %v1452_v60  ;;  %v1476_v15 = vadd.f32 %v1742_v12, %v1453_v7 }
 0x1d2   :  { %v1477_v16 = vadd.f32 %v1742_v12, %v1454_v61  ;;  %v1478_v17 = vadd.f32 %v1742_v12, %v1455_v9  ;;  %v1479_v18 = vadd.f32 %v1742_v12, %v1456_v62  ;;  %v1480_v20 = vadd.f32 %v1742_v12, %v1457_v13 }
 0x1d3   :  { %vm1481_vm0 = vcmp.gt.f32.partialorder %v1465_v19, 0.0  ;;  %vm1482_vm1 = vcmp.gt.f32.partialorder %v1466_v29, 0.0  ;;  %vm1483_vm2 = vcmp.gt.f32.partialorder %v1467_v4, 0.0  ;;  %vm1484_vm3 = vcmp.gt.f32.partialorder %v1468_v33, 0.0 }
 0x1d4   :  { %vm1485_vm4 = vcmp.gt.f32.partialorder %v1469_v49, 0.0  ;;  %vm1486_vm5 = vcmp.gt.f32.partialorder %v1470_v57, 0.0  ;;  %vm1487_vm6 = vcmp.gt.f32.partialorder %v1471_v41, 0.0  ;;  %vm1488_vm7 = vcmp.gt.f32.partialorder %v1472_v8, 0.0 }
 0x1d5   :  { %vm1489_vm8 = vcmp.gt.f32.partialorder %v1473_v10, 0.0  ;;  %vm1490_vm9 = vcmp.gt.f32.partialorder %v1474_v21, 0.0  ;;  %vm1491_vm10 = vcmp.gt.f32.partialorder %v1475_v14, 0.0  ;;  %vm1492_vm11 = vcmp.gt.f32.partialorder %v1476_v15, 0.0 }
 0x1d6   :  { %vm1493_vm12 = vcmp.gt.f32.partialorder %v1477_v16, 0.0  ;;  %vm1494_vm13 = vcmp.gt.f32.partialorder %v1478_v17, 0.0  ;;  %vm1495_vm14 = vcmp.gt.f32.partialorder %v1479_v18, 0.0  ;;  %vm1496_vm15 = vcmp.gt.f32.partialorder %v1480_v20, 0.0 }
 0x1d7   :  { %v1497_v11 = vmul.f32 0.2, %v1465_v19  ;;  %v1498_v53 = vmul.f32 0.2, %v1466_v29  ;;  %v1499_v22 = vmul.f32 0.2, %v1467_v4 }
 0x1d8   :  { %v1500_v23 = vmul.f32 0.2, %v1468_v33  ;;  %v1501_v24 = vmul.f32 0.2, %v1469_v49  ;;  %v1502_v26 = vmul.f32 0.2, %v1470_v57 }
 0x1d9   :  { %v1503_v35 = vmul.f32 0.2, %v1471_v41  ;;  %v1504_v28 = vmul.f32 0.2, %v1472_v8  ;;  %v1505_v55 = vmul.f32 0.2, %v1473_v10  ;;  %v1513_v30 = vsel %vm1481_vm0, %v1465_v19, %v1497_v11 }
 0x1da   :  { %v1506_v32 = vmul.f32 0.2, %v1474_v21  ;;  %v1507_v37 = vmul.f32 0.2, %v1475_v14  ;;  %v1508_v34 = vmul.f32 0.2, %v1476_v15  ;;  %v1514_v36 = vsel %vm1482_vm1, %v1466_v29, %v1498_v53 }
 0x1db   :  { %v1509_v38 = vmul.f32 0.2, %v1477_v16  ;;  %v1510_v40 = vmul.f32 0.2, %v1478_v17  ;;  %v1511_v42 = vmul.f32 0.2, %v1479_v18  ;;  %v1515_v25 = vsel %vm1483_vm2, %v1467_v4, %v1499_v22 }
 0x1dc   :  { %v1512_v43 = vmul.f32 0.2, %v1480_v20  ;;  %v1516_v3 = vsel %vm1484_vm3, %v1468_v33, %v1500_v23  ;;  %v1517_v44 = vsel %vm1485_vm4, %v1469_v49, %v1501_v24  ;;  %v1518_v45 = vsel %vm1486_vm5, %v1470_v57, %v1502_v26 }
 0x1dd   :  { %v1519_v39 = vsel %vm1487_vm6, %v1471_v41, %v1503_v35  ;;  %v1520_v31 = vsel %vm1488_vm7, %v1472_v8, %v1504_v28  ;;  %v1521_v63 = vsel %vm1489_vm8, %v1473_v10, %v1505_v55  ;;  %v1522_v48 = vsel %vm1490_vm9, %v1474_v21, %v1506_v32 }
 0x1de   :  { %v1523_v0 = vsel %vm1491_vm10, %v1475_v14, %v1507_v37  ;;  %v1524_v52 = vsel %vm1492_vm11, %v1476_v15, %v1508_v34  ;;  %v1525_v1 = vsel %vm1493_vm12, %v1477_v16, %v1509_v38  ;;  %v1526_v6 = vsel %vm1494_vm13, %v1478_v17, %v1510_v40 }
 0x1df   :  { %v1527_v2 = vsel %vm1495_vm14, %v1479_v18, %v1511_v42  ;;  %v1528_v46 = vsel %vm1496_vm15, %v1480_v20, %v1512_v43  ;;  %v1778_v51 = vpack.c.bf16 %v1514_v36, %v1513_v30  ;;  %v1783_v47 = vpack.c.bf16 %v1516_v3, %v1515_v25 }
 0x1e0   :  { %v1788_v27 = vpack.c.bf16 %v1518_v45, %v1517_v44  ;;  %v1793_v54 = vpack.c.bf16 %v1520_v31, %v1519_v39  ;;  %v1798_v5 = vpack.c.bf16 %v1522_v48, %v1521_v63  ;;  %v1803_v50 = vpack.c.bf16 %v1524_v52, %v1523_v0 }
 0x1e1   :  { %1779 = vst [vmem:[%s2691_s4] sm:$0xff] %v1778_v51   ;;  %1815 = vst [vmem:[%s2691_s4 + $0x8] sm:$0xff] %v1783_v47   ;;  %v1808_v56 = vpack.c.bf16 %v1526_v6, %v1525_v1  ;;  %v1813_v12 = vpack.c.bf16 %v1528_v46, %v1527_v2 }
 0x1e2   :  { %1816 = vst [vmem:[%s2691_s4 + $0x10] sm:$0xff] %v1788_v27   ;;  %1817 = vst [vmem:[%s2691_s4 + $0x18] sm:$0xff] %v1793_v54  }
 0x1e3   :  { %1818 = vst [vmem:[%s2691_s4 + $0x20] sm:$0xff] %v1798_v5   ;;  %1819 = vst [vmem:[%s2691_s4 + $0x28] sm:$0xff] %v1803_v50  }
 0x1e4   :  { %1820 = vst [vmem:[%s2691_s4 + $0x30] sm:$0xff] %v1808_v56   ;;  %1821 = vst [vmem:[%s2691_s4 + $0x38] sm:$0xff] %v1813_v12  }

// kernel: discriminator_forward.5
= control target key start
LH: loop header
LB: loop body
LE: loop exit
PB: predicated region body
PF: predicated region fallthrough
CT: control target
= control target key end

     0   :  { %vm2370_vm8 = vcmask 130112   ;;  %vm2381_vm9 = vcmask 1041409   ;;  %vm2384_vm10 = vcmask 123904   ;;  %vm2394_vm11 = vcmask 1024   ;;  %s4112_s1 = inlined_call_operand.vmem [shape: bf16[2048,256], index: 1, kind: input, shape index: {}]   ;;  %s4113_s0 = inlined_call_operand.vmem [shape: bf16[32,2048], index: 0, kind: input, shape index: {}]   ;;  %s4114_s2 = inlined_call_operand.vmem [shape: f32[1,256], index: 2, kind: input, shape index: {}]   ;;  %s4115_s3 = inlined_call_operand.vmem [shape: f32[1,256], index: 3, kind: input, shape index: {}]   ;;  %s4116_s4 = inlined_call_operand.vmem [shape: f32[16,256], index: 4, kind: input, shape index: {}]   ;;  %s4117_s5 = inlined_call_operand.vmem [shape: f32[2,1], index: 5, kind: output, shape index: {}]  }
   0x1   :  { %v2747_v0 = vld [vmem:[%s4112_s1 + $0x4] ss:$8 sps:$4 sm:$0xff]   ;;  %v2751_v2 = vld [vmem:[%s4112_s1] ss:$8 sps:$4 sm:$0xff]   ;;  %v2753_v4 = vld [vmem:[%s4112_s1 + $0x14] ss:$8 sps:$4 sm:$0xff]  }
   0x2   :  { %v2749_v1 = vld [vmem:[%s4112_s1 + $0x404] ss:$8 sps:$4 sm:$0xff]   ;;  %1748 = vmatprep.subr.bf16.mxu1 %v2747_v0  ;;  %v2752_v3 = vld [vmem:[%s4112_s1 + $0x400] ss:$8 sps:$4 sm:$0xff]   ;;  %v2755_v5 = vld [vmem:[%s4112_s1 + $0x414] ss:$8 sps:$4 sm:$0xff]  }
   0x3   :  { %1960 = vmatprep.subr.bf16.mxu0 %v2749_v1  ;;  %1749 = vmatpush1.bf16.msra.mxu1 %v2751_v2  ;;  %v2757_v6 = vld [vmem:[%s4112_s1 + $0x10] ss:$8 sps:$4 sm:$0xff]   ;;  %v2759_v8 = vld [vmem:[%s4112_s1 + $0x24] ss:$8 sps:$4 sm:$0xff]   ;;  %v2763_v10 = vld [vmem:[%s4112_s1 + $0x20] ss:$8 sps:$4 sm:$0xff]  }
   0x4   :  { %1961 = vmatpush1.bf16.msra.mxu0 %v2752_v3  ;;  %1750 = vmatprep.subr.bf16.mxu1 %v2753_v4  ;;  %v2758_v7 = vld [vmem:[%s4112_s1 + $0x410] ss:$8 sps:$4 sm:$0xff]   ;;  %v2761_v9 = vld [vmem:[%s4112_s1 + $0x424] ss:$8 sps:$4 sm:$0xff]   ;;  %v2764_v11 = vld [vmem:[%s4112_s1 + $0x420] ss:$8 sps:$4 sm:$0xff]  }
   0x5   :  { %1962 = vmatprep.subr.bf16.mxu0 %v2755_v5  ;;  %v2765_v12 = vld [vmem:[%s4112_s1 + $0x34] ss:$8 sps:$4 sm:$0xff]   ;;  %v2769_v14 = vld [vmem:[%s4112_s1 + $0x30] ss:$8 sps:$4 sm:$0xff]   ;;  %v2771_v16 = vld [vmem:[%s4112_s1 + $0x44] ss:$8 sps:$4 sm:$0xff]  }
   0x6   :  { %v2767_v13 = vld [vmem:[%s4112_s1 + $0x434] ss:$8 sps:$4 sm:$0xff]   ;;  %v2770_v15 = vld [vmem:[%s4112_s1 + $0x430] ss:$8 sps:$4 sm:$0xff]   ;;  %v2773_v17 = vld [vmem:[%s4112_s1 + $0x444] ss:$8 sps:$4 sm:$0xff]  }
   0x7   :  { %1751 = vmatpush1.bf16.msra.mxu1 %v2757_v6  ;;  %v2775_v18 = vld [vmem:[%s4112_s1 + $0x40] ss:$8 sps:$4 sm:$0xff]   ;;  %v2777_v20 = vld [vmem:[%s4112_s1 + $0x54] ss:$8 sps:$4 sm:$0xff]   ;;  %v2781_v22 = vld [vmem:[%s4112_s1 + $0x50] ss:$8 sps:$4 sm:$0xff]  }
   0x8   :  { %1963 = vmatpush1.bf16.msra.mxu0 %v2758_v7  ;;  %1752 = vmatprep.subr.bf16.mxu1 %v2759_v8  ;;  %v2776_v19 = vld [vmem:[%s4112_s1 + $0x440] ss:$8 sps:$4 sm:$0xff]   ;;  %v2779_v21 = vld [vmem:[%s4112_s1 + $0x454] ss:$8 sps:$4 sm:$0xff]   ;;  %v2782_v23 = vld [vmem:[%s4112_s1 + $0x450] ss:$8 sps:$4 sm:$0xff]  }
   0x9   :  { %1964 = vmatprep.subr.bf16.mxu0 %v2761_v9  ;;  %v2783_v24 = vld [vmem:[%s4112_s1 + $0x64] ss:$8 sps:$4 sm:$0xff]   ;;  %v2787_v26 = vld [vmem:[%s4112_s1 + $0x60] ss:$8 sps:$4 sm:$0xff]   ;;  %v2789_v28 = vld [vmem:[%s4112_s1 + $0x74] ss:$8 sps:$4 sm:$0xff]  }
   0xa   :  { %v2785_v25 = vld [vmem:[%s4112_s1 + $0x464] ss:$8 sps:$4 sm:$0xff]   ;;  %v2788_v27 = vld [vmem:[%s4112_s1 + $0x460] ss:$8 sps:$4 sm:$0xff]   ;;  %v2791_v29 = vld [vmem:[%s4112_s1 + $0x474] ss:$8 sps:$4 sm:$0xff]  }
   0xb   :  { %1753 = vmatpush1.bf16.msra.mxu1 %v2763_v10  ;;  %v2793_v30 = vld [vmem:[%s4112_s1 + $0x70] ss:$8 sps:$4 sm:$0xff]   ;;  %v2795_v32 = vld [vmem:[%s4112_s1 + $0x84] ss:$8 sps:$4 sm:$0xff]   ;;  %v2799_v34 = vld [vmem:[%s4112_s1 + $0x80] ss:$8 sps:$4 sm:$0xff]  }
   0xc   :  { %1965 = vmatpush1.bf16.msra.mxu0 %v2764_v11  ;;  %1754 = vmatprep.subr.bf16.mxu1 %v2765_v12  ;;  %v2794_v31 = vld [vmem:[%s4112_s1 + $0x470] ss:$8 sps:$4 sm:$0xff]   ;;  %v2797_v33 = vld [vmem:[%s4112_s1 + $0x484] ss:$8 sps:$4 sm:$0xff]   ;;  %v2800_v35 = vld [vmem:[%s4112_s1 + $0x480] ss:$8 sps:$4 sm:$0xff]  }
   0xd   :  { %1966 = vmatprep.subr.bf16.mxu0 %v2767_v13  ;;  %v2801_v36 = vld [vmem:[%s4112_s1 + $0x94] ss:$8 sps:$4 sm:$0xff]   ;;  %v2805_v38 = vld [vmem:[%s4112_s1 + $0x90] ss:$8 sps:$4 sm:$0xff]   ;;  %v2807_v40 = vld [vmem:[%s4112_s1 + $0xa4] ss:$8 sps:$4 sm:$0xff]  }
   0xe   :  { %v2803_v37 = vld [vmem:[%s4112_s1 + $0x494] ss:$8 sps:$4 sm:$0xff]   ;;  %v2806_v39 = vld [vmem:[%s4112_s1 + $0x490] ss:$8 sps:$4 sm:$0xff]   ;;  %v2809_v41 = vld [vmem:[%s4112_s1 + $0x4a4] ss:$8 sps:$4 sm:$0xff]  }
   0xf   :  { %1755 = vmatpush1.bf16.msra.mxu1 %v2769_v14  ;;  %v2811_v42 = vld [vmem:[%s4112_s1 + $0xa0] ss:$8 sps:$4 sm:$0xff]   ;;  %v2813_v44 = vld [vmem:[%s4112_s1 + $0xb4] ss:$8 sps:$4 sm:$0xff]   ;;  %v2817_v46 = vld [vmem:[%s4112_s1 + $0xb0] ss:$8 sps:$4 sm:$0xff]  }
  0x10   :  { %1967 = vmatpush1.bf16.msra.mxu0 %v2770_v15  ;;  %1756 = vmatprep.subr.bf16.mxu1 %v2771_v16  ;;  %v2812_v43 = vld [vmem:[%s4112_s1 + $0x4a0] ss:$8 sps:$4 sm:$0xff]   ;;  %v2815_v45 = vld [vmem:[%s4112_s1 + $0x4b4] ss:$8 sps:$4 sm:$0xff]   ;;  %v2818_v47 = vld [vmem:[%s4112_s1 + $0x4b0] ss:$8 sps:$4 sm:$0xff]  }
  0x11   :  { %1968 = vmatprep.subr.bf16.mxu0 %v2773_v17  ;;  %v20_v48 = vld [vmem:[%s4113_s0] sm:$0xff]  ;;  %v2825_v58 = vld [vmem:[%s4112_s1 + $0xd4] ss:$8 sps:$4 sm:$0xff]   ;;  %v2829_v60 = vld [vmem:[%s4112_s1 + $0xd0] ss:$8 sps:$4 sm:$0xff]  }
  0x12   :  { %v28_v49 = vld [vmem:[%s4113_s0 + $0x40] sm:$0xff]  ;;  %v2827_v59 = vld [vmem:[%s4112_s1 + $0x4d4] ss:$8 sps:$4 sm:$0xff]   ;;  %v2830_v61 = vld [vmem:[%s4112_s1 + $0x4d0] ss:$8 sps:$4 sm:$0xff]  }
  0x13   :  { %1757 = vmatpush1.bf16.msra.mxu1 %v2775_v18  ;;  %v2819_v50 = vld [vmem:[%s4112_s1 + $0xc4] ss:$8 sps:$4 sm:$0xff]   ;;  %v2403_v52 = vcombine.high %v20_v48, %v28_v49  ;;  %v2823_v56 = vld [vmem:[%s4112_s1 + $0xc0] ss:$8 sps:$4 sm:$0xff]   ;;  %v2837_v2 = vld [vmem:[%s4112_s1 + $0xf4] ss:$8 sps:$4 sm:$0xff]   ;;  %v2402_v8 = vcombine.low %v20_v48, %v28_v49 }
  0x14   :  { %1969 = vmatpush1.bf16.msra.mxu0 %v2776_v19  ;;  %1758 = vmatprep.subr.bf16.mxu1 %v2777_v20  ;;  %v2821_v51 = vld [vmem:[%s4112_s1 + $0x4c4] ss:$8 sps:$4 sm:$0xff]   ;;  %v2824_v57 = vld [vmem:[%s4112_s1 + $0x4c0] ss:$8 sps:$4 sm:$0xff]   ;;  %v2839_v3 = vld [vmem:[%s4112_s1 + $0x4f4] ss:$8 sps:$4 sm:$0xff]  }
  0x15   :  { %1970 = vmatprep.subr.bf16.mxu0 %v2779_v21  ;;  %v24_v53 = vld [vmem:[%s4113_s0 + $0x20] sm:$0xff]  ;;  %1780 = vmatprep.mubr.bf16.mxu1 %v2403_v52  ;;  %v2841_v4 = vld [vmem:[%s4112_s1 + $0xf0] ss:$8 sps:$4 sm:$0xff]   ;;  %v2851_v12 = vld [vmem:[%s4112_s1 + $0x114] ss:$8 sps:$4 sm:$0xff]  }
  0x16   :  { %v32_v54 = vld [vmem:[%s4113_s0 + $0x60] sm:$0xff]  ;;  %v2842_v5 = vld [vmem:[%s4112_s1 + $0x4f0] ss:$8 sps:$4 sm:$0xff]   ;;  %v2854_v13 = vld [vmem:[%s4112_s1 + $0x514] ss:$8 sps:$4 sm:$0xff]  }
  0x17   :  { %1759 = vmatpush1.bf16.msra.mxu1 %v2781_v22  ;;  %v2411_v55 = vcombine.high %v24_v53, %v32_v54  ;;  %v2831_v62 = vld [vmem:[%s4112_s1 + $0xe4] ss:$8 sps:$4 sm:$0xff]   ;;  %v2835_v0 = vld [vmem:[%s4112_s1 + $0xe0] ss:$8 sps:$4 sm:$0xff]   ;;  %v2410_v10 = vcombine.low %v24_v53, %v32_v54  ;;  %v2849_v14 = vld [vmem:[%s4112_s1 + $0x110] ss:$8 sps:$4 sm:$0xff]  }
  0x18   :  { %1971 = vmatpush1.bf16.msra.mxu0 %v2782_v23  ;;  %1760 = vmatprep.subr.bf16.mxu1 %v2783_v24  ;;  %v2833_v63 = vld [vmem:[%s4112_s1 + $0x4e4] ss:$8 sps:$4 sm:$0xff]   ;;  %v2836_v1 = vld [vmem:[%s4112_s1 + $0x4e0] ss:$8 sps:$4 sm:$0xff]   ;;  %v2852_v15 = vld [vmem:[%s4112_s1 + $0x510] ss:$8 sps:$4 sm:$0xff]  }
  0x19   :  { %1972 = vmatprep.subr.bf16.mxu0 %v2785_v25  ;;  %1992 = vmatprep.mubr.bf16.mxu0 %v2411_v55  ;;  %v2845_v6 = vld [vmem:[%s4112_s1 + $0x104] ss:$8 sps:$4 sm:$0xff]   ;;  %v2843_v9 = vld [vmem:[%s4112_s1 + $0x100] ss:$8 sps:$4 sm:$0xff]   ;;  %v2863_v20 = vld [vmem:[%s4112_s1 + $0x134] ss:$8 sps:$4 sm:$0xff]  }
  0x1a   :  { %v2848_v7 = vld [vmem:[%s4112_s1 + $0x504] ss:$8 sps:$4 sm:$0xff]   ;;  %v2846_v11 = vld [vmem:[%s4112_s1 + $0x500] ss:$8 sps:$4 sm:$0xff]   ;;  %v2866_v21 = vld [vmem:[%s4112_s1 + $0x534] ss:$8 sps:$4 sm:$0xff]  }
  0x1b   :  { %1761 = vmatpush1.bf16.msra.mxu1 %v2787_v26  ;;  %v2857_v16 = vld [vmem:[%s4112_s1 + $0x124] ss:$8 sps:$4 sm:$0xff]   ;;  %v2855_v18 = vld [vmem:[%s4112_s1 + $0x120] ss:$8 sps:$4 sm:$0xff]   ;;  %v2861_v22 = vld [vmem:[%s4112_s1 + $0x130] ss:$8 sps:$4 sm:$0xff]  }
  0x1c   :  { %1973 = vmatpush1.bf16.msra.mxu0 %v2788_v27  ;;  %1762 = vmatprep.subr.bf16.mxu1 %v2789_v28  ;;  %v2860_v17 = vld [vmem:[%s4112_s1 + $0x524] ss:$8 sps:$4 sm:$0xff]   ;;  %v2858_v19 = vld [vmem:[%s4112_s1 + $0x520] ss:$8 sps:$4 sm:$0xff]   ;;  %v2864_v23 = vld [vmem:[%s4112_s1 + $0x530] ss:$8 sps:$4 sm:$0xff]  }
  0x1d   :  { %1974 = vmatprep.subr.bf16.mxu0 %v2791_v29  ;;  %v2869_v24 = vld [vmem:[%s4112_s1 + $0x144] ss:$8 sps:$4 sm:$0xff]   ;;  %v2867_v26 = vld [vmem:[%s4112_s1 + $0x140] ss:$8 sps:$4 sm:$0xff]   ;;  %v2875_v28 = vld [vmem:[%s4112_s1 + $0x154] ss:$8 sps:$4 sm:$0xff]  }
  0x1e   :  { %v2872_v25 = vld [vmem:[%s4112_s1 + $0x544] ss:$8 sps:$4 sm:$0xff]   ;;  %v2870_v27 = vld [vmem:[%s4112_s1 + $0x540] ss:$8 sps:$4 sm:$0xff]   ;;  %v2878_v29 = vld [vmem:[%s4112_s1 + $0x554] ss:$8 sps:$4 sm:$0xff]  }
  0x1f   :  { %1763 = vmatpush1.bf16.msra.mxu1 %v2793_v30  ;;  %v36_v30 = vld [vmem:[%s4113_s0 + $0x80] sm:$0xff]  ;;  %v3490_v49 = vld [vmem:[%s4113_s0 + $0x28] sm:$0xff]  ;;  %v2888_v52 = vld [vmem:[%s4112_s1 + $0x570] ss:$8 sps:$4 sm:$0xff]  }
  0x20   :  { %1975 = vmatpush1.bf16.msra.mxu0 %v2794_v31  ;;  %1764 = vmatprep.subr.bf16.mxu1 %v2795_v32  ;;  %v44_v31 = vld [vmem:[%s4113_s0 + $0xc0] sm:$0xff]  ;;  %v2873_v32 = vld [vmem:[%s4112_s1 + $0x150] ss:$8 sps:$4 sm:$0xff]  }
  0x21   :  { %1976 = vmatprep.subr.bf16.mxu0 %v2797_v33  ;;  %v2419_v33 = vcombine.high %v36_v30, %v44_v31  ;;  %v2893_v54 = vld [vmem:[%s4112_s1 + $0x184] ss:$8 sps:$4 sm:$0xff]  }
  0x22   :  { %v2896_v55 = vld [vmem:[%s4112_s1 + $0x584] ss:$8 sps:$4 sm:$0xff]  }
  0x23   :  { %1765 = vmatpush1.bf16.msra.mxu1 %v2799_v34  ;;  %v2876_v34 = vld [vmem:[%s4112_s1 + $0x550] ss:$8 sps:$4 sm:$0xff]  }
  0x24   :  { %1977 = vmatpush1.bf16.msra.mxu0 %v2800_v35  ;;  %1766 = vmatprep.subr.bf16.mxu1 %v2801_v36  ;;  %v40_v35 = vld [vmem:[%s4113_s0 + $0xa0] sm:$0xff] }
  0x25   :  { %1978 = vmatprep.subr.bf16.mxu0 %v2803_v37  ;;  %v48_v36 = vld [vmem:[%s4113_s0 + $0xe0] sm:$0xff]  ;;  %v2418_v37 = vcombine.low %v36_v30, %v44_v31  ;;  %v2947_v30 = vld [vmem:[%s4112_s1 + $0x214] ss:$8 sps:$4 sm:$0xff]  }
  0x26   :  { %v2950_v31 = vld [vmem:[%s4112_s1 + $0x614] ss:$8 sps:$4 sm:$0xff]  }
  0x27   :  { %1767 = vmatpush1.bf16.msra.mxu1 %v2805_v38  ;;  %v2881_v38 = vld [vmem:[%s4112_s1 + $0x164] ss:$8 sps:$4 sm:$0xff]  }
  0x28   :  { %1979 = vmatpush1.bf16.msra.mxu0 %v2806_v39  ;;  %1768 = vmatprep.subr.bf16.mxu1 %v2807_v40  ;;  %v2427_v39 = vcombine.high %v40_v35, %v48_v36  ;;  %v2426_v40 = vcombine.low %v40_v35, %v48_v36  ;;  %v2945_v36 = vld [vmem:[%s4112_s1 + $0x210] ss:$8 sps:$4 sm:$0xff]  }
  0x29   :  { %1980 = vmatprep.subr.bf16.mxu0 %v2809_v41  ;;  %v2884_v41 = vld [vmem:[%s4112_s1 + $0x564] ss:$8 sps:$4 sm:$0xff]  }
  0x2b   :  { %1769 = vmatpush1.bf16.msra.mxu1 %v2811_v42  ;;  %v2879_v42 = vld [vmem:[%s4112_s1 + $0x160] ss:$8 sps:$4 sm:$0xff]  }
  0x2c   :  { %1981 = vmatpush1.bf16.msra.mxu0 %v2812_v43  ;;  %1770 = vmatprep.subr.bf16.mxu1 %v2813_v44  ;;  %v2882_v43 = vld [vmem:[%s4112_s1 + $0x560] ss:$8 sps:$4 sm:$0xff]  }
  0x2d   :  { %1982 = vmatprep.subr.bf16.mxu0 %v2815_v45  ;;  %v3472_v44 = vld [vmem:[%s4113_s0 + $0x8] sm:$0xff] }
  0x2e   :  { %v3477_v45 = vld [vmem:[%s4113_s0 + $0x48] sm:$0xff] }
  0x2f   :  { %1771 = vmatpush1.bf16.msra.mxu1 %v2817_v46  ;;  %v2887_v46 = vld [vmem:[%s4112_s1 + $0x174] ss:$8 sps:$4 sm:$0xff]   ;;  %v2405_v48 = vcombine.high %v3472_v44, %v3477_v45 }
  0x30   :  { %1983 = vmatpush1.bf16.msra.mxu0 %v2818_v47  ;;  %1772 = vmatprep.subr.bf16.mxu1 %v2819_v50  ;;  %v2890_v47 = vld [vmem:[%s4112_s1 + $0x574] ss:$8 sps:$4 sm:$0xff]   ;;  %v3495_v50 = vld [vmem:[%s4113_s0 + $0x68] sm:$0xff] }
  0x31   :  { %1984 = vmatprep.subr.bf16.mxu0 %v2821_v51  ;;  %v2885_v51 = vld [vmem:[%s4112_s1 + $0x170] ss:$8 sps:$4 sm:$0xff]   ;;  %v2413_v53 = vcombine.high %v3490_v49, %v3495_v50 }
  0x33   :  { %1773 = vmatpush1.bf16.msra.mxu1 %v2823_v56  ;;  %v2891_v56 = vld [vmem:[%s4112_s1 + $0x180] ss:$8 sps:$4 sm:$0xff]  }
  0x34   :  { %1985 = vmatpush1.bf16.msra.mxu0 %v2824_v57  ;;  %1774 = vmatprep.subr.bf16.mxu1 %v2825_v58  ;;  %v2894_v57 = vld [vmem:[%s4112_s1 + $0x580] ss:$8 sps:$4 sm:$0xff]   ;;  %v2899_v58 = vld [vmem:[%s4112_s1 + $0x194] ss:$8 sps:$4 sm:$0xff]  }
  0x35   :  { %1986 = vmatprep.subr.bf16.mxu0 %v2827_v59  ;;  %v2902_v59 = vld [vmem:[%s4112_s1 + $0x594] ss:$8 sps:$4 sm:$0xff]  }
  0x37   :  { %1775 = vmatpush1.bf16.msra.mxu1 %v2829_v60  ;;  %v2897_v60 = vld [vmem:[%s4112_s1 + $0x190] ss:$8 sps:$4 sm:$0xff]  }
  0x38   :  { %1987 = vmatpush1.bf16.msra.mxu0 %v2830_v61  ;;  %1776 = vmatprep.subr.bf16.mxu1 %v2831_v62  ;;  %v2900_v61 = vld [vmem:[%s4112_s1 + $0x590] ss:$8 sps:$4 sm:$0xff]   ;;  %v2905_v62 = vld [vmem:[%s4112_s1 + $0x1a4] ss:$8 sps:$4 sm:$0xff]  }
  0x39   :  { %1988 = vmatprep.subr.bf16.mxu0 %v2833_v63  ;;  %v2908_v63 = vld [vmem:[%s4112_s1 + $0x5a4] ss:$8 sps:$4 sm:$0xff]  }
  0x3b   :  { %1777 = vmatpush1.bf16.msra.mxu1 %v2835_v0  ;;  %v2903_v0 = vld [vmem:[%s4112_s1 + $0x1a0] ss:$8 sps:$4 sm:$0xff]  }
  0x3c   :  { %1989 = vmatpush1.bf16.msra.mxu0 %v2836_v1  ;;  %1778 = vmatprep.subr.bf16.mxu1 %v2837_v2  ;;  %v2906_v1 = vld [vmem:[%s4112_s1 + $0x5a0] ss:$8 sps:$4 sm:$0xff]   ;;  %v2911_v2 = vld [vmem:[%s4112_s1 + $0x1b4] ss:$8 sps:$4 sm:$0xff]  }
  0x3d   :  { %1990 = vmatprep.subr.bf16.mxu0 %v2839_v3  ;;  %v2914_v3 = vld [vmem:[%s4112_s1 + $0x5b4] ss:$8 sps:$4 sm:$0xff]  }
  0x3f   :  { %1779 = vmatpush1.bf16.msra.mxu1 %v2841_v4  ;;  %v2909_v4 = vld [vmem:[%s4112_s1 + $0x1b0] ss:$8 sps:$4 sm:$0xff]  }
  0x40   :  { %1991 = vmatpush1.bf16.msra.mxu0 %v2842_v5  ;;  %1801 = vmatprep.subr.bf16.mxu1 %v2845_v6  ;;  %v2912_v5 = vld [vmem:[%s4112_s1 + $0x5b0] ss:$8 sps:$4 sm:$0xff]   ;;  %v2917_v6 = vld [vmem:[%s4112_s1 + $0x1c4] ss:$8 sps:$4 sm:$0xff]  }
  0x41   :  { %2013 = vmatprep.subr.bf16.mxu0 %v2848_v7  ;;  %v2920_v7 = vld [vmem:[%s4112_s1 + $0x5c4] ss:$8 sps:$4 sm:$0xff]  }
  0x42   :  { %1781 = vmatmul.mubr.bf16.vlgmr.msra.gmra.mrb[0].mxu1 %v2402_v8  ;;  %v2915_v8 = vld [vmem:[%s4112_s1 + $0x1c0] ss:$8 sps:$4 sm:$0xff]  }
  0x43   :  { %1993 = vmatmul.mubr.bf16.vlgmr.msra.gmra.mrb[0].mxu0 %v2410_v10  ;;  %1802 = vmatpush1.bf16.msra.mxu1 %v2843_v9  ;;  %v2918_v9 = vld [vmem:[%s4112_s1 + $0x5c0] ss:$8 sps:$4 sm:$0xff]   ;;  %v2923_v10 = vld [vmem:[%s4112_s1 + $0x1d4] ss:$8 sps:$4 sm:$0xff]  }
  0x44   :  { %2014 = vmatpush1.bf16.msra.mxu0 %v2846_v11  ;;  %1803 = vmatprep.subr.bf16.mxu1 %v2851_v12  ;;  %v2926_v11 = vld [vmem:[%s4112_s1 + $0x5d4] ss:$8 sps:$4 sm:$0xff]   ;;  %v2921_v12 = vld [vmem:[%s4112_s1 + $0x1d0] ss:$8 sps:$4 sm:$0xff]  }
  0x45   :  { %2015 = vmatprep.subr.bf16.mxu0 %v2854_v13  ;;  %1790 = vmatprep.mubr.bf16.mxu1 %v2419_v33  ;;  %v2924_v13 = vld [vmem:[%s4112_s1 + $0x5d0] ss:$8 sps:$4 sm:$0xff]   ;;  %v49_v33 = vld [vmem:[%s4113_s0 + $0xe8] sm:$0xff] }
  0x46   :  { %2002 = vmatprep.mubr.bf16.mxu0 %v2427_v39  ;;  %v2956_v39 = vld [vmem:[%s4112_s1 + $0x624] ss:$8 sps:$4 sm:$0xff]  }
  0x47   :  { %1804 = vmatpush1.bf16.msra.mxu1 %v2849_v14  ;;  %v2929_v14 = vld [vmem:[%s4112_s1 + $0x1e4] ss:$8 sps:$4 sm:$0xff]  }
  0x48   :  { %2016 = vmatpush1.bf16.msra.mxu0 %v2852_v15  ;;  %1805 = vmatprep.subr.bf16.mxu1 %v2857_v16  ;;  %v2932_v15 = vld [vmem:[%s4112_s1 + $0x5e4] ss:$8 sps:$4 sm:$0xff]   ;;  %v2927_v16 = vld [vmem:[%s4112_s1 + $0x1e0] ss:$8 sps:$4 sm:$0xff]  }
  0x49   :  { %2017 = vmatprep.subr.bf16.mxu0 %v2860_v17  ;;  %v2930_v17 = vld [vmem:[%s4112_s1 + $0x5e0] ss:$8 sps:$4 sm:$0xff]  }
  0x4a   :  { %1791 = vmatmul.mubr.bf16.gmra.mrb[4].mxu1 %v2418_v37  ;;  %v2948_v37 = vld [vmem:[%s4112_s1 + $0x610] ss:$8 sps:$4 sm:$0xff]  }
  0x4b   :  { %1806 = vmatpush1.bf16.msra.mxu1 %v2855_v18  ;;  %2003 = vmatmul.mubr.bf16.gmra.mrb[4].mxu0 %v2426_v40  ;;  %v2935_v18 = vld [vmem:[%s4112_s1 + $0x1f4] ss:$8 sps:$4 sm:$0xff]   ;;  %v2951_v40 = vld [vmem:[%s4112_s1 + $0x220] ss:$8 sps:$4 sm:$0xff]  }
  0x4c   :  { %2018 = vmatpush1.bf16.msra.mxu0 %v2858_v19  ;;  %1807 = vmatprep.subr.bf16.mxu1 %v2863_v20  ;;  %v2938_v19 = vld [vmem:[%s4112_s1 + $0x5f4] ss:$8 sps:$4 sm:$0xff]   ;;  %v2933_v20 = vld [vmem:[%s4112_s1 + $0x1f0] ss:$8 sps:$4 sm:$0xff]  }
  0x4d   :  { %2019 = vmatprep.subr.bf16.mxu0 %v2866_v21  ;;  %1833 = vmatprep.mubr.bf16.mxu1 %v2405_v48  ;;  %v2936_v21 = vld [vmem:[%s4112_s1 + $0x5f0] ss:$8 sps:$4 sm:$0xff]   ;;  %v2959_v48 = vld [vmem:[%s4112_s1 + $0x234] ss:$8 sps:$4 sm:$0xff]  }
  0x4e   :  { %2045 = vmatprep.mubr.bf16.mxu0 %v2413_v53  ;;  %v2960_v53 = vld [vmem:[%s4112_s1 + $0x630] ss:$8 sps:$4 sm:$0xff]  }
  0x4f   :  { %1808 = vmatpush1.bf16.msra.mxu1 %v2861_v22  ;;  %v2941_v22 = vld [vmem:[%s4112_s1 + $0x204] ss:$8 sps:$4 sm:$0xff]  }
  0x50   :  { %2020 = vmatpush1.bf16.msra.mxu0 %v2864_v23  ;;  %1809 = vmatprep.subr.bf16.mxu1 %v2869_v24  ;;  %v2944_v23 = vld [vmem:[%s4112_s1 + $0x604] ss:$8 sps:$4 sm:$0xff]   ;;  %v2939_v24 = vld [vmem:[%s4112_s1 + $0x200] ss:$8 sps:$4 sm:$0xff]  }
  0x51   :  { %2021 = vmatprep.subr.bf16.mxu0 %v2872_v25  ;;  %v2942_v25 = vld [vmem:[%s4112_s1 + $0x600] ss:$8 sps:$4 sm:$0xff]  }
  0x53   :  { %1810 = vmatpush1.bf16.msra.mxu1 %v2867_v26  ;;  %v37_v26 = vld [vmem:[%s4113_s0 + $0x88] sm:$0xff] }
  0x54   :  { %2022 = vmatpush1.bf16.msra.mxu0 %v2870_v27  ;;  %1811 = vmatprep.subr.bf16.mxu1 %v2875_v28  ;;  %v2404_v27 = vcombine.low %v3472_v44, %v3477_v45  ;;  %v2412_v28 = vcombine.low %v3490_v49, %v3495_v50  ;;  %v3661_v45 = vld [vmem:[%s4113_s0 + $0x50] sm:$0xff] }
  0x55   :  { %2023 = vmatprep.subr.bf16.mxu0 %v2878_v29  ;;  %v45_v29 = vld [vmem:[%s4113_s0 + $0xc8] sm:$0xff]  ;;  %v2962_v49 = vld [vmem:[%s4112_s1 + $0x634] ss:$8 sps:$4 sm:$0xff]  }
  0x57   :  { %1812 = vmatpush1.bf16.msra.mxu1 %v2873_v32  ;;  %v41_v32 = vld [vmem:[%s4113_s0 + $0xa8] sm:$0xff] }
  0x58   :  { %2024 = vmatpush1.bf16.msra.mxu0 %v2876_v34  ;;  %1813 = vmatprep.subr.bf16.mxu1 %v2881_v38  ;;  %v2421_v34 = vcombine.high %v37_v26, %v45_v29  ;;  %v2429_v35 = vcombine.high %v41_v32, %v49_v33  ;;  %v2953_v38 = vld [vmem:[%s4112_s1 + $0x224] ss:$8 sps:$4 sm:$0xff]   ;;  %v2428_v44 = vcombine.low %v41_v32, %v49_v33  ;;  %v3023_v32 = vld [vmem:[%s4112_s1 + $0x2e0] ss:$8 sps:$4 sm:$0xff]  }
  0x59   :  { %2025 = vmatprep.subr.bf16.mxu0 %v2884_v41  ;;  %v2954_v41 = vld [vmem:[%s4112_s1 + $0x620] ss:$8 sps:$4 sm:$0xff]  }
  0x5a   :  { %v3026_v33 = vld [vmem:[%s4112_s1 + $0x6e0] ss:$8 sps:$4 sm:$0xff]  }
  0x5b   :  { %1814 = vmatpush1.bf16.msra.mxu1 %v2879_v42  ;;  %v3656_v42 = vld [vmem:[%s4113_s0 + $0x10] sm:$0xff] }
  0x5c   :  { %2026 = vmatpush1.bf16.msra.mxu0 %v2882_v43  ;;  %1815 = vmatprep.subr.bf16.mxu1 %v2887_v46  ;;  %v2420_v43 = vcombine.low %v37_v26, %v45_v29  ;;  %v3666_v46 = vld [vmem:[%s4113_s0 + $0x30] sm:$0xff]  ;;  %v2407_v50 = vcombine.high %v3656_v42, %v3661_v45 }
  0x5d   :  { %2027 = vmatprep.subr.bf16.mxu0 %v2890_v47  ;;  %v3671_v47 = vld [vmem:[%s4113_s0 + $0x70] sm:$0xff] }
  0x5e   :  { %v3019_v26 = vld [vmem:[%s4112_s1 + $0x2d4] ss:$8 sps:$4 sm:$0xff]   ;;  %v3020_v29 = vld [vmem:[%s4112_s1 + $0x6d0] ss:$8 sps:$4 sm:$0xff]  }
  0x5f   :  { %1816 = vmatpush1.bf16.msra.mxu1 %v2885_v51  ;;  %v2415_v51 = vcombine.high %v3666_v46, %v3671_v47 }
  0x60   :  { %2028 = vmatpush1.bf16.msra.mxu0 %v2888_v52  ;;  %1817 = vmatprep.subr.bf16.mxu1 %v2893_v54  ;;  %v2957_v52 = vld [vmem:[%s4112_s1 + $0x230] ss:$8 sps:$4 sm:$0xff]   ;;  %v2965_v54 = vld [vmem:[%s4112_s1 + $0x244] ss:$8 sps:$4 sm:$0xff]  }
  0x61   :  { %2029 = vmatprep.subr.bf16.mxu0 %v2896_v55  ;;  %v2968_v55 = vld [vmem:[%s4112_s1 + $0x644] ss:$8 sps:$4 sm:$0xff]  }
  0x63   :  { %1818 = vmatpush1.bf16.msra.mxu1 %v2891_v56  ;;  %v2963_v56 = vld [vmem:[%s4112_s1 + $0x240] ss:$8 sps:$4 sm:$0xff]  }
  0x64   :  { %2030 = vmatpush1.bf16.msra.mxu0 %v2894_v57  ;;  %1819 = vmatprep.subr.bf16.mxu1 %v2899_v58  ;;  %v2966_v57 = vld [vmem:[%s4112_s1 + $0x640] ss:$8 sps:$4 sm:$0xff]   ;;  %v2971_v58 = vld [vmem:[%s4112_s1 + $0x254] ss:$8 sps:$4 sm:$0xff]  }
  0x65   :  { %2031 = vmatprep.subr.bf16.mxu0 %v2902_v59  ;;  %v2974_v59 = vld [vmem:[%s4112_s1 + $0x654] ss:$8 sps:$4 sm:$0xff]  }
  0x67   :  { %1820 = vmatpush1.bf16.msra.mxu1 %v2897_v60  ;;  %v2969_v60 = vld [vmem:[%s4112_s1 + $0x250] ss:$8 sps:$4 sm:$0xff]  }
  0x68   :  { %2032 = vmatpush1.bf16.msra.mxu0 %v2900_v61  ;;  %1821 = vmatprep.subr.bf16.mxu1 %v2905_v62  ;;  %v2972_v61 = vld [vmem:[%s4112_s1 + $0x650] ss:$8 sps:$4 sm:$0xff]   ;;  %v2977_v62 = vld [vmem:[%s4112_s1 + $0x264] ss:$8 sps:$4 sm:$0xff]  }
  0x69   :  { %2033 = vmatprep.subr.bf16.mxu0 %v2908_v63  ;;  %v2980_v63 = vld [vmem:[%s4112_s1 + $0x664] ss:$8 sps:$4 sm:$0xff]  }
  0x6b   :  { %1822 = vmatpush1.bf16.msra.mxu1 %v2903_v0  ;;  %v2975_v0 = vld [vmem:[%s4112_s1 + $0x260] ss:$8 sps:$4 sm:$0xff]  }
  0x6c   :  { %2034 = vmatpush1.bf16.msra.mxu0 %v2906_v1  ;;  %1823 = vmatprep.subr.bf16.mxu1 %v2911_v2  ;;  %v2978_v1 = vld [vmem:[%s4112_s1 + $0x660] ss:$8 sps:$4 sm:$0xff]   ;;  %v2983_v2 = vld [vmem:[%s4112_s1 + $0x274] ss:$8 sps:$4 sm:$0xff]  }
  0x6d   :  { %2035 = vmatprep.subr.bf16.mxu0 %v2914_v3  ;;  %v2986_v3 = vld [vmem:[%s4112_s1 + $0x674] ss:$8 sps:$4 sm:$0xff]  }
  0x6f   :  { %1824 = vmatpush1.bf16.msra.mxu1 %v2909_v4  ;;  %v2981_v4 = vld [vmem:[%s4112_s1 + $0x270] ss:$8 sps:$4 sm:$0xff]  }
  0x70   :  { %2036 = vmatpush1.bf16.msra.mxu0 %v2912_v5  ;;  %1825 = vmatprep.subr.bf16.mxu1 %v2917_v6  ;;  %v2984_v5 = vld [vmem:[%s4112_s1 + $0x670] ss:$8 sps:$4 sm:$0xff]   ;;  %v2989_v6 = vld [vmem:[%s4112_s1 + $0x284] ss:$8 sps:$4 sm:$0xff]  }
  0x71   :  { %2037 = vmatprep.subr.bf16.mxu0 %v2920_v7  ;;  %v2992_v7 = vld [vmem:[%s4112_s1 + $0x684] ss:$8 sps:$4 sm:$0xff]  }
  0x73   :  { %1826 = vmatpush1.bf16.msra.mxu1 %v2915_v8  ;;  %v2987_v8 = vld [vmem:[%s4112_s1 + $0x280] ss:$8 sps:$4 sm:$0xff]  }
  0x74   :  { %2038 = vmatpush1.bf16.msra.mxu0 %v2918_v9  ;;  %1827 = vmatprep.subr.bf16.mxu1 %v2923_v10  ;;  %v2990_v9 = vld [vmem:[%s4112_s1 + $0x680] ss:$8 sps:$4 sm:$0xff]   ;;  %v2995_v10 = vld [vmem:[%s4112_s1 + $0x294] ss:$8 sps:$4 sm:$0xff]  }
  0x75   :  { %2039 = vmatprep.subr.bf16.mxu0 %v2926_v11  ;;  %v2998_v11 = vld [vmem:[%s4112_s1 + $0x694] ss:$8 sps:$4 sm:$0xff]  }
  0x77   :  { %1828 = vmatpush1.bf16.msra.mxu1 %v2921_v12  ;;  %v2993_v12 = vld [vmem:[%s4112_s1 + $0x290] ss:$8 sps:$4 sm:$0xff]  }
  0x78   :  { %2040 = vmatpush1.bf16.msra.mxu0 %v2924_v13  ;;  %1829 = vmatprep.subr.bf16.mxu1 %v2929_v14  ;;  %v2996_v13 = vld [vmem:[%s4112_s1 + $0x690] ss:$8 sps:$4 sm:$0xff]   ;;  %v3001_v14 = vld [vmem:[%s4112_s1 + $0x2a4] ss:$8 sps:$4 sm:$0xff]  }
  0x79   :  { %2041 = vmatprep.subr.bf16.mxu0 %v2932_v15  ;;  %v3004_v15 = vld [vmem:[%s4112_s1 + $0x6a4] ss:$8 sps:$4 sm:$0xff]  }
  0x7b   :  { %1830 = vmatpush1.bf16.msra.mxu1 %v2927_v16  ;;  %v2999_v16 = vld [vmem:[%s4112_s1 + $0x2a0] ss:$8 sps:$4 sm:$0xff]  }
  0x7c   :  { %2042 = vmatpush1.bf16.msra.mxu0 %v2930_v17  ;;  %1831 = vmatprep.subr.bf16.mxu1 %v2935_v18  ;;  %v3002_v17 = vld [vmem:[%s4112_s1 + $0x6a0] ss:$8 sps:$4 sm:$0xff]   ;;  %v3007_v18 = vld [vmem:[%s4112_s1 + $0x2b4] ss:$8 sps:$4 sm:$0xff]  }
  0x7d   :  { %2043 = vmatprep.subr.bf16.mxu0 %v2938_v19  ;;  %v3010_v19 = vld [vmem:[%s4112_s1 + $0x6b4] ss:$8 sps:$4 sm:$0xff]  }
  0x7f   :  { %1832 = vmatpush1.bf16.msra.mxu1 %v2933_v20  ;;  %v3005_v20 = vld [vmem:[%s4112_s1 + $0x2b0] ss:$8 sps:$4 sm:$0xff]  }
  0x80   :  { %2044 = vmatpush1.bf16.msra.mxu0 %v2936_v21  ;;  %1854 = vmatprep.subr.bf16.mxu1 %v2941_v22  ;;  %v3008_v21 = vld [vmem:[%s4112_s1 + $0x6b0] ss:$8 sps:$4 sm:$0xff]   ;;  %v3013_v22 = vld [vmem:[%s4112_s1 + $0x2c4] ss:$8 sps:$4 sm:$0xff]  }
  0x81   :  { %2066 = vmatprep.subr.bf16.mxu0 %v2944_v23  ;;  %v3016_v23 = vld [vmem:[%s4112_s1 + $0x6c4] ss:$8 sps:$4 sm:$0xff]  }
  0x82   :  { %1834 = vmatmul.mubr.bf16.vlgmr.msra.gmra.mrb[0].mxu1 %v2404_v27  ;;  %v3022_v27 = vld [vmem:[%s4112_s1 + $0x6d4] ss:$8 sps:$4 sm:$0xff]  }
  0x83   :  { %2046 = vmatmul.mubr.bf16.vlgmr.msra.gmra.mrb[0].mxu0 %v2412_v28  ;;  %1855 = vmatpush1.bf16.msra.mxu1 %v2939_v24  ;;  %v3011_v24 = vld [vmem:[%s4112_s1 + $0x2c0] ss:$8 sps:$4 sm:$0xff]   ;;  %v3017_v28 = vld [vmem:[%s4112_s1 + $0x2d0] ss:$8 sps:$4 sm:$0xff]  }
  0x84   :  { %2067 = vmatpush1.bf16.msra.mxu0 %v2942_v25  ;;  %1856 = vmatprep.subr.bf16.mxu1 %v2947_v30  ;;  %v3014_v25 = vld [vmem:[%s4112_s1 + $0x6c0] ss:$8 sps:$4 sm:$0xff]   ;;  %v3025_v30 = vld [vmem:[%s4112_s1 + $0x2e4] ss:$8 sps:$4 sm:$0xff]  }
  0x85   :  { %2068 = vmatprep.subr.bf16.mxu0 %v2950_v31  ;;  %1843 = vmatprep.mubr.bf16.mxu1 %v2421_v34  ;;  %v3028_v31 = vld [vmem:[%s4112_s1 + $0x6e4] ss:$8 sps:$4 sm:$0xff]   ;;  %v3031_v34 = vld [vmem:[%s4112_s1 + $0x2f4] ss:$8 sps:$4 sm:$0xff]  }
  0x86   :  { %2055 = vmatprep.mubr.bf16.mxu0 %v2429_v35  ;;  %v3034_v35 = vld [vmem:[%s4112_s1 + $0x6f4] ss:$8 sps:$4 sm:$0xff]  }
  0x87   :  { %1857 = vmatpush1.bf16.msra.mxu1 %v2945_v36  ;;  %v3029_v36 = vld [vmem:[%s4112_s1 + $0x2f0] ss:$8 sps:$4 sm:$0xff]  }
  0x88   :  { %2069 = vmatpush1.bf16.msra.mxu0 %v2948_v37  ;;  %1858 = vmatprep.subr.bf16.mxu1 %v2953_v38  ;;  %v3032_v37 = vld [vmem:[%s4112_s1 + $0x6f0] ss:$8 sps:$4 sm:$0xff]   ;;  %v3037_v38 = vld [vmem:[%s4112_s1 + $0x304] ss:$8 sps:$4 sm:$0xff]  }
  0x89   :  { %2070 = vmatprep.subr.bf16.mxu0 %v2956_v39  ;;  %v3040_v39 = vld [vmem:[%s4112_s1 + $0x704] ss:$8 sps:$4 sm:$0xff]  }
  0x8a   :  { %1844 = vmatmul.mubr.bf16.gmra.mrb[4].mxu1 %v2420_v43  ;;  %v2414_v43 = vcombine.low %v3666_v46, %v3671_v47  ;;  %v3043_v46 = vld [vmem:[%s4112_s1 + $0x314] ss:$8 sps:$4 sm:$0xff]  }
  0x8b   :  { %2056 = vmatmul.mubr.bf16.gmra.mrb[4].mxu0 %v2428_v44  ;;  %1859 = vmatpush1.bf16.msra.mxu1 %v2951_v40  ;;  %v38_v40 = vld [vmem:[%s4113_s0 + $0x90] sm:$0xff] }
  0x8c   :  { %2071 = vmatpush1.bf16.msra.mxu0 %v2954_v41  ;;  %1860 = vmatprep.subr.bf16.mxu1 %v2959_v48  ;;  %v2406_v41 = vcombine.low %v3656_v42, %v3661_v45  ;;  %v46_v44 = vld [vmem:[%s4113_s0 + $0xd0] sm:$0xff]  ;;  %v3035_v42 = vld [vmem:[%s4112_s1 + $0x300] ss:$8 sps:$4 sm:$0xff]  }
  0x8d   :  { %2072 = vmatprep.subr.bf16.mxu0 %v2962_v49  ;;  %1886 = vmatprep.mubr.bf16.mxu1 %v2407_v50  ;;  %v42_v48 = vld [vmem:[%s4113_s0 + $0xb0] sm:$0xff]  ;;  %v3038_v45 = vld [vmem:[%s4112_s1 + $0x700] ss:$8 sps:$4 sm:$0xff]   ;;  %v2423_v50 = vcombine.high %v38_v40, %v46_v44 }
  0x8e   :  { %2098 = vmatprep.mubr.bf16.mxu0 %v2415_v51  ;;  %v50_v49 = vld [vmem:[%s4113_s0 + $0xf0] sm:$0xff] }
  0x8f   :  { %1861 = vmatpush1.bf16.msra.mxu1 %v2957_v52  ;;  %v3046_v47 = vld [vmem:[%s4112_s1 + $0x714] ss:$8 sps:$4 sm:$0xff]   ;;  %v2431_v51 = vcombine.high %v42_v48, %v50_v49  ;;  %v3041_v52 = vld [vmem:[%s4112_s1 + $0x310] ss:$8 sps:$4 sm:$0xff]  }
  0x90   :  { %2073 = vmatpush1.bf16.msra.mxu0 %v2960_v53  ;;  %1862 = vmatprep.subr.bf16.mxu1 %v2965_v54  ;;  %v3044_v53 = vld [vmem:[%s4112_s1 + $0x710] ss:$8 sps:$4 sm:$0xff]   ;;  %v3049_v54 = vld [vmem:[%s4112_s1 + $0x324] ss:$8 sps:$4 sm:$0xff]  }
  0x91   :  { %2074 = vmatprep.subr.bf16.mxu0 %v2968_v55  ;;  %v3052_v55 = vld [vmem:[%s4112_s1 + $0x724] ss:$8 sps:$4 sm:$0xff]  }
  0x93   :  { %1863 = vmatpush1.bf16.msra.mxu1 %v2963_v56  ;;  %v3882_v56 = vld [vmem:[%s4113_s0 + $0x18] sm:$0xff] }
  0x94   :  { %2075 = vmatpush1.bf16.msra.mxu0 %v2966_v57  ;;  %1864 = vmatprep.subr.bf16.mxu1 %v2971_v58  ;;  %v2422_v57 = vcombine.low %v38_v40, %v46_v44  ;;  %v2430_v58 = vcombine.low %v42_v48, %v50_v49  ;;  %v3107_v40 = vld [vmem:[%s4112_s1 + $0x3c0] ss:$8 sps:$4 sm:$0xff]   ;;  %v3118_v44 = vld [vmem:[%s4112_s1 + $0x7d4] ss:$8 sps:$4 sm:$0xff]   ;;  %v3113_v48 = vld [vmem:[%s4112_s1 + $0x3d0] ss:$8 sps:$4 sm:$0xff]  }
  0x95   :  { %2076 = vmatprep.subr.bf16.mxu0 %v2974_v59  ;;  %v3887_v59 = vld [vmem:[%s4113_s0 + $0x58] sm:$0xff] }
  0x96   :  { %v3116_v49 = vld [vmem:[%s4112_s1 + $0x7d0] ss:$8 sps:$4 sm:$0xff]  }
  0x97   :  { %1865 = vmatpush1.bf16.msra.mxu1 %v2969_v60  ;;  %v3892_v60 = vld [vmem:[%s4113_s0 + $0x38] sm:$0xff] }
  0x98   :  { %2077 = vmatpush1.bf16.msra.mxu0 %v2972_v61  ;;  %1866 = vmatprep.subr.bf16.mxu1 %v2977_v62  ;;  %v3897_v61 = vld [vmem:[%s4113_s0 + $0x78] sm:$0xff]  ;;  %v3047_v62 = vld [vmem:[%s4112_s1 + $0x320] ss:$8 sps:$4 sm:$0xff]  }
  0x99   :  { %2078 = vmatprep.subr.bf16.mxu0 %v2980_v63  ;;  %v3050_v63 = vld [vmem:[%s4112_s1 + $0x720] ss:$8 sps:$4 sm:$0xff]  }
  0x9b   :  { %1867 = vmatpush1.bf16.msra.mxu1 %v2975_v0  ;;  %v3055_v0 = vld [vmem:[%s4112_s1 + $0x334] ss:$8 sps:$4 sm:$0xff]  }
  0x9c   :  { %2079 = vmatpush1.bf16.msra.mxu0 %v2978_v1  ;;  %1868 = vmatprep.subr.bf16.mxu1 %v2983_v2  ;;  %v3058_v1 = vld [vmem:[%s4112_s1 + $0x734] ss:$8 sps:$4 sm:$0xff]   ;;  %v2409_v2 = vcombine.high %v3882_v56, %v3887_v59 }
  0x9d   :  { %2080 = vmatprep.subr.bf16.mxu0 %v2986_v3  ;;  %v2417_v3 = vcombine.high %v3892_v60, %v3897_v61 }
  0x9f   :  { %1869 = vmatpush1.bf16.msra.mxu1 %v2981_v4  ;;  %v3053_v4 = vld [vmem:[%s4112_s1 + $0x330] ss:$8 sps:$4 sm:$0xff]  }
  0xa0   :  { %2081 = vmatpush1.bf16.msra.mxu0 %v2984_v5  ;;  %1870 = vmatprep.subr.bf16.mxu1 %v2989_v6  ;;  %v3056_v5 = vld [vmem:[%s4112_s1 + $0x730] ss:$8 sps:$4 sm:$0xff]   ;;  %v3061_v6 = vld [vmem:[%s4112_s1 + $0x344] ss:$8 sps:$4 sm:$0xff]  }
  0xa1   :  { %2082 = vmatprep.subr.bf16.mxu0 %v2992_v7  ;;  %v3064_v7 = vld [vmem:[%s4112_s1 + $0x744] ss:$8 sps:$4 sm:$0xff]  }
  0xa3   :  { %1871 = vmatpush1.bf16.msra.mxu1 %v2987_v8  ;;  %v3059_v8 = vld [vmem:[%s4112_s1 + $0x340] ss:$8 sps:$4 sm:$0xff]  }
  0xa4   :  { %2083 = vmatpush1.bf16.msra.mxu0 %v2990_v9  ;;  %1872 = vmatprep.subr.bf16.mxu1 %v2995_v10  ;;  %v3062_v9 = vld [vmem:[%s4112_s1 + $0x740] ss:$8 sps:$4 sm:$0xff]   ;;  %v3067_v10 = vld [vmem:[%s4112_s1 + $0x354] ss:$8 sps:$4 sm:$0xff]  }
  0xa5   :  { %2084 = vmatprep.subr.bf16.mxu0 %v2998_v11  ;;  %v3070_v11 = vld [vmem:[%s4112_s1 + $0x754] ss:$8 sps:$4 sm:$0xff]  }
  0xa7   :  { %1873 = vmatpush1.bf16.msra.mxu1 %v2993_v12  ;;  %v3065_v12 = vld [vmem:[%s4112_s1 + $0x350] ss:$8 sps:$4 sm:$0xff]  }
  0xa8   :  { %2085 = vmatpush1.bf16.msra.mxu0 %v2996_v13  ;;  %1874 = vmatprep.subr.bf16.mxu1 %v3001_v14  ;;  %v3068_v13 = vld [vmem:[%s4112_s1 + $0x750] ss:$8 sps:$4 sm:$0xff]   ;;  %v3073_v14 = vld [vmem:[%s4112_s1 + $0x364] ss:$8 sps:$4 sm:$0xff]  }
  0xa9   :  { %2086 = vmatprep.subr.bf16.mxu0 %v3004_v15  ;;  %v3076_v15 = vld [vmem:[%s4112_s1 + $0x764] ss:$8 sps:$4 sm:$0xff]  }
  0xab   :  { %1875 = vmatpush1.bf16.msra.mxu1 %v2999_v16  ;;  %v3071_v16 = vld [vmem:[%s4112_s1 + $0x360] ss:$8 sps:$4 sm:$0xff]  }
  0xac   :  { %2087 = vmatpush1.bf16.msra.mxu0 %v3002_v17  ;;  %1876 = vmatprep.subr.bf16.mxu1 %v3007_v18  ;;  %v3074_v17 = vld [vmem:[%s4112_s1 + $0x760] ss:$8 sps:$4 sm:$0xff]   ;;  %v3079_v18 = vld [vmem:[%s4112_s1 + $0x374] ss:$8 sps:$4 sm:$0xff]  }
  0xad   :  { %2088 = vmatprep.subr.bf16.mxu0 %v3010_v19  ;;  %v3082_v19 = vld [vmem:[%s4112_s1 + $0x774] ss:$8 sps:$4 sm:$0xff]  }
  0xaf   :  { %1877 = vmatpush1.bf16.msra.mxu1 %v3005_v20  ;;  %v3077_v20 = vld [vmem:[%s4112_s1 + $0x370] ss:$8 sps:$4 sm:$0xff]  }
  0xb0   :  { %2089 = vmatpush1.bf16.msra.mxu0 %v3008_v21  ;;  %1878 = vmatprep.subr.bf16.mxu1 %v3013_v22  ;;  %v3080_v21 = vld [vmem:[%s4112_s1 + $0x770] ss:$8 sps:$4 sm:$0xff]   ;;  %v3085_v22 = vld [vmem:[%s4112_s1 + $0x384] ss:$8 sps:$4 sm:$0xff]  }
  0xb1   :  { %2090 = vmatprep.subr.bf16.mxu0 %v3016_v23  ;;  %v3088_v23 = vld [vmem:[%s4112_s1 + $0x784] ss:$8 sps:$4 sm:$0xff]  }
  0xb3   :  { %1879 = vmatpush1.bf16.msra.mxu1 %v3011_v24  ;;  %v3083_v24 = vld [vmem:[%s4112_s1 + $0x380] ss:$8 sps:$4 sm:$0xff]  }
  0xb4   :  { %2091 = vmatpush1.bf16.msra.mxu0 %v3014_v25  ;;  %1880 = vmatprep.subr.bf16.mxu1 %v3019_v26  ;;  %v3086_v25 = vld [vmem:[%s4112_s1 + $0x780] ss:$8 sps:$4 sm:$0xff]   ;;  %v3091_v26 = vld [vmem:[%s4112_s1 + $0x394] ss:$8 sps:$4 sm:$0xff]  }
  0xb5   :  { %2092 = vmatprep.subr.bf16.mxu0 %v3022_v27  ;;  %v3094_v27 = vld [vmem:[%s4112_s1 + $0x794] ss:$8 sps:$4 sm:$0xff]  }
  0xb7   :  { %1881 = vmatpush1.bf16.msra.mxu1 %v3017_v28  ;;  %v3089_v28 = vld [vmem:[%s4112_s1 + $0x390] ss:$8 sps:$4 sm:$0xff]  }
  0xb8   :  { %2093 = vmatpush1.bf16.msra.mxu0 %v3020_v29  ;;  %1882 = vmatprep.subr.bf16.mxu1 %v3025_v30  ;;  %v3092_v29 = vld [vmem:[%s4112_s1 + $0x790] ss:$8 sps:$4 sm:$0xff]   ;;  %v3097_v30 = vld [vmem:[%s4112_s1 + $0x3a4] ss:$8 sps:$4 sm:$0xff]  }
  0xb9   :  { %2094 = vmatprep.subr.bf16.mxu0 %v3028_v31  ;;  %v3100_v31 = vld [vmem:[%s4112_s1 + $0x7a4] ss:$8 sps:$4 sm:$0xff]  }
  0xbb   :  { %1883 = vmatpush1.bf16.msra.mxu1 %v3023_v32  ;;  %v3095_v32 = vld [vmem:[%s4112_s1 + $0x3a0] ss:$8 sps:$4 sm:$0xff]  }
  0xbc   :  { %2095 = vmatpush1.bf16.msra.mxu0 %v3026_v33  ;;  %1884 = vmatprep.subr.bf16.mxu1 %v3031_v34  ;;  %v3098_v33 = vld [vmem:[%s4112_s1 + $0x7a0] ss:$8 sps:$4 sm:$0xff]   ;;  %v3103_v34 = vld [vmem:[%s4112_s1 + $0x3b4] ss:$8 sps:$4 sm:$0xff]  }
  0xbd   :  { %2096 = vmatprep.subr.bf16.mxu0 %v3034_v35  ;;  %v3106_v35 = vld [vmem:[%s4112_s1 + $0x7b4] ss:$8 sps:$4 sm:$0xff]  }
  0xbf   :  { %1885 = vmatpush1.bf16.msra.mxu1 %v3029_v36  ;;  %v3101_v36 = vld [vmem:[%s4112_s1 + $0x3b0] ss:$8 sps:$4 sm:$0xff]  }
  0xc0   :  { %2097 = vmatpush1.bf16.msra.mxu0 %v3032_v37  ;;  %1907 = vmatprep.subr.bf16.mxu1 %v3037_v38  ;;  %v3104_v37 = vld [vmem:[%s4112_s1 + $0x7b0] ss:$8 sps:$4 sm:$0xff]   ;;  %v3109_v38 = vld [vmem:[%s4112_s1 + $0x3c4] ss:$8 sps:$4 sm:$0xff]  }
  0xc1   :  { %2119 = vmatprep.subr.bf16.mxu0 %v3040_v39  ;;  %v3112_v39 = vld [vmem:[%s4112_s1 + $0x7c4] ss:$8 sps:$4 sm:$0xff]  }
  0xc2   :  { %1887 = vmatmul.mubr.bf16.vlgmr.msra.gmra.mrb[0].mxu1 %v2406_v41  ;;  %v3110_v41 = vld [vmem:[%s4112_s1 + $0x7c0] ss:$8 sps:$4 sm:$0xff]  }
  0xc3   :  { %2099 = vmatmul.mubr.bf16.vlgmr.msra.gmra.mrb[0].mxu0 %v2414_v43  ;;  %1908 = vmatpush1.bf16.msra.mxu1 %v3035_v42  ;;  %v3115_v43 = vld [vmem:[%s4112_s1 + $0x3d4] ss:$8 sps:$4 sm:$0xff]   ;;  %v3121_v42 = vld [vmem:[%s4112_s1 + $0x3e4] ss:$8 sps:$4 sm:$0xff]  }
  0xc4   :  { %2120 = vmatpush1.bf16.msra.mxu0 %v3038_v45  ;;  %1909 = vmatprep.subr.bf16.mxu1 %v3043_v46  ;;  %v3124_v45 = vld [vmem:[%s4112_s1 + $0x7e4] ss:$8 sps:$4 sm:$0xff]   ;;  %v3119_v46 = vld [vmem:[%s4112_s1 + $0x3e0] ss:$8 sps:$4 sm:$0xff]  }
  0xc5   :  { %2121 = vmatprep.subr.bf16.mxu0 %v3046_v47  ;;  %1896 = vmatprep.mubr.bf16.mxu1 %v2423_v50  ;;  %v3122_v47 = vld [vmem:[%s4112_s1 + $0x7e0] ss:$8 sps:$4 sm:$0xff]   ;;  %v3127_v50 = vld [vmem:[%s4112_s1 + $0x3f4] ss:$8 sps:$4 sm:$0xff]  }
  0xc6   :  { %2108 = vmatprep.mubr.bf16.mxu0 %v2431_v51  ;;  %v3130_v51 = vld [vmem:[%s4112_s1 + $0x7f4] ss:$8 sps:$4 sm:$0xff]  }
  0xc7   :  { %1910 = vmatpush1.bf16.msra.mxu1 %v3041_v52  ;;  %v3125_v52 = vld [vmem:[%s4112_s1 + $0x3f0] ss:$8 sps:$4 sm:$0xff]  }
  0xc8   :  { %2122 = vmatpush1.bf16.msra.mxu0 %v3044_v53  ;;  %1911 = vmatprep.subr.bf16.mxu1 %v3049_v54  ;;  %v3128_v53 = vld [vmem:[%s4112_s1 + $0x7f0] ss:$8 sps:$4 sm:$0xff]  }
  0xc9   :  { %2123 = vmatprep.subr.bf16.mxu0 %v3052_v55  ;;  %v39_v54 = vld [vmem:[%s4113_s0 + $0x98] sm:$0xff] }
  0xca   :  { %1897 = vmatmul.mubr.bf16.gmra.mrb[4].mxu1 %v2422_v57  ;;  %v47_v55 = vld [vmem:[%s4113_s0 + $0xd8] sm:$0xff] }
  0xcb   :  { %2109 = vmatmul.mubr.bf16.gmra.mrb[4].mxu0 %v2430_v58  ;;  %1912 = vmatpush1.bf16.msra.mxu1 %v3047_v62  ;;  %v43_v57 = vld [vmem:[%s4113_s0 + $0xb8] sm:$0xff]  ;;  %v2408_v62 = vcombine.low %v3882_v56, %v3887_v59 }
  0xcc   :  { %2124 = vmatpush1.bf16.msra.mxu0 %v3050_v63  ;;  %1913 = vmatprep.subr.bf16.mxu1 %v3055_v0  ;;  %v51_v58 = vld [vmem:[%s4113_s0 + $0xf8] sm:$0xff]  ;;  %v2416_v63 = vcombine.low %v3892_v60, %v3897_v61  ;;  %v2425_v0 = vcombine.high %v39_v54, %v47_v55 }
  0xcd   :  { %2125 = vmatprep.subr.bf16.mxu0 %v3058_v1  ;;  %1939 = vmatprep.mubr.bf16.mxu1 %v2409_v2  ;;  %v2433_v1 = vcombine.high %v43_v57, %v51_v58  ;;  %v2424_v2 = vcombine.low %v39_v54, %v47_v55 }
  0xce   :  { %2151 = vmatprep.mubr.bf16.mxu0 %v2417_v3  ;;  %v2432_v3 = vcombine.low %v43_v57, %v51_v58 }
  0xcf   :  { %1914 = vmatpush1.bf16.msra.mxu1 %v3053_v4 }
  0xd0   :  { %2126 = vmatpush1.bf16.msra.mxu0 %v3056_v5  ;;  %1915 = vmatprep.subr.bf16.mxu1 %v3061_v6 }
  0xd1   :  { %2127 = vmatprep.subr.bf16.mxu0 %v3064_v7 }
  0xd3   :  { %1916 = vmatpush1.bf16.msra.mxu1 %v3059_v8 }
  0xd4   :  { %2128 = vmatpush1.bf16.msra.mxu0 %v3062_v9  ;;  %1917 = vmatprep.subr.bf16.mxu1 %v3067_v10 }
  0xd5   :  { %2129 = vmatprep.subr.bf16.mxu0 %v3070_v11 }
  0xd7   :  { %1918 = vmatpush1.bf16.msra.mxu1 %v3065_v12 }
  0xd8   :  { %2130 = vmatpush1.bf16.msra.mxu0 %v3068_v13  ;;  %1919 = vmatprep.subr.bf16.mxu1 %v3073_v14 }
  0xd9   :  { %2131 = vmatprep.subr.bf16.mxu0 %v3076_v15 }
  0xdb   :  { %1920 = vmatpush1.bf16.msra.mxu1 %v3071_v16 }
  0xdc   :  { %2132 = vmatpush1.bf16.msra.mxu0 %v3074_v17  ;;  %1921 = vmatprep.subr.bf16.mxu1 %v3079_v18 }
  0xdd   :  { %2133 = vmatprep.subr.bf16.mxu0 %v3082_v19 }
  0xdf   :  { %1922 = vmatpush1.bf16.msra.mxu1 %v3077_v20 }
  0xe0   :  { %2134 = vmatpush1.bf16.msra.mxu0 %v3080_v21  ;;  %1923 = vmatprep.subr.bf16.mxu1 %v3085_v22 }
  0xe1   :  { %2135 = vmatprep.subr.bf16.mxu0 %v3088_v23 }
  0xe3   :  { %1924 = vmatpush1.bf16.msra.mxu1 %v3083_v24 }
  0xe4   :  { %2136 = vmatpush1.bf16.msra.mxu0 %v3086_v25  ;;  %1925 = vmatprep.subr.bf16.mxu1 %v3091_v26 }
  0xe5   :  { %2137 = vmatprep.subr.bf16.mxu0 %v3094_v27 }
  0xe7   :  { %1926 = vmatpush1.bf16.msra.mxu1 %v3089_v28 }
  0xe8   :  { %2138 = vmatpush1.bf16.msra.mxu0 %v3092_v29  ;;  %1927 = vmatprep.subr.bf16.mxu1 %v3097_v30 }
  0xe9   :  { %2139 = vmatprep.subr.bf16.mxu0 %v3100_v31 }
  0xeb   :  { %1928 = vmatpush1.bf16.msra.mxu1 %v3095_v32 }
  0xec   :  { %2140 = vmatpush1.bf16.msra.mxu0 %v3098_v33  ;;  %1929 = vmatprep.subr.bf16.mxu1 %v3103_v34 }
  0xed   :  { %2141 = vmatprep.subr.bf16.mxu0 %v3106_v35 }
  0xef   :  { %1930 = vmatpush1.bf16.msra.mxu1 %v3101_v36 }
  0xf0   :  { %2142 = vmatpush1.bf16.msra.mxu0 %v3104_v37  ;;  %1931 = vmatprep.subr.bf16.mxu1 %v3109_v38 }
  0xf1   :  { %2143 = vmatprep.subr.bf16.mxu0 %v3112_v39 }
  0xf3   :  { %1932 = vmatpush1.bf16.msra.mxu1 %v3107_v40 }
  0xf4   :  { %2144 = vmatpush1.bf16.msra.mxu0 %v3110_v41  ;;  %1933 = vmatprep.subr.bf16.mxu1 %v3115_v43 }
  0xf5   :  { %2145 = vmatprep.subr.bf16.mxu0 %v3118_v44 }
  0xf7   :  { %1934 = vmatpush1.bf16.msra.mxu1 %v3113_v48 }
  0xf8   :  { %2146 = vmatpush1.bf16.msra.mxu0 %v3116_v49  ;;  %1935 = vmatprep.subr.bf16.mxu1 %v3121_v42 }
  0xf9   :  { %2147 = vmatprep.subr.bf16.mxu0 %v3124_v45 }
  0xfb   :  { %1936 = vmatpush1.bf16.msra.mxu1 %v3119_v46 }
  0xfc   :  { %2148 = vmatpush1.bf16.msra.mxu0 %v3122_v47  ;;  %1937 = vmatprep.subr.bf16.mxu1 %v3127_v50 }
  0xfd   :  { %2149 = vmatprep.subr.bf16.mxu0 %v3130_v51 }
  0xff   :  { %1938 = vmatpush1.bf16.msra.mxu1 %v3125_v52 }
 0x100   :  { %2150 = vmatpush1.bf16.msra.mxu0 %v3128_v53 }
 0x102   :  { %1940 = vmatmul.mubr.bf16.vlgmr.msra.gmra.mrb[0].mxu1 %v2408_v62 }
 0x103   :  { %2152 = vmatmul.mubr.bf16.vlgmr.msra.gmra.mrb[0].mxu0 %v2416_v63  ;;  %1949 = vmatprep.mubr.bf16.mxu1 %v2425_v0 }
 0x104   :  { %2161 = vmatprep.mubr.bf16.mxu0 %v2433_v1 }
 0x10a   :  { %1950 = vmatmul.mubr.bf16.gmra.mrb[4].mxu1 %v2424_v2 }
 0x10b   :  { %2162 = vmatmul.mubr.bf16.gmra.mrb[4].mxu0 %v2432_v3 }
 0x1d5   :  { %v1941_v4 = vpop.f32.mrb[0].mxu1 }
 0x1d6   :  { %v2153_v5 = vpop.f32.mrb[0].mxu0  ;;  %v1943_v7 = vpop.f32.mrb[1].mxu1 }
 0x1d7   :  { %v2691_v6 = vadd.f32 %v2153_v5, %v1941_v4  ;;  %v2155_v56 = vpop.f32.mrb[1].mxu0  ;;  %v1945_v8 = vpop.f32.mrb[2].mxu1 }
 0x1d8   :  { %v2692_v59 = vadd.f32 %v2155_v56, %v1943_v7  ;;  %v2157_v60 = vpop.f32.mrb[2].mxu0  ;;  %v1947_v9 = vpop.f32.mrb[3].mxu1 }
 0x1d9   :  { %v2693_v61 = vadd.f32 %v2157_v60, %v1945_v8  ;;  %v2159_v10 = vpop.f32.mrb[3].mxu0 }
 0x1da   :  { %v2694_v11 = vadd.f32 %v2159_v10, %v1947_v9 }
 0x1db   :  { %v2198_v12 = vadd.f32 %v2693_v61, %v2691_v6 }
 0x1dc   :  { %v2207_v13 = vadd.f32 %v2694_v11, %v2692_v59 }
 0x1dd   :  { %v1951_v14 = vpop.f32.mrb[4].mxu1 }
 0x1de   :  { %v2163_v15 = vpop.f32.mrb[4].mxu0  ;;  %v1953_v17 = vpop.f32.mrb[5].mxu1 }
 0x1df   :  { %v2695_v16 = vadd.f32 %v2163_v15, %v1951_v14  ;;  %v2165_v18 = vpop.f32.mrb[5].mxu0  ;;  %v1955_v20 = vpop.f32.mrb[6].mxu1  ;;  %v2269_v15 = vlaneseq }
 0x1e0   :  { %v2696_v19 = vadd.f32 %v2165_v18, %v1953_v17  ;;  %v2167_v21 = vpop.f32.mrb[6].mxu0  ;;  %v1957_v24 = vpop.f32.mrb[7].mxu1 }
 0x1e1   :  { %v2199_v22 = vadd.f32 %v2695_v16, %v2198_v12  ;;  %v2697_v23 = vadd.f32 %v2167_v21, %v1955_v20  ;;  %v2169_v25 = vpop.f32.mrb[7].mxu0  ;;  %v2267_v21 = vld [vmem:[%s4114_s2] sm:$0x3] }
 0x1e2   :  { %v2208_v26 = vadd.f32 %v2696_v19, %v2207_v13  ;;  %v2698_v27 = vadd.f32 %v2169_v25, %v1957_v24 }
 0x1e3   :  { %v2200_v28 = vadd.f32 %v2697_v23, %v2199_v22 }
 0x1e4   :  { %v2209_v29 = vadd.f32 %v2698_v27, %v2208_v26 }
 0x1e5   :  { %v2201_v30 = vrot.slane %v2200_v28, 4 }
 0x1e6   :  { %v2210_v31 = vrot.slane %v2209_v29, 4 }
 0x1e7   :  { %v2202_v32 = vadd.f32 %v2201_v30, %v2200_v28 }
 0x1e8   :  { %v2211_v33 = vadd.f32 %v2210_v31, %v2209_v29 }
 0x1e9   :  { %v2203_v34 = vrot.slane %v2202_v32, 2 }
 0x1ea   :  { %v2212_v35 = vrot.slane %v2211_v33, 2 }
 0x1eb   :  { %v2204_v36 = vadd.f32 %v2203_v34, %v2202_v32 }
 0x1ec   :  { %v2213_v37 = vadd.f32 %v2212_v35, %v2211_v33 }
 0x1ed   :  { %v2205_v38 = vrot.slane %v2204_v36, 1 }
 0x1ee   :  { %v2214_v39 = vrot.slane %v2213_v37, 1 }
 0x1ef   :  { %v2206_v40 = vadd.f32 %v2205_v38, %v2204_v36 }
 0x1f0   :  { %v2215_v41 = vadd.f32 %v2214_v39, %v2213_v37 }
 0x1f1   :  { %v2217_v43 = vmul.f32 0.03125, %v2206_v40 }
 0x1f2   :  { %v2218_v44 = vmul.f32 0.03125, %v2215_v41 }
 0x1f3   :  { %v2219_v48 = vsub.f32 %v2691_v6, %v2217_v43  ;;  %v2221_v49 = vsub.f32 %v2693_v61, %v2217_v43  ;;  %v2223_v42 = vsub.f32 %v2695_v16, %v2217_v43  ;;  %v2225_v45 = vsub.f32 %v2697_v23, %v2217_v43  ;;  %v2287_v23 = vld [vmem:[%s4115_s3] sm:$0x3] }
 0x1f4   :  { %v2220_v46 = vsub.f32 %v2692_v59, %v2218_v44  ;;  %v2222_v47 = vsub.f32 %v2694_v11, %v2218_v44  ;;  %v2224_v50 = vsub.f32 %v2696_v19, %v2218_v44  ;;  %v2226_v51 = vsub.f32 %v2698_v27, %v2218_v44 }
 0x1f5   :  { %v2227_v52 = vmul.f32 %v2219_v48, %v2219_v48  ;;  %v2229_v53 = vmul.f32 %v2221_v49, %v2221_v49  ;;  %v2231_v57 = vmul.f32 %v2223_v42, %v2223_v42  ;;  %v2233_v0 = vmul.f32 %v2225_v45, %v2225_v45 }
 0x1f6   :  { %v2228_v54 = vmul.f32 %v2220_v46, %v2220_v46  ;;  %v2230_v55 = vmul.f32 %v2222_v47, %v2222_v47  ;;  %v2232_v62 = vmul.f32 %v2224_v50, %v2224_v50  ;;  %v2234_v2 = vmul.f32 %v2226_v51, %v2226_v51 }
 0x1f7   :  { %v2235_v58 = vadd.f32 %v2229_v53, %v2227_v52  ;;  %v4082_v19 = vshrl.u32 %v2269_v15, 7 }
 0x1f8   :  { %v2244_v63 = vadd.f32 %v2230_v55, %v2228_v54 }
 0x1f9   :  { %v2236_v1 = vadd.f32 %v2235_v58, %v2231_v57  ;;  %v2271_v20 = vsub.s32 0, %v4082_v19  ;;  %v2275_v22 = vsub.s32 1, %v4082_v19 }
 0x1fa   :  { %v2245_v3 = vadd.f32 %v2244_v63, %v2232_v62 }
 0x1fb   :  { %v2237_v4 = vadd.f32 %v2236_v1, %v2233_v0  ;;  %v2272_v24 = vrot.slane %v2267_v21, %v2271_v20  ;;  %v2292_v26 = vrot.slane %v2287_v23, %v2271_v20  ;;  %v2276_v27 = vrot.slane %v2267_v21, %v2275_v22 }
 0x1fc   :  { %v2246_v5 = vadd.f32 %v2245_v3, %v2234_v2  ;;  %v2296_v28 = vrot.slane %v2287_v23, %v2275_v22 }
 0x1fd   :  { %v2238_v6 = vrot.slane %v2237_v4, 4 }
 0x1fe   :  { %v2247_v7 = vrot.slane %v2246_v5, 4 }
 0x1ff   :  { %v2239_v56 = vadd.f32 %v2238_v6, %v2237_v4 }
 0x200   :  { %v2248_v59 = vadd.f32 %v2247_v7, %v2246_v5 }
 0x201   :  { %v2240_v8 = vrot.slane %v2239_v56, 2 }
 0x202   :  { %v2249_v60 = vrot.slane %v2248_v59, 2 }
 0x203   :  { %v2241_v61 = vadd.f32 %v2240_v8, %v2239_v56  ;;  %v2333_v8 = vld [vmem:[%s4116_s4 + $0x10] sm:$0xff] }
 0x204   :  { %v2250_v9 = vadd.f32 %v2249_v60, %v2248_v59  ;;  %v2334_v60 = vld [vmem:[%s4116_s4 + $0x18] sm:$0xff] }
 0x205   :  { %v2242_v10 = vrot.slane %v2241_v61, 1 }
 0x206   :  { %v2251_v11 = vrot.slane %v2250_v9, 1 }
 0x207   :  { %v2243_v12 = vadd.f32 %v2242_v10, %v2241_v61 }
 0x208   :  { %v2252_v13 = vadd.f32 %v2251_v11, %v2250_v9 }
 0x209   :  { %v2253_v14 = vmul.f32 0.03125, %v2243_v12 }
 0x20a   :  { %v2254_v16 = vmul.f32 0.03125, %v2252_v13 }
 0x20b   :  { %v2255_v17 = vadd.f32 1e-05, %v2253_v14 }
 0x20c   :  { %v2256_v18 = vadd.f32 1e-05, %v2254_v16 }
 0x20d   :  { %3131 = vrsqrt.f32 %v2255_v17 }
 0x20e   :  { %3133 = vrsqrt.f32 %v2256_v18 }
 0x217   :  { %v3132_v25 = vpop.eup %3131 }
 0x218   :  { %v3134_v29 = vpop.eup %3133  ;;  %v2265_v30 = vmul.f32 %v3132_v25, %v2225_v45  ;;  %v2263_v31 = vmul.f32 %v3132_v25, %v2223_v42  ;;  %v2259_v32 = vmul.f32 %v3132_v25, %v2219_v48  ;;  %v2261_v33 = vmul.f32 %v3132_v25, %v2221_v49  ;;  %v2331_v48 = vld [vmem:[%s4116_s4] sm:$0xff]  ;;  %v2332_v49 = vld [vmem:[%s4116_s4 + $0x8] sm:$0xff] }
 0x219   :  { %v2266_v34 = vmul.f32 %v3134_v29, %v2226_v51  ;;  %v2264_v35 = vmul.f32 %v3134_v29, %v2224_v50  ;;  %v2260_v36 = vmul.f32 %v3134_v29, %v2220_v46  ;;  %v2262_v37 = vmul.f32 %v3134_v29, %v2222_v47 }
 0x21a   :  { %v2285_v38 = vmul.f32 %v2272_v24, %v2265_v30  ;;  %v2283_v39 = vmul.f32 %v2272_v24, %v2263_v31  ;;  %v2279_v40 = vmul.f32 %v2272_v24, %v2259_v32  ;;  %v2281_v41 = vmul.f32 %v2272_v24, %v2261_v33 }
 0x21b   :  { %v2286_v43 = vmul.f32 %v2276_v27, %v2266_v34  ;;  %v2284_v44 = vmul.f32 %v2276_v27, %v2264_v35  ;;  %v2280_v52 = vmul.f32 %v2276_v27, %v2260_v36  ;;  %v2282_v53 = vmul.f32 %v2276_v27, %v2262_v37 }
 0x21c   :  { %v2305_v54 = vadd.f32 %v2292_v26, %v2285_v38  ;;  %v2303_v55 = vadd.f32 %v2292_v26, %v2283_v39  ;;  %v2299_v57 = vadd.f32 %v2292_v26, %v2279_v40  ;;  %v2301_v58 = vadd.f32 %v2292_v26, %v2281_v41 }
 0x21d   :  { %v2306_v45 = vadd.f32 %v2296_v28, %v2286_v43  ;;  %v2304_v42 = vadd.f32 %v2296_v28, %v2284_v44  ;;  %v2300_v46 = vadd.f32 %v2296_v28, %v2280_v52  ;;  %v2302_v47 = vadd.f32 %v2296_v28, %v2282_v53 }
 0x21e   :  { %vm2311_vm0 = vcmp.gt.f32.partialorder %v2303_v55, 0.0  ;;  %v2319_v50 = vmul.f32 0.2, %v2303_v55  ;;  %vm2307_vm1 = vcmp.gt.f32.partialorder %v2299_v57, 0.0  ;;  %v2315_v51 = vmul.f32 0.2, %v2299_v57 }
 0x21f   :  { %vm2312_vm2 = vcmp.gt.f32.partialorder %v2304_v42, 0.0  ;;  %v2320_v62 = vmul.f32 0.2, %v2304_v42  ;;  %vm2308_vm3 = vcmp.gt.f32.partialorder %v2300_v46, 0.0  ;;  %v2316_v63 = vmul.f32 0.2, %v2300_v46 }
 0x220   :  { %v2327_v0 = vsel %vm2311_vm0, %v2303_v55, %v2319_v50  ;;  %v2323_v1 = vsel %vm2307_vm1, %v2299_v57, %v2315_v51  ;;  %vm2313_vm4 = vcmp.gt.f32.partialorder %v2305_v54, 0.0  ;;  %vm2314_vm5 = vcmp.gt.f32.partialorder %v2306_v45, 0.0 }
 0x221   :  { %v2328_v2 = vsel %vm2312_vm2, %v2304_v42, %v2320_v62  ;;  %v2339_v3 = vmul.f32 %v2331_v48, %v2327_v0  ;;  %v2324_v4 = vsel %vm2308_vm3, %v2300_v46, %v2316_v63  ;;  %v2335_v5 = vmul.f32 %v2331_v48, %v2323_v1 }
 0x222   :  { %v2340_v6 = vmul.f32 %v2332_v49, %v2328_v2  ;;  %v2336_v7 = vmul.f32 %v2332_v49, %v2324_v4  ;;  %v2321_v56 = vmul.f32 0.2, %v2305_v54  ;;  %v2322_v59 = vmul.f32 0.2, %v2306_v45 }
 0x223   :  { %vm2309_vm6 = vcmp.gt.f32.partialorder %v2301_v58, 0.0  ;;  %vm2310_vm7 = vcmp.gt.f32.partialorder %v2302_v47, 0.0  ;;  %v2317_v61 = vmul.f32 0.2, %v2301_v58  ;;  %v2318_v9 = vmul.f32 0.2, %v2302_v47 }
 0x224   :  { %v2349_v10 = vadd.f32 %v2340_v6, %v2339_v3  ;;  %v2343_v11 = vadd.f32 %v2336_v7, %v2335_v5  ;;  %v2329_v12 = vsel %vm2313_vm4, %v2305_v54, %v2321_v56  ;;  %v2330_v13 = vsel %vm2314_vm5, %v2306_v45, %v2322_v59 }
 0x225   :  { %v2341_v14 = vmul.f32 %v2333_v8, %v2329_v12  ;;  %v2342_v16 = vmul.f32 %v2334_v60, %v2330_v13  ;;  %v2325_v17 = vsel %vm2309_vm6, %v2301_v58, %v2317_v61  ;;  %v2326_v18 = vsel %vm2310_vm7, %v2302_v47, %v2318_v9 }
 0x226   :  { %2350 = vadd.xlane.f32.xlu1 %v2349_v10  ;;  %2344 = vadd.xlane.f32.xlu0 %v2343_v11  ;;  %v2337_v20 = vmul.f32 %v2333_v8, %v2325_v17  ;;  %v2338_v21 = vmul.f32 %v2334_v60, %v2326_v18  ;;  %v2360_v24 = vand.u32 127, %v2269_v15 }
 0x227   :  { %v2352_v22 = vadd.f32 %v2342_v16, %v2341_v14 }
 0x228   :  { %v2346_v23 = vadd.f32 %v2338_v21, %v2337_v20  ;;  %v2365_v25 = vadd.s32 4294967288, %v2360_v24  ;;  %v2363_v28 = vsub.s32 %v2360_v24, %v4082_v19 }
 0x22a   :  { %2353 = vadd.xlane.f32.xlu1 %v2352_v22  ;;  %2347 = vadd.xlane.f32.xlu0 %v2346_v23  ;;  %v2368_v29 = vsub.s32 %v2365_v25, %v4082_v19 }
 0x2b3   :  { %v2351_v26 = vpop.xlane.xlu1 %2350  ;;  %v2345_v27 = vpop.xlane.xlu0 %2344 }
 0x2b4   :  { %v2375_v32 = vrot.slane %v2351_v26, %v2363_v28  ;;  %v2364_v33 = vrot.slane %v2345_v27, %v2363_v28 }
 0x2b7   :  { %v2354_v30 = vpop.xlane.xlu1 %2353  ;;  %v2348_v31 = vpop.xlane.xlu0 %2347 }
 0x2b8   :  { %v2379_v34 = vrot.slane %v2354_v30, %v2368_v29  ;;  %v2369_v35 = vrot.slane %v2348_v31, %v2368_v29 }
 0x2ba   :  { %v2371_v36 = vsel %vm2370_vm8, %v2369_v35, %v2364_v33  ;;  %v2380_v37 = vsel %vm2370_vm8, %v2379_v34, %v2375_v32 }
 0x2bb   :  { %v2382_v38 = vsel %vm2381_vm9, %v2380_v37, %v2371_v36 }
 0x2bc   :  { %v2385_v15 = vsel %vm2384_vm10, %v2382_v38, 0.0 }
 0x2bd   :  { %2386 = vadd.xlane.f32.xlu0 %v2385_v15 }
 0x34a   :  { %v2387_v39 = vpop.xlane.xlu0 %2386 }
 0x34b   :  { %v2690_v40 = vmul.f32 -1.442695, %v2387_v39 }
 0x34d   :  { %3135 = vpow2.f32 %v2690_v40 }
 0x357   :  { %v3136_v41 = vpop.eup %3135 }
 0x358   :  { %v2391_v43 = vadd.f32 1.0, %v3136_v41 }
 0x35a   :  { %3137 = vrcp.f32 %v2391_v43 }
 0x364   :  { %v3138_v19 = vpop.eup %3137 }
 0x365   :  { %2395 = vst.msk [vmem:[%s4117_s5] sm:$0x3] %vm2394_vm11, %v3138_v19 }

</bundles_post_ra>
